<compile_context>
chip_gen: v5e
topology: v5e:2x2
jax: 0.10.0
libtpu: 0.0.40
codegen_flags: <defaults>
</compile_context>

<pallas_src>
import jax
import jax.numpy as jnp
from jax import lax
from jax.experimental import pallas as pl
from jax.experimental.pallas import tpu as pltpu

EPS = 1e-5
LANE = 128


def _round_up(x, m):
    return ((x + m - 1) // m) * m


# ------------------------------ Pallas kernel ------------------------------ #

def _bottleneck_kernel(x_ref, w1_ref, b1_ref, w2_ref, b2_ref, w3_ref, b3_ref,
                       o_ref, h1pad_ref, acc_ref):
    # x_ref : (1, H, W, Cp)       input image block (channels padded to 128)
    # w1    : (Cp, Cm)  b1: (1, Cm)        folded conv1+bn1
    # w2    : (3, 3*Cm, Cm)  b2: (1, Cm)   folded conv2+bn2, kw folded into K
    # w3    : (Cm, Cp)  b3: (1, Cp)        folded conv3+bn3
    # o_ref : (1, H, W, Cp)
    # h1pad_ref : VMEM (H+2, W+2, Cm) zero-padded h1 (stays on-chip)
    # acc_ref   : VMEM (H*W, Cm) f32 conv2 accumulator
    _, H, W, Cp = x_ref.shape
    Cm = w1_ref.shape[1]

    # ---- conv1 (1x1) + bn1 + relu ----
    x2d = x_ref[0].reshape(H * W, Cp)
    h1 = jnp.dot(x2d, w1_ref[...], preferred_element_type=jnp.float32)
    h1 = jnp.maximum(h1 + b1_ref[...], 0.0)

    # ---- zero-padded h1 kept entirely in VMEM (padding must be true zeros) ----
    h1pad_ref[...] = jnp.zeros_like(h1pad_ref)
    h1pad_ref[1:H + 1, 1:W + 1, :] = h1.reshape(H, W, Cm)

    # ---- conv2 (3x3, stride 1, pad 1) + bn2 + relu ----
    # 3 deep matmuls, each K = 3*Cm (the kw taps are concatenated on the lane dim)
    acc_ref[...] = jnp.zeros_like(acc_ref)
    for kh in range(3):
        rows = h1pad_ref[kh:kh + H, :, :]                       # (H, W+2, Cm)
        patch = jnp.concatenate(
            [rows[:, 0:W, :], rows[:, 1:W + 1, :], rows[:, 2:W + 2, :]],
            axis=-1).reshape(H * W, 3 * Cm)                     # (H*W, 3*Cm)
        acc_ref[...] += jnp.dot(patch, w2_ref[kh],
                                preferred_element_type=jnp.float32)
    h2 = jnp.maximum(acc_ref[...] + b2_ref[...], 0.0)           # (H*W, Cm)

    # ---- conv3 (1x1) + bn3 + residual add + relu ----
    y = jnp.dot(h2, w3_ref[...], preferred_element_type=jnp.float32)
    y = y + b3_ref[...] + x2d.astype(jnp.float32)
    o_ref[0] = jnp.maximum(y, 0.0).reshape(H, W, Cp).astype(o_ref.dtype)


def bottleneck_block_pallas(x_nhwc, w1, b1, w2f, b2, w3, b3):
    """Fused bottleneck. x_nhwc: (N, H, W, Cp) with Cp, Cm multiples of 128."""
    N, H, W, Cp = x_nhwc.shape
    Cm = w1.shape[1]
    return pl.pallas_call(
        _bottleneck_kernel,
        out_shape=jax.ShapeDtypeStruct((N, H, W, Cp), x_nhwc.dtype),
        grid_spec=pltpu.PrefetchScalarGridSpec(
            num_scalar_prefetch=0,
            grid=(N,),
            in_specs=[
                pl.BlockSpec((1, H, W, Cp), lambda n: (n, 0, 0, 0)),
                pl.BlockSpec((Cp, Cm), lambda n: (0, 0)),
                pl.BlockSpec((1, Cm), lambda n: (0, 0)),
                pl.BlockSpec((3, 3 * Cm, Cm), lambda n: (0, 0, 0)),
                pl.BlockSpec((1, Cm), lambda n: (0, 0)),
                pl.BlockSpec((Cm, Cp), lambda n: (0, 0)),
                pl.BlockSpec((1, Cp), lambda n: (0, 0)),
            ],
            out_specs=pl.BlockSpec((1, H, W, Cp), lambda n: (n, 0, 0, 0)),
            scratch_shapes=[
                pltpu.VMEM((H + 2, W + 2, Cm), jnp.float32),  # padded h1
                pltpu.VMEM((H * W, Cm), jnp.float32),         # conv2 accumulator
            ],
        ),
        compiler_params=pltpu.CompilerParams(
            dimension_semantics=("parallel",),
            vmem_limit_bytes=48 * 1024 * 1024,
        ),
    )(x_nhwc, w1, b1, w2f, b2, w3, b3)


# --------------------------- parameters / glue ------------------------------ #

def fold_bn(w, b, gamma, beta, mean, var, eps=EPS):
    """Fold eval-mode BatchNorm into a conv whose weight has Cout as last axis."""
    scale = gamma / jnp.sqrt(var + eps)
    return w * scale, (b - mean) * scale + beta


def init_params(key, in_channels, out_channels, expansion=4):
    cmid = out_channels
    cout = out_channels * expansion
    ks = jax.random.split(key, 12)

    def conv_w(k, shape, fan_in):
        bound = 1.0 / jnp.sqrt(fan_in)
        return jax.random.uniform(k, shape, jnp.float32, -bound, bound)

    p = {}
    p["w1"] = conv_w(ks[0], (in_channels, cmid), in_channels)        # (Cin, Cmid)
    p["b1"] = conv_w(ks[1], (cmid,), in_channels)
    p["w2"] = conv_w(ks[2], (3, 3, cmid, cmid), cmid * 9)            # HWIO
    p["b2"] = conv_w(ks[3], (cmid,), cmid * 9)
    p["w3"] = conv_w(ks[4], (cmid, cout), cmid)                      # (Cmid, Cout)
    p["b3"] = conv_w(ks[5], (cout,), cmid)
    for i, c in ((1, cmid), (2, cmid), (3, cout)):
        p[f"g{i}"] = jax.random.uniform(ks[5 + i], (c,), jnp.float32, 0.5, 1.5)
        p[f"be{i}"] = jax.random.normal(ks[8 + i - 1], (c,)) * 0.1
        p[f"m{i}"] = jax.random.normal(jax.random.fold_in(key, 100 + i), (c,)) * 0.1
        p[f"v{i}"] = jax.random.uniform(jax.random.fold_in(key, 200 + i), (c,),
                                        jnp.float32, 0.5, 1.5)
    return p


def block_forward(x_nchw, p):
    """Pallas implementation of block.forward (stride=1, identity_downsample=None)."""
    x = jnp.transpose(x_nchw, (0, 2, 3, 1))  # NCHW -> NHWC (channels on lanes)
    N, H, W, Cin = x.shape
    cmid = p["w1"].shape[1]
    cout = p["w3"].shape[1]
    assert Cin == cout, "residual path requires in_channels == out_channels*4"

    # Fold eval-mode BN into the convs, then zero-pad channels to 128 lanes.
    w1, b1 = fold_bn(p["w1"], p["b1"], p["g1"], p["be1"], p["m1"], p["v1"])
    w2, b2 = fold_bn(p["w2"], p["b2"], p["g2"], p["be2"], p["m2"], p["v2"])
    w3, b3 = fold_bn(p["w3"], p["b3"], p["g3"], p["be3"], p["m3"], p["v3"])

    Cp = _round_up(Cin, LANE)
    Cm = _round_up(cmid, LANE)

    xp = jnp.pad(x, ((0, 0), (0, 0), (0, 0), (0, Cp - Cin)))
    w1p = jnp.pad(w1, ((0, Cp - Cin), (0, Cm - cmid)))
    b1p = jnp.pad(b1, (0, Cm - cmid))[None, :]
    w2p = jnp.pad(w2, ((0, 0), (0, 0), (0, Cm - cmid), (0, Cm - cmid)))
    w2f = w2p.reshape(3, 3 * Cm, Cm)           # (kh, kw*Cm + ci, co)
    b2p = jnp.pad(b2, (0, Cm - cmid))[None, :]
    w3p = jnp.pad(w3, ((0, Cm - cmid), (0, Cp - cout)))
    b3p = jnp.pad(b3, (0, Cp - cout))[None, :]

    out = bottleneck_block_pallas(xp, w1p, b1p, w2f, b2p, w3p, b3p)
    out = out[..., :cout]
    return jnp.transpose(out, (0, 3, 1, 2))    # NHWC -> NCHW


# --------------------------- pure-JAX reference ----------------------------- #

def block_forward_ref(x_nchw, p):
    x = jnp.transpose(x_nchw, (0, 2, 3, 1))

    def bn(y, g, b, m, v):
        return (y - m) / jnp.sqrt(v + EPS) * g + b

    h = jnp.einsum("nhwc,co->nhwo", x, p["w1"]) + p["b1"]
    h = jax.nn.relu(bn(h, p["g1"], p["be1"], p["m1"], p["v1"]))
    h = lax.conv_general_dilated(h, p["w2"], (1, 1), "SAME",
                                 dimension_numbers=("NHWC", "HWIO", "NHWC")) + p["b2"]
    h = jax.nn.relu(bn(h, p["g2"], p["be2"], p["m2"], p["v2"]))
    h = jnp.einsum("nhwc,co->nhwo", h, p["w3"]) + p["b3"]
    h = bn(h, p["g3"], p["be3"], p["m3"], p["v3"])
    h = jax.nn.relu(h + x)
    return jnp.transpose(h, (0, 3, 1, 2))


if __name__ == "__main__":
    key = jax.random.PRNGKey(0)
    in_channels, out_channels = 16, 4      # in == out * expansion -> residual adds cleanly
    N, H, W = 2, 16, 16

    kx, kp = jax.random.split(key)
    x = jax.random.normal(kx, (N, in_channels, H, W), jnp.float32)  # NCHW like PyTorch
    params = init_params(kp, in_channels, out_channels)

    out = jax.jit(block_forward)(x, params)
    out = jax.block_until_ready(out)

    ref = block_forward_ref(x, params)
    assert out.shape == (N, out_channels * 4, H, W)
    assert jnp.allclose(out, ref, atol=1e-3, rtol=1e-3), "mismatch vs JAX reference"

    print("KERNEL_OK")
</pallas_src>

<mosaic_0001>
module attributes {stable_mosaic.version = 11 : i64} {
  func.func @_bottleneck_kernel(%arg0: i32, %arg1: memref<1x16x16x128xf32, #tpu.memory_space<vmem>>, %arg2: memref<128x128xf32, #tpu.memory_space<vmem>>, %arg3: memref<1x128xf32, #tpu.memory_space<vmem>>, %arg4: memref<3x384x128xf32, #tpu.memory_space<vmem>>, %arg5: memref<1x128xf32, #tpu.memory_space<vmem>>, %arg6: memref<128x128xf32, #tpu.memory_space<vmem>>, %arg7: memref<1x128xf32, #tpu.memory_space<vmem>>, %arg8: memref<1x16x16x128xf32, #tpu.memory_space<vmem>>, %arg9: memref<18x18x128xf32, #tpu.memory_space<vmem>>, %arg10: memref<256x128xf32, #tpu.memory_space<vmem>>) attributes {dimension_semantics = [#tpu.dimension_semantics<parallel>], iteration_bounds = array<i64: 2>, scalar_prefetch = 0 : i64, scratch_operands = 2 : i64, tpu.core_type = #tpu.core_type<tc>, window_params = [{transform_indices = @transform_0, window_bounds = array<i64: 1, 16, 16, 128>}, {pipeline_mode = #tpu.pipeline_mode<synchronous>, transform_indices = @transform_1, window_bounds = array<i64: 128, 128>}, {pipeline_mode = #tpu.pipeline_mode<synchronous>, transform_indices = @transform_2, window_bounds = array<i64: 1, 128>}, {pipeline_mode = #tpu.pipeline_mode<synchronous>, transform_indices = @transform_3, window_bounds = array<i64: 3, 384, 128>}, {pipeline_mode = #tpu.pipeline_mode<synchronous>, transform_indices = @transform_4, window_bounds = array<i64: 1, 128>}, {pipeline_mode = #tpu.pipeline_mode<synchronous>, transform_indices = @transform_5, window_bounds = array<i64: 128, 128>}, {pipeline_mode = #tpu.pipeline_mode<synchronous>, transform_indices = @transform_6, window_bounds = array<i64: 1, 128>}, {transform_indices = @transform_7, window_bounds = array<i64: 1, 16, 16, 128>}]} {
    %c0 = arith.constant 0 : index
    %c0_0 = arith.constant 0 : index
    %c0_1 = arith.constant 0 : index
    %c0_2 = arith.constant 0 : index
    %0 = vector.load %arg1[%c0, %c0_0, %c0_1, %c0_2] : memref<1x16x16x128xf32, #tpu.memory_space<vmem>>, vector<1x16x16x128xf32>
    %1 = vector.shape_cast %0 : vector<1x16x16x128xf32> to vector<16x16x128xf32>
    %2 = vector.shape_cast %1 : vector<16x16x128xf32> to vector<256x128xf32>
    %c0_3 = arith.constant 0 : index
    %c0_4 = arith.constant 0 : index
    %3 = vector.load %arg2[%c0_3, %c0_4] : memref<128x128xf32, #tpu.memory_space<vmem>>, vector<128x128xf32>
    %cst = arith.constant dense<0.000000e+00> : vector<256x128xf32>
    %4 = tpu.matmul %2, %3, %cst {dimension_numbers = #tpu.dot_dimension_numbers<[1], [0], [0], [1], [0, 0, 1, 1], [], []>} : vector<256x128xf32>, vector<128x128xf32>, vector<256x128xf32> -> vector<256x128xf32>
    %c0_5 = arith.constant 0 : index
    %c0_6 = arith.constant 0 : index
    %5 = vector.load %arg3[%c0_5, %c0_6] : memref<1x128xf32, #tpu.memory_space<vmem>>, vector<1x128xf32>
    %6 = vector.broadcast %5 : vector<1x128xf32> to vector<256x128xf32>
    %7 = arith.addf %4, %6 : vector<256x128xf32>
    %cst_7 = arith.constant 0.000000e+00 : f32
    %8 = vector.broadcast %cst_7 : f32 to vector<256x128xf32>
    %9 = arith.maximumf %7, %8 : vector<256x128xf32>
    %cst_8 = arith.constant 0.000000e+00 : f32
    %10 = vector.broadcast %cst_8 : f32 to vector<18x18x128xf32>
    %c0_9 = arith.constant 0 : index
    %c0_10 = arith.constant 0 : index
    %c0_11 = arith.constant 0 : index
    %11 = vector.load %arg9[%c0_9, %c0_10, %c0_11] : memref<18x18x128xf32, #tpu.memory_space<vmem>>, vector<18x18x128xf32>
    tpu.vector_store %arg9[%c0_9, %c0_10, %c0_11], %10 {strides = array<i32>} : memref<18x18x128xf32, #tpu.memory_space<vmem>>, vector<18x18x128xf32>,
    %12 = vector.shape_cast %9 : vector<256x128xf32> to vector<16x16x128xf32>
    %c1 = arith.constant 1 : index
    %c1_12 = arith.constant 1 : index
    %c0_13 = arith.constant 0 : index
    %13 = vector.load %arg9[%c1, %c1_12, %c0_13] : memref<18x18x128xf32, #tpu.memory_space<vmem>>, vector<16x16x128xf32>
    tpu.vector_store %arg9[%c1, %c1_12, %c0_13], %12 {strides = array<i32>} : memref<18x18x128xf32, #tpu.memory_space<vmem>>, vector<16x16x128xf32>,
    %cst_14 = arith.constant 0.000000e+00 : f32
    %14 = vector.broadcast %cst_14 : f32 to vector<256x128xf32>
    %c0_15 = arith.constant 0 : index
    %c0_16 = arith.constant 0 : index
    %15 = vector.load %arg10[%c0_15, %c0_16] : memref<256x128xf32, #tpu.memory_space<vmem>>, vector<256x128xf32>
    tpu.vector_store %arg10[%c0_15, %c0_16], %14 {strides = array<i32>} : memref<256x128xf32, #tpu.memory_space<vmem>>, vector<256x128xf32>,
    %c0_17 = arith.constant 0 : index
    %c0_18 = arith.constant 0 : index
    %c0_19 = arith.constant 0 : index
    %16 = vector.load %arg9[%c0_17, %c0_18, %c0_19] : memref<18x18x128xf32, #tpu.memory_space<vmem>>, vector<16x18x128xf32>
    %17 = vector.extract_strided_slice %16 {offsets = [0, 0, 0], sizes = [16, 16, 128], strides = [1, 1, 1]} : vector<16x18x128xf32> to vector<16x16x128xf32>
    %18 = vector.extract_strided_slice %16 {offsets = [0, 1, 0], sizes = [16, 16, 128], strides = [1, 1, 1]} : vector<16x18x128xf32> to vector<16x16x128xf32>
    %19 = vector.extract_strided_slice %16 {offsets = [0, 2, 0], sizes = [16, 16, 128], strides = [1, 1, 1]} : vector<16x18x128xf32> to vector<16x16x128xf32>
    %20 = tpu.concatenate %17, %18, %19 in 2 : vector<16x16x128xf32>, vector<16x16x128xf32>, vector<16x16x128xf32> -> vector<16x16x384xf32>
    %21 = vector.shape_cast %20 : vector<16x16x384xf32> to vector<256x384xf32>
    %c0_20 = arith.constant 0 : index
    %c0_21 = arith.constant 0 : index
    %22 = vector.load %arg10[%c0_20, %c0_21] : memref<256x128xf32, #tpu.memory_space<vmem>>, vector<256x128xf32>
    %c0_22 = arith.constant 0 : index
    %c0_23 = arith.constant 0 : index
    %c0_24 = arith.constant 0 : index
    %23 = vector.load %arg4[%c0_22, %c0_23, %c0_24] : memref<3x384x128xf32, #tpu.memory_space<vmem>>, vector<1x384x128xf32>
    %24 = vector.shape_cast %23 : vector<1x384x128xf32> to vector<384x128xf32>
    %cst_25 = arith.constant dense<0.000000e+00> : vector<256x128xf32>
    %25 = tpu.matmul %21, %24, %cst_25 {dimension_numbers = #tpu.dot_dimension_numbers<[1], [0], [0], [1], [0, 0, 1, 1], [], []>} : vector<256x384xf32>, vector<384x128xf32>, vector<256x128xf32> -> vector<256x128xf32>
    %26 = arith.addf %22, %25 : vector<256x128xf32>
    %c0_26 = arith.constant 0 : index
    %c0_27 = arith.constant 0 : index
    %27 = vector.load %arg10[%c0_26, %c0_27] : memref<256x128xf32, #tpu.memory_space<vmem>>, vector<256x128xf32>
    tpu.vector_store %arg10[%c0_26, %c0_27], %26 {strides = array<i32>} : memref<256x128xf32, #tpu.memory_space<vmem>>, vector<256x128xf32>,
    %c1_28 = arith.constant 1 : index
    %c0_29 = arith.constant 0 : index
    %c0_30 = arith.constant 0 : index
    %28 = vector.load %arg9[%c1_28, %c0_29, %c0_30] : memref<18x18x128xf32, #tpu.memory_space<vmem>>, vector<16x18x128xf32>
    %29 = vector.extract_strided_slice %28 {offsets = [0, 0, 0], sizes = [16, 16, 128], strides = [1, 1, 1]} : vector<16x18x128xf32> to vector<16x16x128xf32>
    %30 = vector.extract_strided_slice %28 {offsets = [0, 1, 0], sizes = [16, 16, 128], strides = [1, 1, 1]} : vector<16x18x128xf32> to vector<16x16x128xf32>
    %31 = vector.extract_strided_slice %28 {offsets = [0, 2, 0], sizes = [16, 16, 128], strides = [1, 1, 1]} : vector<16x18x128xf32> to vector<16x16x128xf32>
    %32 = tpu.concatenate %29, %30, %31 in 2 : vector<16x16x128xf32>, vector<16x16x128xf32>, vector<16x16x128xf32> -> vector<16x16x384xf32>
    %33 = vector.shape_cast %32 : vector<16x16x384xf32> to vector<256x384xf32>
    %c0_31 = arith.constant 0 : index
    %c0_32 = arith.constant 0 : index
    %34 = vector.load %arg10[%c0_31, %c0_32] : memref<256x128xf32, #tpu.memory_space<vmem>>, vector<256x128xf32>
    %c1_33 = arith.constant 1 : index
    %c0_34 = arith.constant 0 : index
    %c0_35 = arith.constant 0 : index
    %35 = vector.load %arg4[%c1_33, %c0_34, %c0_35] : memref<3x384x128xf32, #tpu.memory_space<vmem>>, vector<1x384x128xf32>
    %36 = vector.shape_cast %35 : vector<1x384x128xf32> to vector<384x128xf32>
    %cst_36 = arith.constant dense<0.000000e+00> : vector<256x128xf32>
    %37 = tpu.matmul %33, %36, %cst_36 {dimension_numbers = #tpu.dot_dimension_numbers<[1], [0], [0], [1], [0, 0, 1, 1], [], []>} : vector<256x384xf32>, vector<384x128xf32>, vector<256x128xf32> -> vector<256x128xf32>
    %38 = arith.addf %34, %37 : vector<256x128xf32>
    %c0_37 = arith.constant 0 : index
    %c0_38 = arith.constant 0 : index
    %39 = vector.load %arg10[%c0_37, %c0_38] : memref<256x128xf32, #tpu.memory_space<vmem>>, vector<256x128xf32>
    tpu.vector_store %arg10[%c0_37, %c0_38], %38 {strides = array<i32>} : memref<256x128xf32, #tpu.memory_space<vmem>>, vector<256x128xf32>,
    %c2 = arith.constant 2 : index
    %c0_39 = arith.constant 0 : index
    %c0_40 = arith.constant 0 : index
    %40 = vector.load %arg9[%c2, %c0_39, %c0_40] : memref<18x18x128xf32, #tpu.memory_space<vmem>>, vector<16x18x128xf32>
    %41 = vector.extract_strided_slice %40 {offsets = [0, 0, 0], sizes = [16, 16, 128], strides = [1, 1, 1]} : vector<16x18x128xf32> to vector<16x16x128xf32>
    %42 = vector.extract_strided_slice %40 {offsets = [0, 1, 0], sizes = [16, 16, 128], strides = [1, 1, 1]} : vector<16x18x128xf32> to vector<16x16x128xf32>
    %43 = vector.extract_strided_slice %40 {offsets = [0, 2, 0], sizes = [16, 16, 128], strides = [1, 1, 1]} : vector<16x18x128xf32> to vector<16x16x128xf32>
    %44 = tpu.concatenate %41, %42, %43 in 2 : vector<16x16x128xf32>, vector<16x16x128xf32>, vector<16x16x128xf32> -> vector<16x16x384xf32>
    %45 = vector.shape_cast %44 : vector<16x16x384xf32> to vector<256x384xf32>
    %c0_41 = arith.constant 0 : index
    %c0_42 = arith.constant 0 : index
    %46 = vector.load %arg10[%c0_41, %c0_42] : memref<256x128xf32, #tpu.memory_space<vmem>>, vector<256x128xf32>
    %c2_43 = arith.constant 2 : index
    %c0_44 = arith.constant 0 : index
    %c0_45 = arith.constant 0 : index
    %47 = vector.load %arg4[%c2_43, %c0_44, %c0_45] : memref<3x384x128xf32, #tpu.memory_space<vmem>>, vector<1x384x128xf32>
    %48 = vector.shape_cast %47 : vector<1x384x128xf32> to vector<384x128xf32>
    %cst_46 = arith.constant dense<0.000000e+00> : vector<256x128xf32>
    %49 = tpu.matmul %45, %48, %cst_46 {dimension_numbers = #tpu.dot_dimension_numbers<[1], [0], [0], [1], [0, 0, 1, 1], [], []>} : vector<256x384xf32>, vector<384x128xf32>, vector<256x128xf32> -> vector<256x128xf32>
    %50 = arith.addf %46, %49 : vector<256x128xf32>
    %c0_47 = arith.constant 0 : index
    %c0_48 = arith.constant 0 : index
    %51 = vector.load %arg10[%c0_47, %c0_48] : memref<256x128xf32, #tpu.memory_space<vmem>>, vector<256x128xf32>
    tpu.vector_store %arg10[%c0_47, %c0_48], %50 {strides = array<i32>} : memref<256x128xf32, #tpu.memory_space<vmem>>, vector<256x128xf32>,
    %c0_49 = arith.constant 0 : index
    %c0_50 = arith.constant 0 : index
    %52 = vector.load %arg10[%c0_49, %c0_50] : memref<256x128xf32, #tpu.memory_space<vmem>>, vector<256x128xf32>
    %c0_51 = arith.constant 0 : index
    %c0_52 = arith.constant 0 : index
    %53 = vector.load %arg5[%c0_51, %c0_52] : memref<1x128xf32, #tpu.memory_space<vmem>>, vector<1x128xf32>
    %54 = vector.broadcast %53 : vector<1x128xf32> to vector<256x128xf32>
    %55 = arith.addf %52, %54 : vector<256x128xf32>
    %cst_53 = arith.constant 0.000000e+00 : f32
    %56 = vector.broadcast %cst_53 : f32 to vector<256x128xf32>
    %57 = arith.maximumf %55, %56 : vector<256x128xf32>
    %c0_54 = arith.constant 0 : index
    %c0_55 = arith.constant 0 : index
    %58 = vector.load %arg6[%c0_54, %c0_55] : memref<128x128xf32, #tpu.memory_space<vmem>>, vector<128x128xf32>
    %cst_56 = arith.constant dense<0.000000e+00> : vector<256x128xf32>
    %59 = tpu.matmul %57, %58, %cst_56 {dimension_numbers = #tpu.dot_dimension_numbers<[1], [0], [0], [1], [0, 0, 1, 1], [], []>} : vector<256x128xf32>, vector<128x128xf32>, vector<256x128xf32> -> vector<256x128xf32>
    %c0_57 = arith.constant 0 : index
    %c0_58 = arith.constant 0 : index
    %60 = vector.load %arg7[%c0_57, %c0_58] : memref<1x128xf32, #tpu.memory_space<vmem>>, vector<1x128xf32>
    %61 = vector.broadcast %60 : vector<1x128xf32> to vector<256x128xf32>
    %62 = arith.addf %59, %61 : vector<256x128xf32>
    %63 = arith.addf %62, %2 : vector<256x128xf32>
    %cst_59 = arith.constant 0.000000e+00 : f32
    %64 = vector.broadcast %cst_59 : f32 to vector<256x128xf32>
    %65 = arith.maximumf %63, %64 : vector<256x128xf32>
    %66 = vector.shape_cast %65 : vector<256x128xf32> to vector<16x16x128xf32>
    %c0_60 = arith.constant 0 : index
    %c0_61 = arith.constant 0 : index
    %c0_62 = arith.constant 0 : index
    %c0_63 = arith.constant 0 : index
    %67 = vector.load %arg8[%c0_60, %c0_61, %c0_62, %c0_63] : memref<1x16x16x128xf32, #tpu.memory_space<vmem>>, vector<1x16x16x128xf32>
    %68 = vector.shape_cast %67 : vector<1x16x16x128xf32> to vector<16x16x128xf32>
    %69 = vector.shape_cast %66 : vector<16x16x128xf32> to vector<1x16x16x128xf32>
    tpu.vector_store %arg8[%c0_60, %c0_61, %c0_62, %c0_63], %69 {strides = array<i32>} : memref<1x16x16x128xf32, #tpu.memory_space<vmem>>, vector<1x16x16x128xf32>,
    return
  }
  func.func @transform_0(%arg0: i32) -> (i32, i32, i32, i32) {
    %c0_i32 = arith.constant 0 : i32
    %c0_i32_0 = arith.constant 0 : i32
    %c0_i32_1 = arith.constant 0 : i32
    %c0_i32_2 = arith.constant 0 : i32
    return %arg0, %c0_i32, %c0_i32_0, %c0_i32_1 : i32, i32, i32, i32
  }
  func.func @transform_1(%arg0: i32) -> (i32, i32) {
    %c0_i32 = arith.constant 0 : i32
    %c0_i32_0 = arith.constant 0 : i32
    %c0_i32_1 = arith.constant 0 : i32
    return %c0_i32, %c0_i32_0 : i32, i32
  }
  func.func @transform_2(%arg0: i32) -> (i32, i32) {
    %c0_i32 = arith.constant 0 : i32
    %c0_i32_0 = arith.constant 0 : i32
    %c0_i32_1 = arith.constant 0 : i32
    return %c0_i32, %c0_i32_0 : i32, i32
  }
  func.func @transform_3(%arg0: i32) -> (i32, i32, i32) {
    %c0_i32 = arith.constant 0 : i32
    %c0_i32_0 = arith.constant 0 : i32
    %c0_i32_1 = arith.constant 0 : i32
    %c0_i32_2 = arith.constant 0 : i32
    return %c0_i32, %c0_i32_0, %c0_i32_1 : i32, i32, i32
  }
  func.func @transform_4(%arg0: i32) -> (i32, i32) {
    %c0_i32 = arith.constant 0 : i32
    %c0_i32_0 = arith.constant 0 : i32
    %c0_i32_1 = arith.constant 0 : i32
    return %c0_i32, %c0_i32_0 : i32, i32
  }
  func.func @transform_5(%arg0: i32) -> (i32, i32) {
    %c0_i32 = arith.constant 0 : i32
    %c0_i32_0 = arith.constant 0 : i32
    %c0_i32_1 = arith.constant 0 : i32
    return %c0_i32, %c0_i32_0 : i32, i32
  }
  func.func @transform_6(%arg0: i32) -> (i32, i32) {
    %c0_i32 = arith.constant 0 : i32
    %c0_i32_0 = arith.constant 0 : i32
    %c0_i32_1 = arith.constant 0 : i32
    return %c0_i32, %c0_i32_0 : i32, i32
  }
  func.func @transform_7(%arg0: i32) -> (i32, i32, i32, i32) {
    %c0_i32 = arith.constant 0 : i32
    %c0_i32_0 = arith.constant 0 : i32
    %c0_i32_1 = arith.constant 0 : i32
    %c0_i32_2 = arith.constant 0 : i32
    return %arg0, %c0_i32, %c0_i32_0, %c0_i32_1 : i32, i32, i32, i32
  }
}

</mosaic_0001>

<bundles_post_ra>
// kernel: block_forward.1
= control target key start
LH: loop header
LB: loop body
LE: loop exit
PB: predicated region body
PF: predicated region fallthrough
CT: control target
= control target key end

     0   :  { %s3652_s24 = smov 0   ;;  %s6048_s0 = inlined_call_operand.vmem [shape: f32[2,16,16,128], index: 0, kind: input, shape index: {}]   ;;  %s6049_s1 = inlined_call_operand.vmem [shape: f32[128,128], index: 1, kind: input, shape index: {}]   ;;  %s6050_s2 = inlined_call_operand.vmem [shape: f32[1,128], index: 2, kind: input, shape index: {}]   ;;  %s6051_s3 = inlined_call_operand.vmem [shape: f32[3,384,128], index: 3, kind: input, shape index: {}]   ;;  %s6052_s4 = inlined_call_operand.vmem [shape: f32[1,128], index: 4, kind: input, shape index: {}]   ;;  %s6053_s5 = inlined_call_operand.vmem [shape: f32[128,128], index: 5, kind: input, shape index: {}]   ;;  %s6054_s6 = inlined_call_operand.vmem [shape: f32[1,128], index: 6, kind: input, shape index: {}]   ;;  %s6055_s7 = inlined_call_operand.vmem [shape: f32[2,16,16,128], index: 7, kind: output, shape index: {}]  }
   0x1 LB: > { %s3393_s25 = sadd.s32 4294967295, %s3609_s24   ;;  %p3397_p0 = scmp.ge.s32.totalorder %s3609_s24, 1  ;;  %s3609_s24 = sphi %s3652_s24, %s17_s24  }
   0x2   : > { %p237_p1 = scmp.lt.s32.totalorder %s3609_s24, 3 }
   0x4   : > { %p238_p2 = pnand %p3397_p0, %p237_p1 }
   0x6   : > { %241 = sbr.rel (%p238_p2) target bundleno = 1270 (0x4f6), region = 48 }
   0xb   : > { %v326_v0 = vld [vmem:[%s6049_s1 + $0x78] sm:$0xff]  ;;  %v325_v1 = vld [vmem:[%s6049_s1 + $0x70] sm:$0xff]  ;;  %v324_v2 = vld [vmem:[%s6049_s1 + $0x68] sm:$0xff]  ;;  %p269_p3 = scmp.lt.s32.totalorder %s3393_s25, 1  ;;  %v3611_v54 = vmov 0.0   ;;  %vm691_vm0 = vcmask 1046528  }
   0xc   : > { %331 = vmatpush.msra.mxu0 %v326_v0  ;;  %3502 = vmatpush.msra.mxu3 %v326_v0  ;;  %v323_v3 = vld [vmem:[%s6049_s1 + $0x60] sm:$0xff]  ;;  %v322_v4 = vld [vmem:[%s6049_s1 + $0x58] sm:$0xff]  ;;  %v321_v5 = vld [vmem:[%s6049_s1 + $0x50] sm:$0xff]  ;;  %476 = vst [vmem:[#allocation2] sm:$0xff] %v3611_v54  ;;  %v692_v62 = vrot.slane %v3611_v54, 1  ;;  %vm804_vm1 = vcmask 1045504  }
   0xd   : > { %v320_v6 = vld [vmem:[%s6049_s1 + $0x48] sm:$0xff]  ;;  %v319_v7 = vld [vmem:[%s6049_s1 + $0x40] sm:$0xff]  ;;  %v318_v8 = vld [vmem:[%s6049_s1 + $0x38] sm:$0xff]  ;;  %s6351_s25 = smov (!%p269_p3, %s3393_s25), 1  ;;  %478 = vst [vmem:[#allocation2 + $0x10] sm:$0x3] %v3611_v54 }
   0xe   : > { %332 = vmatpush.msra.mxu0 %v325_v1  ;;  %3503 = vmatpush.msra.mxu3 %v325_v1  ;;  %v317_v9 = vld [vmem:[%s6049_s1 + $0x30] sm:$0xff]  ;;  %v316_v10 = vld [vmem:[%s6049_s1 + $0x28] sm:$0xff]  ;;  %v315_v11 = vld [vmem:[%s6049_s1 + $0x20] sm:$0xff]  ;;  %s3500_s8 = sshll.u32 %s6351_s25, 8  ;;  %479 = vst [vmem:[#allocation2 + $0x18] sm:$0xff] %v3611_v54 }
   0xf   : > { %v314_v12 = vld [vmem:[%s6049_s1 + $0x18] sm:$0xff]  ;;  %v313_v13 = vld [vmem:[%s6049_s1 + $0x10] sm:$0xff]  ;;  %v312_v14 = vld [vmem:[%s6049_s1 + $0x8] sm:$0xff]  ;;  %s3717_s15 = scalar_lea.vmem %s6048_s0, %s3500_s8  ;;  %480 = vst [vmem:[#allocation2 + $0x20] sm:$0xff] %v3611_v54  ;;  %s5882_s27 = scalar_lea.vmem %s6055_s7, %s3500_s8 }
  0x10   : > { %333 = vmatpush.msra.mxu0 %v324_v2  ;;  %3504 = vmatpush.msra.mxu3 %v324_v2  ;;  %v311_v15 = vld [vmem:[%s6049_s1] sm:$0xff]  ;;  %v280_v17 = vld [vmem:[%s3717_s15 + $0x8] sm:$0xff]  ;;  %v281_v18 = vld [vmem:[%s3717_s15 + $0x10] sm:$0xff]  ;;  %481 = vst [vmem:[#allocation2 + $0x28] sm:$0x3] %v3611_v54 }
  0x11   : > { %v279_v16 = vld [vmem:[%s3717_s15] sm:$0xff]  ;;  %v282_v19 = vld [vmem:[%s3717_s15 + $0x18] sm:$0xff]  ;;  %v284_v21 = vld [vmem:[%s3717_s15 + $0x28] sm:$0xff]  ;;  %482 = vst [vmem:[#allocation2 + $0x30] sm:$0xff] %v3611_v54 }
  0x12   : > { %334 = vmatpush.msra.mxu0 %v323_v3  ;;  %3505 = vmatpush.msra.mxu3 %v323_v3  ;;  %v283_v20 = vld [vmem:[%s3717_s15 + $0x20] sm:$0xff]  ;;  %v285_v22 = vld [vmem:[%s3717_s15 + $0x30] sm:$0xff]  ;;  %v286_v23 = vld [vmem:[%s3717_s15 + $0x38] sm:$0xff]  ;;  %483 = vst [vmem:[#allocation2 + $0x38] sm:$0xff] %v3611_v54 }
  0x13   : > { %v964_v24 = vld [vmem:[%s6051_s3 + $0x78] sm:$0xff]  ;;  %v963_v25 = vld [vmem:[%s6051_s3 + $0x70] sm:$0xff]  ;;  %v962_v26 = vld [vmem:[%s6051_s3 + $0x68] sm:$0xff]  ;;  %484 = vst [vmem:[#allocation2 + $0x40] sm:$0x3] %v3611_v54 }
  0x14   : > { %335 = vmatpush.msra.mxu0 %v322_v4  ;;  %3506 = vmatpush.msra.mxu3 %v322_v4  ;;  %v287_v27 = vld [vmem:[%s3717_s15 + $0x40] sm:$0xff]  ;;  %v960_v29 = vld [vmem:[%s6051_s3 + $0x58] sm:$0xff]  ;;  %v959_v31 = vld [vmem:[%s6051_s3 + $0x50] sm:$0xff]  ;;  %485 = vst [vmem:[#allocation2 + $0x48] sm:$0xff] %v3611_v54 }
  0x15   : > { %997 = vmatpush.msra.mxu1 %v964_v24  ;;  %v961_v28 = vld [vmem:[%s6051_s3 + $0x60] sm:$0xff]  ;;  %v3749_v30 = vld [vmem:[%s6051_s3 + $0xf8] sm:$0xff]  ;;  %v958_v32 = vld [vmem:[%s6051_s3 + $0x48] sm:$0xff]  ;;  %486 = vst [vmem:[#allocation2 + $0x50] sm:$0xff] %v3611_v54 }
  0x16   : > { %336 = vmatpush.msra.mxu0 %v321_v5  ;;  %3507 = vmatpush.msra.mxu3 %v321_v5  ;;  %v288_v33 = vld [vmem:[%s3717_s15 + $0x48] sm:$0xff]  ;;  %v3762_v34 = vld [vmem:[%s6051_s3 + $0xf0] sm:$0xff]  ;;  %v957_v35 = vld [vmem:[%s6051_s3 + $0x40] sm:$0xff]  ;;  %487 = vst [vmem:[#allocation2 + $0x58] sm:$0x3] %v3611_v54 }
  0x17   : > { %998 = vmatpush.msra.mxu1 %v963_v25  ;;  %1110 = vmatpush.msra.mxu2 %v3749_v30  ;;  %v3771_v36 = vld [vmem:[%s6051_s3 + $0xe8] sm:$0xff]  ;;  %v956_v37 = vld [vmem:[%s6051_s3 + $0x38] sm:$0xff]  ;;  %v3779_v38 = vld [vmem:[%s6051_s3 + $0xe0] sm:$0xff]  ;;  %488 = vst [vmem:[#allocation2 + $0x60] sm:$0xff] %v3611_v54 }
  0x18   : > { %337 = vmatpush.msra.mxu0 %v320_v6  ;;  %3508 = vmatpush.msra.mxu3 %v320_v6  ;;  %v955_v39 = vld [vmem:[%s6051_s3 + $0x30] sm:$0xff]  ;;  %v3788_v40 = vld [vmem:[%s6051_s3 + $0xd8] sm:$0xff]  ;;  %v954_v41 = vld [vmem:[%s6051_s3 + $0x28] sm:$0xff]  ;;  %489 = vst [vmem:[#allocation2 + $0x68] sm:$0xff] %v3611_v54 }
  0x19   : > { %999 = vmatpush.msra.mxu1 %v962_v26  ;;  %1111 = vmatpush.msra.mxu2 %v3762_v34  ;;  %v289_v42 = vld [vmem:[%s3717_s15 + $0x50] sm:$0xff]  ;;  %v953_v44 = vld [vmem:[%s6051_s3 + $0x20] sm:$0xff]  ;;  %v3808_v45 = vld [vmem:[%s6051_s3 + $0xc8] sm:$0xff]  ;;  %490 = vst [vmem:[#allocation2 + $0x70] sm:$0x3] %v3611_v54 }
  0x1a   : > { %338 = vmatpush.msra.mxu0 %v319_v7  ;;  %3509 = vmatpush.msra.mxu3 %v319_v7  ;;  %v3799_v43 = vld [vmem:[%s6051_s3 + $0xd0] sm:$0xff]  ;;  %v952_v46 = vld [vmem:[%s6051_s3 + $0x18] sm:$0xff]  ;;  %v3816_v47 = vld [vmem:[%s6051_s3 + $0xc0] sm:$0xff]  ;;  %491 = vst [vmem:[#allocation2 + $0x78] sm:$0xff] %v3611_v54 }
  0x1b   : > { %1000 = vmatpush.msra.mxu1 %v961_v28  ;;  %1112 = vmatpush.msra.mxu2 %v3771_v36  ;;  %v951_v48 = vld [vmem:[%s6051_s3 + $0x10] sm:$0xff]  ;;  %v3825_v49 = vld [vmem:[%s6051_s3 + $0xb8] sm:$0xff]  ;;  %v950_v50 = vld [vmem:[%s6051_s3 + $0x8] sm:$0xff]  ;;  %492 = vst [vmem:[#allocation2 + $0x80] sm:$0xff] %v3611_v54 }
  0x1c   : > { %339 = vmatpush.msra.mxu0 %v318_v8  ;;  %3510 = vmatpush.msra.mxu3 %v318_v8  ;;  %v290_v51 = vld [vmem:[%s3717_s15 + $0x58] sm:$0xff]  ;;  %v3836_v52 = vld [vmem:[%s6051_s3 + $0xb0] sm:$0xff]  ;;  %v949_v53 = vld [vmem:[%s6051_s3] sm:$0xff]  ;;  %493 = vst [vmem:[#allocation2 + $0x88] sm:$0x3] %v3611_v54 }
  0x1d   : > { %1001 = vmatpush.msra.mxu1 %v960_v29  ;;  %1113 = vmatpush.msra.mxu2 %v3779_v38  ;;  %v3846_v55 = vld [vmem:[%s6051_s3 + $0xa8] sm:$0xff]  ;;  %v3854_v56 = vld [vmem:[%s6051_s3 + $0xa0] sm:$0xff]  ;;  %v3878_v59 = vld [vmem:[%s6051_s3 + $0x98] sm:$0xff]  ;;  %494 = vst [vmem:[#allocation2 + $0x90] sm:$0xff] %v3611_v54 }
  0x1e   : > { %340 = vmatpush.msra.mxu0 %v317_v9  ;;  %3511 = vmatpush.msra.mxu3 %v317_v9  ;;  %v291_v57 = vld [vmem:[%s3717_s15 + $0x60] sm:$0xff]  ;;  %v292_v58 = vld [vmem:[%s3717_s15 + $0x68] sm:$0xff]  ;;  %495 = vst [vmem:[#allocation2 + $0x98] sm:$0xff] %v3611_v54  ;;  %v3886_v60 = vld [vmem:[%s6051_s3 + $0x90] sm:$0xff] }
  0x1f   : > { %1002 = vmatpush.msra.mxu1 %v959_v31  ;;  %1114 = vmatpush.msra.mxu2 %v3788_v40  ;;  %v293_v61 = vld [vmem:[%s3717_s15 + $0x70] sm:$0xff]  ;;  %496 = vst [vmem:[#allocation2 + $0xa0] sm:$0x3] %v3611_v54  ;;  %v3896_v63 = vld [vmem:[%s6051_s3 + $0x88] sm:$0xff]  ;;  %v3903_v0 = vld [vmem:[%s6051_s3 + $0x80] sm:$0xff] }
  0x20   : > { %341 = vmatpush.msra.mxu0 %v316_v10  ;;  %3512 = vmatpush.msra.mxu3 %v316_v10  ;;  %497 = vst [vmem:[#allocation2 + $0xa8] sm:$0xff] %v3611_v54  ;;  %v294_v1 = vld [vmem:[%s3717_s15 + $0x78] sm:$0xff]  ;;  %v597_v2 = vld [vmem:[#allocation2 + $0x10] sm:$0x3]  ;;  %v295_v6 = vld [vmem:[%s3717_s15 + $0x80] sm:$0xff] }
  0x21   : > { %1003 = vmatpush.msra.mxu1 %v958_v32  ;;  %1115 = vmatpush.msra.mxu2 %v3799_v43  ;;  %498 = vst [vmem:[#allocation2 + $0xb0] sm:$0xff] %v3611_v54  ;;  %v695_v3 = vrot.slane %v597_v2, 1  ;;  %v3932_v7 = vld [vmem:[%s6050_s2] ss:$0 sm:$0xff]  ;;  %v296_v9 = vld [vmem:[%s3717_s15 + $0x88] sm:$0xff] }
  0x22   : > { %342 = vmatpush.msra.mxu0 %v315_v11  ;;  %3513 = vmatpush.msra.mxu3 %v315_v11  ;;  %499 = vst [vmem:[#allocation2 + $0xb8] sm:$0x3] %v3611_v54  ;;  %v3417_v11 = vld [vmem:[%s6051_s3 + $0x1f8] sm:$0xff]  ;;  %v3407_v2 = vld [vmem:[%s6051_s3 + $0x1a8] sm:$0xff] }
  0x23   : > { %1004 = vmatpush.msra.mxu1 %v957_v35  ;;  %1116 = vmatpush.msra.mxu2 %v3808_v45  ;;  %500 = vst [vmem:[#allocation2 + $0xc0] sm:$0xff] %v3611_v54  ;;  %v696_v4 = vsel %vm691_vm0, %v692_v62, %v695_v3 }
  0x24   : > { %343 = vmatpush.msra.mxu0 %v314_v12  ;;  %3514 = vmatpush.msra.mxu3 %v314_v12  ;;  %501 = vst [vmem:[#allocation2 + $0xc8] sm:$0xff] %v3611_v54 }
  0x25   : > { %1005 = vmatpush.msra.mxu1 %v956_v37  ;;  %1117 = vmatpush.msra.mxu2 %v3816_v47  ;;  %502 = vst [vmem:[#allocation2 + $0xd0] sm:$0x3] %v3611_v54 }
  0x26   : > { %344 = vmatpush.msra.mxu0 %v313_v13  ;;  %3515 = vmatpush.msra.mxu3 %v313_v13  ;;  %503 = vst [vmem:[#allocation2 + $0xd8] sm:$0xff] %v3611_v54 }
  0x27   : > { %1006 = vmatpush.msra.mxu1 %v955_v39  ;;  %1118 = vmatpush.msra.mxu2 %v3825_v49  ;;  %504 = vst [vmem:[#allocation2 + $0xe0] sm:$0xff] %v3611_v54 }
  0x28   : > { %345 = vmatpush.msra.mxu0 %v312_v14  ;;  %3516 = vmatpush.msra.mxu3 %v312_v14  ;;  %505 = vst [vmem:[#allocation2 + $0xe8] sm:$0x3] %v3611_v54 }
  0x29   : > { %1007 = vmatpush.msra.mxu1 %v954_v41  ;;  %1119 = vmatpush.msra.mxu2 %v3836_v52  ;;  %506 = vst [vmem:[#allocation2 + $0xf0] sm:$0xff] %v3611_v54 }
  0x2a   : > { %346 = vmatpush.msra.mxu0 %v311_v15  ;;  %3517 = vmatpush.msra.mxu3 %v311_v15  ;;  %507 = vst [vmem:[#allocation2 + $0xf8] sm:$0xff] %v3611_v54 }
  0x2b   : > { %347 = vmatmul.f32.vlgmr.msra.gmra.mxu0 %v279_v16  ;;  %1008 = vmatpush.msra.mxu1 %v953_v44  ;;  %508 = vst [vmem:[#allocation2 + $0x100] sm:$0x3] %v3611_v54  ;;  %v297_v16 = vld [vmem:[%s3717_s15 + $0x90] sm:$0xff] }
  0x2c   : > { %3518 = vmatpush.msrb.mxu3 %v964_v24  ;;  %1120 = vmatpush.msra.mxu2 %v3846_v55  ;;  %509 = vst [vmem:[#allocation2 + $0x108] sm:$0xff] %v3611_v54  ;;  %v298_v24 = vld [vmem:[%s3717_s15 + $0x98] sm:$0xff] }
  0x2d   : > { %1009 = vmatpush.msra.mxu1 %v952_v46  ;;  %510 = vst [vmem:[#allocation2 + $0x110] sm:$0xff] %v3611_v54  ;;  %1801 = vmatpush.msrb.mxu0 %v3417_v11  ;;  %v3405_v11 = vld [vmem:[%s6051_s3 + $0x198] sm:$0xff] }
  0x2e   : > { %3519 = vmatpush.msrb.mxu3 %v963_v25  ;;  %1121 = vmatpush.msra.mxu2 %v3854_v56  ;;  %511 = vst [vmem:[#allocation2 + $0x118] sm:$0x3] %v3611_v54 }
  0x2f   : > { %1010 = vmatpush.msra.mxu1 %v951_v48  ;;  %512 = vst [vmem:[#allocation2 + $0x120] sm:$0xff] %v3611_v54 }
  0x30   : > { %3520 = vmatpush.msrb.mxu3 %v962_v26  ;;  %1122 = vmatpush.msra.mxu2 %v3878_v59  ;;  %513 = vst [vmem:[#allocation2 + $0x128] sm:$0xff] %v3611_v54 }
  0x31   : > { %1011 = vmatpush.msra.mxu1 %v950_v50  ;;  %514 = vst [vmem:[#allocation2 + $0x130] sm:$0x3] %v3611_v54 }
  0x32   : > { %3521 = vmatpush.msrb.mxu3 %v961_v28  ;;  %1123 = vmatpush.msra.mxu2 %v3886_v60  ;;  %515 = vst [vmem:[#allocation2 + $0x138] sm:$0xff] %v3611_v54 }
  0x33   : > { %350 = vmatmul.f32.gmra.mxu0 %v280_v17  ;;  %1012 = vmatpush.msra.mxu1 %v949_v53  ;;  %516 = vst [vmem:[#allocation2 + $0x140] sm:$0xff] %v3611_v54 }
  0x34   : > { %3522 = vmatpush.msrb.mxu3 %v960_v29  ;;  %1013 = vmatmul.f32.vlgmr.msra.gmra.mxu1 %v3611_v54  ;;  %517 = vst [vmem:[#allocation2 + $0x148] sm:$0x3] %v3611_v54  ;;  %v3412_v29 = vld [vmem:[%s6051_s3 + $0x1d0] sm:$0xff] }
  0x35   : > { %1124 = vmatpush.msra.mxu2 %v3896_v63  ;;  %518 = vst [vmem:[#allocation2 + $0x150] sm:$0xff] %v3611_v54 }
  0x36   : > { %3523 = vmatpush.msrb.mxu3 %v959_v31  ;;  %519 = vst [vmem:[#allocation2 + $0x158] sm:$0xff] %v3611_v54 }
  0x37   : > { %1125 = vmatpush.msra.mxu2 %v3903_v0  ;;  %520 = vst [vmem:[#allocation2 + $0x160] sm:$0x3] %v3611_v54 }
  0x38   : > { %3524 = vmatpush.msrb.mxu3 %v958_v32  ;;  %1126 = vmatmul.f32.vlgmr.msra.gmra.mxu2 %v692_v62  ;;  %521 = vst [vmem:[#allocation2 + $0x168] sm:$0xff] %v3611_v54  ;;  %v3408_v62 = vld [vmem:[%s6051_s3 + $0x1b0] sm:$0xff] }
  0x39   : > { %522 = vst [vmem:[#allocation2 + $0x170] sm:$0xff] %v3611_v54 }
  0x3a   : > { %3525 = vmatpush.msrb.mxu3 %v957_v35  ;;  %523 = vst [vmem:[#allocation2 + $0x178] sm:$0x3] %v3611_v54 }
  0x3b   : > { %353 = vmatmul.f32.gmra.mxu0 %v281_v18  ;;  %524 = vst [vmem:[#allocation2 + $0x180] sm:$0xff] %v3611_v54  ;;  %v3416_v18 = vld [vmem:[%s6051_s3 + $0x1f0] sm:$0xff] }
  0x3c   : > { %3526 = vmatpush.msrb.mxu3 %v956_v37  ;;  %1016 = vmatmul.f32.gmra.mxu1 %v3611_v54  ;;  %525 = vst [vmem:[#allocation2 + $0x188] sm:$0xff] %v3611_v54  ;;  %v3411_v37 = vld [vmem:[%s6051_s3 + $0x1c8] sm:$0xff] }
  0x3d   : > { %526 = vst [vmem:[#allocation2 + $0x190] sm:$0x3] %v3611_v54  ;;  %1802 = vmatpush.msrb.mxu0 %v3416_v18 }
  0x3e   : > { %3527 = vmatpush.msrb.mxu3 %v955_v39  ;;  %529 = vst [vmem:[#allocation2 + $0x1a8] sm:$0x3] %v3611_v54  ;;  %v299_v54 = vld [vmem:[%s3717_s15 + $0xa0] sm:$0xff] }
  0x40   : > { %3528 = vmatpush.msrb.mxu3 %v954_v41  ;;  %1129 = vmatmul.f32.gmra.mxu2 %v696_v4  ;;  %v304_v4 = vld [vmem:[%s3717_s15 + $0xc8] sm:$0xff] }
  0x42   : > { %3529 = vmatpush.msrb.mxu3 %v953_v44  ;;  %v3410_v44 = vld [vmem:[%s6051_s3 + $0x1c0] sm:$0xff] }
  0x43   : > { %356 = vmatmul.f32.gmra.mxu0 %v282_v19 }
  0x44   : > { %3530 = vmatpush.msrb.mxu3 %v952_v46  ;;  %v303_v46 = vld [vmem:[%s3717_s15 + $0xc0] sm:$0xff] }
  0x45   : > { %419 = vmatmul.f32.vlgmr.msra.gmra.mxu3 %v303_v46 }
  0x46   : > { %3531 = vmatpush.msrb.mxu3 %v951_v48 }
  0x48   : > { %3532 = vmatpush.msrb.mxu3 %v950_v50  ;;  %v3409_v50 = vld [vmem:[%s6051_s3 + $0x1b8] sm:$0xff] }
  0x4a   : > { %3533 = vmatpush.msrb.mxu3 %v949_v53 }
  0x4b   : > { %359 = vmatmul.f32.gmra.mxu0 %v283_v20  ;;  %v3415_v20 = vld [vmem:[%s6051_s3 + $0x1e8] sm:$0xff] }
  0x4c   : > { %1803 = vmatpush.msrb.mxu0 %v3415_v20  ;;  %3534 = vmatpush.msra.mxu3 %v3749_v30  ;;  %v305_v20 = vld [vmem:[%s3717_s15 + $0xd0] sm:$0xff] }
  0x4d   : > { %422 = vmatmul.f32.gmra.mxu3 %v304_v4 }
  0x4e   : > { %3535 = vmatpush.msra.mxu3 %v3762_v34 }
  0x50   : > { %3536 = vmatpush.msra.mxu3 %v3771_v36 }
  0x52   : > { %3537 = vmatpush.msra.mxu3 %v3779_v38 }
  0x53   : > { %362 = vmatmul.f32.gmra.mxu0 %v284_v21  ;;  %v3414_v21 = vld [vmem:[%s6051_s3 + $0x1e0] sm:$0xff] }
  0x54   : > { %1804 = vmatpush.msrb.mxu0 %v3414_v21  ;;  %3538 = vmatpush.msra.mxu3 %v3788_v40  ;;  %v3402_v21 = vld [vmem:[%s6051_s3 + $0x180] sm:$0xff] }
  0x55   : > { %425 = vmatmul.f32.gmra.mxu3 %v305_v20 }
  0x56   : > { %3539 = vmatpush.msra.mxu3 %v3799_v43 }
  0x58   : > { %3540 = vmatpush.msra.mxu3 %v3808_v45 }
  0x5a   : > { %3541 = vmatpush.msra.mxu3 %v3816_v47 }
  0x5b   : > { %365 = vmatmul.f32.gmra.mxu0 %v285_v22  ;;  %v3413_v22 = vld [vmem:[%s6051_s3 + $0x1d8] sm:$0xff] }
  0x5c   : > { %1805 = vmatpush.msrb.mxu0 %v3413_v22  ;;  %3542 = vmatpush.msra.mxu3 %v3825_v49 }
  0x5e   : > { %1806 = vmatpush.msrb.mxu0 %v3412_v29  ;;  %3543 = vmatpush.msra.mxu3 %v3836_v52 }
  0x60   : > { %1807 = vmatpush.msrb.mxu0 %v3411_v37  ;;  %3544 = vmatpush.msra.mxu3 %v3846_v55 }
  0x62   : > { %1808 = vmatpush.msrb.mxu0 %v3410_v44  ;;  %v302_v44 = vld [vmem:[%s3717_s15 + $0xb8] sm:$0xff]  ;;  %3545 = vmatpush.msra.mxu3 %v3854_v56 }
  0x63   : > { %368 = vmatmul.f32.gmra.mxu0 %v286_v23 }
  0x64   : > { %1809 = vmatpush.msrb.mxu0 %v3409_v50  ;;  %3546 = vmatpush.msra.mxu3 %v3878_v59 }
  0x66   : > { %1810 = vmatpush.msrb.mxu0 %v3408_v62  ;;  %3547 = vmatpush.msra.mxu3 %v3886_v60  ;;  %v308_v60 = vld [vmem:[%s3717_s15 + $0xe8] sm:$0xff] }
  0x68   : > { %1811 = vmatpush.msrb.mxu0 %v3407_v2  ;;  %3548 = vmatpush.msra.mxu3 %v3896_v63 }
  0x6a   : > { %3549 = vmatpush.msra.mxu3 %v3903_v0 }
  0x6b   : > { %371 = vmatmul.f32.gmra.mxu0 %v287_v27 }
  0x73   : > { %374 = vmatmul.f32.gmra.mxu0 %v288_v33 }
  0x7b   : > { %377 = vmatmul.f32.gmra.mxu0 %v289_v42 }
  0x83   : > { %380 = vmatmul.f32.gmra.mxu0 %v290_v51 }
  0x8b   : > { %383 = vmatmul.f32.gmra.mxu0 %v291_v57 }
  0x93   : > { %386 = vmatmul.f32.gmra.mxu0 %v292_v58 }
  0x9b   : > { %389 = vmatmul.f32.gmra.mxu0 %v293_v61 }
  0xa3   : > { %392 = vmatmul.f32.gmra.mxu0 %v294_v1 }
  0xa8   : > { %v348_v5 = vpop.f32.mrf.mxu0 }
  0xa9   : > { %v349_v10 = vadd.f32 %v3932_v7, %v348_v5 }
  0xab   : > { %395 = vmatmul.f32.gmra.mxu0 %v295_v6  ;;  %v444_v13 = vmax.f32 %v349_v10, 0.0 }
  0xad   : > { %531 = vst [vmem:[#allocation2 + $0x19] sm:$0xff] %v444_v13 }
  0xb0   : > { %v351_v8 = vpop.f32.mrf.mxu0 }
  0xb1   : > { %v352_v12 = vadd.f32 %v3932_v7, %v351_v8 }
  0xb3   : > { %398 = vmatmul.f32.gmra.mxu0 %v296_v9  ;;  %v445_v14 = vmax.f32 %v352_v12, 0.0  ;;  %v3406_v9 = vld [vmem:[%s6051_s3 + $0x1a0] sm:$0xff] }
  0xb4   : > { %v3964_v25 = vld [vmem:[#allocation2 + $0x18] sm:$0xff]  ;;  %1812 = vmatpush.msrb.mxu0 %v3406_v9 }
  0xb5   : > { %532 = vst [vmem:[#allocation2 + $0x21] sm:$0xff] %v445_v14  ;;  %1019 = vmatmul.f32.gmra.mxu1 %v3964_v25  ;;  %v697_v31 = vrot.slane %v3964_v25, 1  ;;  %v810_v39 = vrot.slane %v3964_v25, 2  ;;  %v300_v14 = vld [vmem:[%s3717_s15 + $0xa8] sm:$0xff] }
  0xb6   : > { %1813 = vmatpush.msrb.mxu0 %v3405_v11 }
  0xb8   : > { %v354_v15 = vpop.f32.mrf.mxu0 }
  0xb9   : > { %v355_v17 = vadd.f32 %v3932_v7, %v354_v15 }
  0xbb   : > { %v446_v19 = vmax.f32 %v355_v17, 0.0  ;;  %401 = vmatmul.f32.gmra.mxu0 %v297_v16  ;;  %v3404_v17 = vld [vmem:[%s6051_s3 + $0x190] sm:$0xff] }
  0xbc   : > { %v3968_v27 = vld [vmem:[#allocation2 + $0x20] sm:$0xff]  ;;  %v600_v28 = vld [vmem:[#allocation2 + $0x28] sm:$0x3]  ;;  %1814 = vmatpush.msrb.mxu0 %v3404_v17 }
  0xbd   : > { %533 = vst [vmem:[#allocation2 + $0x31] sm:$0xff] %v446_v19  ;;  %v3975_v32 = vrot.slane %v3968_v27, 1  ;;  %v3978_v33 = vrot.slane %v3968_v27, 2  ;;  %v813_v41 = vrot.slane %v600_v28, 2  ;;  %v700_v58 = vrot.slane %v600_v28, 1  ;;  %1022 = vmatmul.f32.gmra.mxu1 %v3968_v27  ;;  %v3403_v19 = vld [vmem:[%s6051_s3 + $0x188] sm:$0xff] }
  0xbe   : > { %1815 = vmatpush.msrb.mxu0 %v3403_v19 }
  0xbf   : > { %v3986_v42 = vsel %vm691_vm0, %v697_v31, %v3975_v32  ;;  %v3995_v48 = vsel %vm804_vm1, %v810_v39, %v3978_v33  ;;  %v4002_v51 = vsel %vm804_vm1, %v3978_v33, %v813_v41  ;;  %v701_v6 = vsel %vm691_vm0, %v3975_v32, %v700_v58  ;;  %v306_v31 = vld [vmem:[%s3717_s15 + $0xd8] sm:$0xff] }
  0xc0   : > { %v357_v23 = vpop.f32.mrf.mxu0  ;;  %1132 = vmatmul.f32.gmra.mxu2 %v3986_v42  ;;  %6079 = vst [vmem:[#allocation4_spill] sm:$0xff] %v4002_v51  ;;  %1816 = vmatpush.msrb.mxu0 %v3402_v21 }
  0xc1   : > { %v358_v26 = vadd.f32 %v3932_v7, %v357_v23  ;;  %v301_v23 = vld [vmem:[%s3717_s15 + $0xb0] sm:$0xff]  ;;  %428 = vmatmul.f32.gmra.mxu3 %v306_v31 }
  0xc3   : > { %v447_v35 = vmax.f32 %v358_v26, 0.0  ;;  %404 = vmatmul.f32.gmra.mxu0 %v298_v24 }
  0xc4   : > { %v4008_v61 = vld [vmem:[#allocation2 + $0x30] sm:$0xff] }
  0xc5   : > { %534 = vst [vmem:[#allocation2 + $0x39] sm:$0xff] %v447_v35  ;;  %v815_v5 = vrot.slane %v4008_v61, 2  ;;  %v702_v36 = vrot.slane %v4008_v61, 1  ;;  %1025 = vmatmul.f32.gmra.mxu1 %v4008_v61 }
  0xc8   : > { %v360_v53 = vpop.f32.mrf.mxu0  ;;  %1135 = vmatmul.f32.gmra.mxu2 %v701_v6 }
  0xc9   : > { %v361_v57 = vadd.f32 %v3932_v7, %v360_v53 }
  0xcb   : > { %v448_v1 = vmax.f32 %v361_v57, 0.0  ;;  %407 = vmatmul.f32.gmra.mxu0 %v299_v54  ;;  %v307_v57 = vld [vmem:[%s3717_s15 + $0xe0] sm:$0xff] }
  0xcc   : > { %v4017_v30 = vld [vmem:[#allocation2 + $0x38] sm:$0xff]  ;;  %v603_v3 = vld [vmem:[#allocation2 + $0x40] sm:$0x3]  ;;  %431 = vmatmul.f32.gmra.mxu3 %v307_v57 }
  0xcd   : > { %535 = vst [vmem:[#allocation2 + $0x49] sm:$0xff] %v448_v1  ;;  %v4024_v8 = vrot.slane %v4017_v30, 2  ;;  %v818_v34 = vrot.slane %v603_v3, 2  ;;  %v4031_v10 = vrot.slane %v4017_v30, 1  ;;  %v705_v24 = vrot.slane %v603_v3, 1  ;;  %1028 = vmatmul.f32.gmra.mxu1 %v4017_v30 }
  0xcf   : > { %v4038_v12 = vsel %vm804_vm1, %v815_v5, %v4024_v8  ;;  %v4046_v16 = vsel %vm804_vm1, %v4024_v8, %v818_v34  ;;  %v4054_v38 = vsel %vm691_vm0, %v702_v36, %v4031_v10  ;;  %v706_v35 = vsel %vm691_vm0, %v4031_v10, %v705_v24 }
  0xd0   : > { %v363_v13 = vpop.f32.mrf.mxu0  ;;  %6080 = vst [vmem:[#allocation5_spill] sm:$0xff] %v4046_v16  ;;  %1138 = vmatmul.f32.gmra.mxu2 %v4054_v38 }
  0xd1   : > { %v364_v15 = vadd.f32 %v3932_v7, %v363_v13 }
  0xd3   : > { %v449_v18 = vmax.f32 %v364_v15, 0.0  ;;  %410 = vmatmul.f32.gmra.mxu0 %v300_v14 }
  0xd4   : > { %v4070_v26 = vld [vmem:[#allocation2 + $0x48] sm:$0xff]  ;;  %434 = vmatmul.f32.gmra.mxu3 %v308_v60 }
  0xd5   : > { %536 = vst [vmem:[#allocation2 + $0x51] sm:$0xff] %v449_v18  ;;  %v820_v45 = vrot.slane %v4070_v26, 2  ;;  %v707_v46 = vrot.slane %v4070_v26, 1  ;;  %1031 = vmatmul.f32.gmra.mxu1 %v4070_v26 }
  0xd8   : > { %v366_v22 = vpop.f32.mrf.mxu0  ;;  %1141 = vmatmul.f32.gmra.mxu2 %v706_v35 }
  0xd9   : > { %v367_v40 = vadd.f32 %v3932_v7, %v366_v22 }
  0xdb   : > { %v450_v43 = vmax.f32 %v367_v40, 0.0  ;;  %413 = vmatmul.f32.gmra.mxu0 %v301_v23 }
  0xdc   : > { %v4073_v28 = vld [vmem:[#allocation2 + $0x50] sm:$0xff]  ;;  %v606_v29 = vld [vmem:[#allocation2 + $0x58] sm:$0x3] }
  0xdd   : > { %537 = vst [vmem:[#allocation2 + $0x61] sm:$0xff] %v450_v43  ;;  %v4081_v37 = vrot.slane %v4073_v28, 2  ;;  %v823_v47 = vrot.slane %v606_v29, 2  ;;  %v4085_v39 = vrot.slane %v4073_v28, 1  ;;  %v710_v58 = vrot.slane %v606_v29, 1  ;;  %1034 = vmatmul.f32.gmra.mxu1 %v4073_v28 }
  0xdf   : > { %v4089_v49 = vsel %vm804_vm1, %v820_v45, %v4081_v37  ;;  %v4097_v52 = vsel %vm804_vm1, %v4081_v37, %v823_v47  ;;  %v4103_v54 = vsel %vm691_vm0, %v707_v46, %v4085_v39  ;;  %v711_v63 = vsel %vm691_vm0, %v4085_v39, %v710_v58 }
  0xe0   : > { %v369_v41 = vpop.f32.mrf.mxu0  ;;  %6081 = vst [vmem:[#allocation6_spill] sm:$0xff] %v4097_v52  ;;  %1144 = vmatmul.f32.gmra.mxu2 %v4103_v54 }
  0xe1   : > { %v370_v50 = vadd.f32 %v3932_v7, %v369_v41 }
  0xe3   : > { %v451_v53 = vmax.f32 %v370_v50, 0.0  ;;  %416 = vmatmul.f32.gmra.mxu0 %v302_v44 }
  0xe4   : > { %v4112_v62 = vld [vmem:[#allocation2 + $0x60] sm:$0xff] }
  0xe5   : > { %538 = vst [vmem:[#allocation2 + $0x69] sm:$0xff] %v451_v53  ;;  %v825_v3 = vrot.slane %v4112_v62, 2  ;;  %v712_v9 = vrot.slane %v4112_v62, 1  ;;  %1037 = vmatmul.f32.gmra.mxu1 %v4112_v62 }
  0xe8   : > { %v372_v55 = vpop.f32.mrf.mxu0  ;;  %1147 = vmatmul.f32.gmra.mxu2 %v711_v63 }
  0xe9   : > { %v373_v56 = vadd.f32 %v3932_v7, %v372_v55 }
  0xeb   : > { %v452_v59 = vmax.f32 %v373_v56, 0.0  ;;  %1817 = vmatmul.f32.vlgmr.msrb.gmra.mxu0 %v3964_v25 }
  0xec   : > { %v4116_v1 = vld [vmem:[#allocation2 + $0x68] sm:$0xff]  ;;  %v609_v2 = vld [vmem:[#allocation2 + $0x70] sm:$0x3] }
  0xed   : > { %539 = vst [vmem:[#allocation2 + $0x79] sm:$0xff] %v452_v59  ;;  %v4123_v4 = vrot.slane %v4116_v1, 2  ;;  %v828_v5 = vrot.slane %v609_v2, 2  ;;  %v4126_v0 = vrot.slane %v4116_v1, 1  ;;  %v715_v17 = vrot.slane %v609_v2, 1  ;;  %1040 = vmatmul.f32.gmra.mxu1 %v4116_v1 }
  0xef   : > { %v4130_v25 = vsel %vm804_vm1, %v825_v3, %v4123_v4  ;;  %v4136_v11 = vsel %vm804_vm1, %v4123_v4, %v828_v5  ;;  %v4141_v14 = vsel %vm691_vm0, %v712_v9, %v4126_v0 }
  0xf0   : > { %v375_v6 = vpop.f32.mrf.mxu0  ;;  %6082 = vst [vmem:[#allocation7_spill] sm:$0xff] %v4136_v11  ;;  %1150 = vmatmul.f32.gmra.mxu2 %v4141_v14 }
  0xf1   : > { %v376_v34 = vadd.f32 %v3932_v7, %v375_v6 }
  0xf3   : > { %v453_v13 = vmax.f32 %v376_v34, 0.0  ;;  %1820 = vmatmul.f32.gmra.mxu0 %v3968_v27  ;;  %v716_v27 = vsel %vm691_vm0, %v4126_v0, %v715_v17  ;;  %v3433_v17 = vld [vmem:[%s6051_s3 + $0x278] sm:$0xff] }
  0xf4   : > { %v4147_v18 = vld [vmem:[#allocation2 + $0x78] sm:$0xff]  ;;  %1914 = vmatpush.msrb.mxu1 %v3433_v17 }
  0xf5   : > { %540 = vst [vmem:[#allocation2 + $0x81] sm:$0xff] %v453_v13  ;;  %v830_v22 = vrot.slane %v4147_v18, 2  ;;  %v717_v29 = vrot.slane %v4147_v18, 1  ;;  %1043 = vmatmul.f32.gmra.mxu1 %v4147_v18 }
  0xf8   : > { %v378_v36 = vpop.f32.mrf.mxu0  ;;  %1153 = vmatmul.f32.gmra.mxu2 %v716_v27 }
  0xf9   : > { %v379_v15 = vadd.f32 %v3932_v7, %v378_v36 }
  0xfb   : > { %v454_v19 = vmax.f32 %v379_v15, 0.0  ;;  %1823 = vmatmul.f32.gmra.mxu0 %v4008_v61 }
  0xfc   : > { %v4150_v20 = vld [vmem:[#allocation2 + $0x80] sm:$0xff]  ;;  %v612_v21 = vld [vmem:[#allocation2 + $0x88] sm:$0x3] }
  0xfd   : > { %541 = vst [vmem:[#allocation2 + $0x91] sm:$0xff] %v454_v19  ;;  %v4156_v23 = vrot.slane %v4150_v20, 2  ;;  %v833_v40 = vrot.slane %v612_v21, 2  ;;  %v4159_v24 = vrot.slane %v4150_v20, 1  ;;  %v720_v46 = vrot.slane %v612_v21, 1  ;;  %1046 = vmatmul.f32.gmra.mxu1 %v4150_v20 }
  0xff   : > { %v4163_v61 = vsel %vm804_vm1, %v830_v22, %v4156_v23  ;;  %v4169_v45 = vsel %vm804_vm1, %v4156_v23, %v833_v40  ;;  %v4174_v47 = vsel %vm691_vm0, %v717_v29, %v4159_v24 }
 0x100   : > { %v381_v43 = vpop.f32.mrf.mxu0  ;;  %6083 = vst [vmem:[#allocation8_spill] sm:$0xff] %v4169_v45  ;;  %1156 = vmatmul.f32.gmra.mxu2 %v4174_v47  ;;  %v3439_v45 = vld [vmem:[%s6051_s3 + $0x2a8] sm:$0xff] }
 0x101   : > { %v382_v31 = vadd.f32 %v3932_v7, %v381_v43 }
 0x103   : > { %v455_v35 = vmax.f32 %v382_v31, 0.0  ;;  %1826 = vmatmul.f32.gmra.mxu0 %v4017_v30  ;;  %v721_v30 = vsel %vm691_vm0, %v4159_v24, %v720_v46  ;;  %v3432_v46 = vld [vmem:[%s6051_s3 + $0x270] sm:$0xff] }
 0x104   : > { %v4180_v50 = vld [vmem:[#allocation2 + $0x90] sm:$0xff]  ;;  %1915 = vmatpush.msrb.mxu1 %v3432_v46 }
 0x105   : > { %542 = vst [vmem:[#allocation2 + $0x99] sm:$0xff] %v455_v35  ;;  %v835_v56 = vrot.slane %v4180_v50, 2  ;;  %v722_v3 = vrot.slane %v4180_v50, 1  ;;  %1049 = vmatmul.f32.gmra.mxu1 %v4180_v50 }
 0x108   : > { %v384_v41 = vpop.f32.mrf.mxu0  ;;  %1159 = vmatmul.f32.gmra.mxu2 %v721_v30 }
 0x109   : > { %v385_v44 = vadd.f32 %v3932_v7, %v384_v41 }
 0x10b   : > { %v456_v53 = vmax.f32 %v385_v44, 0.0  ;;  %1829 = vmatmul.f32.gmra.mxu0 %v4070_v26 }
 0x10c   : > { %v4183_v57 = vld [vmem:[#allocation2 + $0x98] sm:$0xff]  ;;  %v615_v55 = vld [vmem:[#allocation2 + $0xa0] sm:$0x3] }
 0x10d   : > { %543 = vst [vmem:[#allocation2 + $0xa9] sm:$0xff] %v456_v53  ;;  %v4189_v58 = vrot.slane %v4183_v57, 2  ;;  %v838_v59 = vrot.slane %v615_v55, 2  ;;  %v4192_v2 = vrot.slane %v4183_v57, 1  ;;  %v725_v36 = vrot.slane %v615_v55, 1  ;;  %1052 = vmatmul.f32.gmra.mxu1 %v4183_v57 }
 0x10f   : > { %v4196_v26 = vsel %vm804_vm1, %v835_v56, %v4189_v58  ;;  %v4202_v5 = vsel %vm804_vm1, %v4189_v58, %v838_v59  ;;  %v4207_v9 = vsel %vm691_vm0, %v722_v3, %v4192_v2  ;;  %v726_v27 = vsel %vm691_vm0, %v4192_v2, %v725_v36  ;;  %v4254_v3 = vpop.f32.mrf.mxu1 }
 0x110   : > { %v387_v60 = vpop.f32.mrf.mxu0  ;;  %6084 = vst [vmem:[#allocation9_spill] sm:$0xff] %v4202_v5  ;;  %1162 = vmatmul.f32.gmra.mxu2 %v4207_v9 }
 0x111   : > { %v388_v63 = vadd.f32 %v3932_v7, %v387_v60  ;;  %6086 = vst [vmem:[#allocation11_spill] sm:$0xff] %v4254_v3  ;;  %v3441_v3 = vld [vmem:[%s6051_s3 + $0x2b8] sm:$0xff] }
 0x113   : > { %v457_v6 = vmax.f32 %v388_v63, 0.0  ;;  %1832 = vmatmul.f32.gmra.mxu0 %v4073_v28 }
 0x114   : > { %v4213_v15 = vld [vmem:[#allocation2 + $0xa8] sm:$0xff] }
 0x115   : > { %544 = vst [vmem:[#allocation2 + $0xb1] sm:$0xff] %v457_v6  ;;  %v840_v22 = vrot.slane %v4213_v15, 2  ;;  %v727_v35 = vrot.slane %v4213_v15, 1  ;;  %1055 = vmatmul.f32.gmra.mxu1 %v4213_v15 }
 0x117   : > { %v4287_v46 = vpop.f32.mrf.mxu1 }
 0x118   : > { %v390_v34 = vpop.f32.mrf.mxu0  ;;  %1165 = vmatmul.f32.gmra.mxu2 %v726_v27  ;;  %6088 = vst [vmem:[#allocation13_spill] sm:$0xff] %v4287_v46 }
 0x119   : > { %v391_v13 = vadd.f32 %v3932_v7, %v390_v34 }
 0x11b   : > { %v458_v19 = vmax.f32 %v391_v13, 0.0  ;;  %1835 = vmatmul.f32.gmra.mxu0 %v4112_v62 }
 0x11c   : > { %v4219_v28 = vld [vmem:[#allocation2 + $0xb0] sm:$0xff]  ;;  %v618_v21 = vld [vmem:[#allocation2 + $0xb8] sm:$0x3] }
 0x11d   : > { %545 = vst [vmem:[#allocation2 + $0xc1] sm:$0xff] %v458_v19  ;;  %v4225_v40 = vrot.slane %v4219_v28, 2  ;;  %v843_v43 = vrot.slane %v618_v21, 2  ;;  %v4228_v29 = vrot.slane %v4219_v28, 1  ;;  %v730_v59 = vrot.slane %v618_v21, 1  ;;  %1058 = vmatmul.f32.gmra.mxu1 %v4219_v28 }
 0x11f   : > { %v4232_v62 = vsel %vm804_vm1, %v840_v22, %v4225_v40  ;;  %v4238_v44 = vsel %vm804_vm1, %v4225_v40, %v843_v43  ;;  %v4246_v55 = vsel %vm691_vm0, %v727_v35, %v4228_v29  ;;  %v731_v13 = vsel %vm691_vm0, %v4228_v29, %v730_v59  ;;  %v3431_v35 = vld [vmem:[%s6051_s3 + $0x268] sm:$0xff] }
 0x120   : > { %v393_v31 = vpop.f32.mrf.mxu0  ;;  %6085 = vst [vmem:[#allocation10_spill] sm:$0xff] %v4238_v44  ;;  %1168 = vmatmul.f32.gmra.mxu2 %v4246_v55  ;;  %1916 = vmatpush.msrb.mxu1 %v3431_v35 }
 0x121   : > { %v394_v41 = vadd.f32 %v3932_v7, %v393_v31 }
 0x123   : > { %v459_v53 = vmax.f32 %v394_v41, 0.0  ;;  %1838 = vmatmul.f32.gmra.mxu0 %v4116_v1 }
 0x124   : > { %v4252_v60 = vld [vmem:[#allocation2 + $0xc0] sm:$0xff] }
 0x125   : > { %546 = vst [vmem:[#allocation2 + $0xc9] sm:$0xff] %v459_v53  ;;  %v732_v34 = vrot.slane %v4252_v60, 1  ;;  %v845_v19 = vrot.slane %v4252_v60, 2  ;;  %1061 = vmatmul.f32.gmra.mxu1 %v4252_v60  ;;  %v4289_v53 = vpop.f32.mrf.mxu2 }
 0x126   : > { %6089 = vst [vmem:[#allocation14_spill] sm:$0xff] %v4289_v53 }
 0x128   : > { %v396_v56 = vpop.f32.mrf.mxu0  ;;  %1171 = vmatmul.f32.gmra.mxu2 %v731_v13  ;;  %v3429_v13 = vld [vmem:[%s6051_s3 + $0x258] sm:$0xff] }
 0x129   : > { %v397_v30 = vadd.f32 %v3932_v7, %v396_v56  ;;  %v309_v56 = vld [vmem:[%s3717_s15 + $0xf0] sm:$0xff] }
 0x12a   : > { %437 = vmatmul.f32.gmra.mxu3 %v309_v56 }
 0x12b   : > { %v460_v63 = vmax.f32 %v397_v30, 0.0  ;;  %1841 = vmatmul.f32.gmra.mxu0 %v4147_v18  ;;  %v3430_v30 = vld [vmem:[%s6051_s3 + $0x260] sm:$0xff] }
 0x12c   : > { %v4257_v6 = vld [vmem:[#allocation2 + $0xc8] sm:$0xff]  ;;  %v621_v1 = vld [vmem:[#allocation2 + $0xd0] sm:$0x3]  ;;  %1917 = vmatpush.msrb.mxu1 %v3430_v30 }
 0x12d   : > { %547 = vst [vmem:[#allocation2 + $0xd9] sm:$0xff] %v460_v63  ;;  %v4263_v36 = vrot.slane %v4257_v6, 1  ;;  %v4266_v17 = vrot.slane %v4257_v6, 2  ;;  %v848_v18 = vrot.slane %v621_v1, 2  ;;  %1064 = vmatmul.f32.gmra.mxu1 %v4257_v6 }
 0x12e   : > { %1918 = vmatpush.msrb.mxu1 %v3429_v13 }
 0x12f   : > { %v4271_v21 = vsel %vm691_vm0, %v732_v34, %v4263_v36  ;;  %v4275_v27 = vsel %vm804_vm1, %v845_v19, %v4266_v17  ;;  %v4280_v31 = vsel %vm804_vm1, %v4266_v17, %v848_v18  ;;  %v735_v34 = vrot.slane %v621_v1, 1  ;;  %v3428_v19 = vld [vmem:[%s6051_s3 + $0x250] sm:$0xff]  ;;  %v3449_v18 = vld [vmem:[%s6051_s3 + $0x2f8] sm:$0xff] }
 0x130   : > { %v399_v22 = vpop.f32.mrf.mxu0  ;;  %6087 = vst [vmem:[#allocation12_spill] sm:$0xff] %v4280_v31  ;;  %1174 = vmatmul.f32.gmra.mxu2 %v4271_v21  ;;  %1919 = vmatpush.msrb.mxu1 %v3428_v19  ;;  %v3426_v19 = vld [vmem:[%s6051_s3 + $0x240] sm:$0xff]  ;;  %v3447_v31 = vld [vmem:[%s6051_s3 + $0x2e8] sm:$0xff] }
 0x131   : > { %v400_v43 = vadd.f32 %v3932_v7, %v399_v22  ;;  %2027 = vmatpush.msrb.mxu2 %v3449_v18  ;;  %v4328_v18 = vpop.f32.mrf.mxu2 }
 0x132   : > { %v1020_v13 = vpop.f32.mrf.mxu1  ;;  %6090 = vst [vmem:[#allocation15_spill] sm:$0xff] %v4328_v18 }
 0x133   : > { %v461_v41 = vmax.f32 %v400_v43, 0.0  ;;  %1844 = vmatmul.f32.gmra.mxu0 %v4150_v20 }
 0x134   : > { %v4296_v63 = vld [vmem:[#allocation2 + $0xd8] sm:$0xff] }
 0x135   : > { %548 = vst [vmem:[#allocation2 + $0xe1] sm:$0xff] %v461_v41  ;;  %v737_v35 = vrot.slane %v4296_v63, 1  ;;  %v736_v41 = vsel %vm691_vm0, %v4263_v36, %v735_v34  ;;  %v310_v34 = vld [vmem:[%s3717_s15 + $0xf8] sm:$0xff]  ;;  %1067 = vmatmul.f32.gmra.mxu1 %v4296_v63 }
 0x136   : > { %440 = vmatmul.f32.gmra.mxu3 %v310_v34 }
 0x138   : > { %v402_v59 = vpop.f32.mrf.mxu0  ;;  %1177 = vmatmul.f32.gmra.mxu2 %v736_v41 }
 0x139   : > { %v403_v20 = vadd.f32 %v3932_v7, %v402_v59  ;;  %v3427_v59 = vld [vmem:[%s6051_s3 + $0x248] sm:$0xff] }
 0x13a   : > { %1920 = vmatpush.msrb.mxu1 %v3427_v59 }
 0x13b   : > { %v462_v22 = vmax.f32 %v403_v20, 0.0  ;;  %1847 = vmatmul.f32.gmra.mxu0 %v4180_v50  ;;  %v850_v50 = vrot.slane %v4296_v63, 2 }
 0x13c   : > { %v4310_v43 = vld [vmem:[#allocation2 + $0xe0] sm:$0xff]  ;;  %v4312_v1 = vld [vmem:[#allocation2 + $0xe8] sm:$0x3]  ;;  %1921 = vmatpush.msrb.mxu1 %v3426_v19 }
 0x13d   : > { %549 = vst [vmem:[#allocation2 + $0xf1] sm:$0xff] %v462_v22  ;;  %v4318_v56 = vrot.slane %v4310_v43, 1  ;;  %v4321_v30 = vrot.slane %v4310_v43, 2  ;;  %v853_v20 = vrot.slane %v4312_v1, 2  ;;  %v3448_v22 = vld [vmem:[%s6051_s3 + $0x2f0] sm:$0xff]  ;;  %v3422_v19 = vld [vmem:[%s6051_s3 + $0x220] sm:$0xff]  ;;  %1070 = vmatmul.f32.gmra.mxu1 %v4310_v43 }
 0x13e   : > { %2028 = vmatpush.msrb.mxu2 %v3448_v22  ;;  %v1023_v22 = vpop.f32.mrf.mxu1 }
 0x13f   : > { %v4339_v41 = vsel %vm691_vm0, %v737_v35, %v4318_v56  ;;  %v4343_v18 = vsel %vm804_vm1, %v850_v50, %v4321_v30  ;;  %v4351_v53 = vsel %vm804_vm1, %v4321_v30, %v853_v20  ;;  %v3425_v35 = vld [vmem:[%s6051_s3 + $0x238] sm:$0xff]  ;;  %v3424_v50 = vld [vmem:[%s6051_s3 + $0x230] sm:$0xff]  ;;  %v3423_v20 = vld [vmem:[%s6051_s3 + $0x228] sm:$0xff] }
 0x140   : > { %v405_v46 = vpop.f32.mrf.mxu0  ;;  %6091 = vst [vmem:[#allocation16_spill] sm:$0xff] %v4351_v53  ;;  %2029 = vmatpush.msrb.mxu2 %v3447_v31  ;;  %1922 = vmatpush.msrb.mxu1 %v3425_v35  ;;  %v3445_v31 = vld [vmem:[%s6051_s3 + $0x2d8] sm:$0xff]  ;;  %v740_v35 = vrot.slane %v4312_v1, 1  ;;  %v3442_v1 = vld [vmem:[%s6051_s3 + $0x2c0] sm:$0xff] }
 0x141   : > { %v406_v59 = vadd.f32 %v3932_v7, %v405_v46  ;;  %v3446_v46 = vld [vmem:[%s6051_s3 + $0x2e0] sm:$0xff]  ;;  %1180 = vmatmul.f32.gmra.mxu2 %v4339_v41  ;;  %v3421_v53 = vld [vmem:[%s6051_s3 + $0x218] sm:$0xff] }
 0x142   : > { %2030 = vmatpush.msrb.mxu2 %v3446_v46  ;;  %1923 = vmatpush.msrb.mxu1 %v3424_v50 }
 0x143   : > { %v463_v34 = vmax.f32 %v406_v59, 0.0  ;;  %1850 = vmatmul.f32.gmra.mxu0 %v4183_v57  ;;  %v3444_v57 = vld [vmem:[%s6051_s3 + $0x2d0] sm:$0xff]  ;;  %v1133_v46 = vpop.f32.mrf.mxu2 }
 0x144   : > { %2031 = vmatpush.msrb.mxu2 %v3445_v31  ;;  %1924 = vmatpush.msrb.mxu1 %v3423_v20  ;;  %v4383_v31 = vadd.f32 %v1133_v46, %v1020_v13  ;;  %v4385_v20 = vld [vmem:[#allocation2 + $0xf0] sm:$0xff]  ;;  %v741_v46 = vsel %vm691_vm0, %v4318_v56, %v740_v35 }
 0x145   : > { %550 = vst [vmem:[#allocation2 + $0xf9] sm:$0xff] %v463_v34  ;;  %v3443_v34 = vld [vmem:[%s6051_s3 + $0x2c8] sm:$0xff]  ;;  %v3420_v13 = vld [vmem:[%s6051_s3 + $0x210] sm:$0xff]  ;;  %v855_v35 = vrot.slane %v4385_v20, 2  ;;  %1073 = vmatmul.f32.gmra.mxu1 %v4385_v20 }
 0x146   : > { %2032 = vmatpush.msrb.mxu2 %v3444_v57  ;;  %1925 = vmatpush.msrb.mxu1 %v3422_v19  ;;  %6092 = vst [vmem:[#allocation17_spill] sm:$0xff] %v4383_v31  ;;  %v420_v57 = vpop.f32.mrf.mxu3  ;;  %v1026_v5 = vpop.f32.mrf.mxu1 }
 0x148   : > { %v408_v59 = vpop.f32.mrf.mxu0  ;;  %2033 = vmatpush.msrb.mxu2 %v3443_v34  ;;  %1926 = vmatpush.msrb.mxu1 %v3421_v53  ;;  %v3419_v53 = vld [vmem:[%s6051_s3 + $0x208] sm:$0xff] }
 0x149   : > { %v409_v50 = vadd.f32 %v3932_v7, %v408_v59  ;;  %v421_v59 = vadd.f32 %v3932_v7, %v420_v57  ;;  %1183 = vmatmul.f32.gmra.mxu2 %v741_v46 }
 0x14a   : > { %2034 = vmatpush.msrb.mxu2 %v3442_v1  ;;  %1927 = vmatpush.msrb.mxu1 %v3420_v13  ;;  %v3418_v13 = vld [vmem:[%s6051_s3 + $0x200] sm:$0xff] }
 0x14b   : > { %v464_v19 = vmax.f32 %v409_v50, 0.0  ;;  %1853 = vmatmul.f32.gmra.mxu0 %v4213_v15  ;;  %v742_v50 = vrot.slane %v4385_v20, 1  ;;  %v468_v57 = vmax.f32 %v421_v59, 0.0 }
 0x14c   : > { %v4400_v31 = vld [vmem:[#allocation2 + $0xf8] sm:$0xff]  ;;  %v627_v44 = vld [vmem:[#allocation2 + $0x100] sm:$0x3]  ;;  %2035 = vmatpush.msrb.mxu2 %v3441_v3  ;;  %1928 = vmatpush.msrb.mxu1 %v3419_v53 }
 0x14d   : > { %551 = vst [vmem:[#allocation2 + $0x109] sm:$0xff] %v464_v19  ;;  %v4407_v15 = vrot.slane %v4400_v31, 1  ;;  %v4410_v34 = vrot.slane %v4400_v31, 2  ;;  %v3440_v19 = vld [vmem:[%s6051_s3 + $0x2b0] sm:$0xff]  ;;  %1076 = vmatmul.f32.gmra.mxu1 %v4400_v31 }
 0x14e   : > { %555 = vst [vmem:[#allocation2 + $0x139] sm:$0xff] %v468_v57  ;;  %v1136_v57 = vpop.f32.mrf.mxu2  ;;  %2036 = vmatpush.msrb.mxu2 %v3440_v19  ;;  %v423_v11 = vpop.f32.mrf.mxu3  ;;  %1929 = vmatpush.msrb.mxu1 %v3418_v13  ;;  %v3438_v19 = vld [vmem:[%s6051_s3 + $0x2a0] sm:$0xff] }
 0x14f   : > { %6093 = vst [vmem:[#allocation18_spill] sm:$0xff] %v4407_v15  ;;  %v4421_v1 = vsel %vm691_vm0, %v742_v50, %v4407_v15  ;;  %v4428_v46 = vsel %vm804_vm1, %v855_v35, %v4410_v34  ;;  %v858_v50 = vrot.slane %v627_v44, 2  ;;  %v4435_v53 = vadd.f32 %v1136_v57, %v1023_v22  ;;  %v1029_v22 = vpop.f32.mrf.mxu1 }
 0x150   : > { %6094 = vst [vmem:[#allocation19_spill] sm:$0xff] %v4410_v34  ;;  %v411_v59 = vpop.f32.mrf.mxu0  ;;  %v424_v35 = vadd.f32 %v3932_v7, %v423_v11  ;;  %2037 = vmatpush.msrb.mxu2 %v3439_v45  ;;  %v3436_v45 = vld [vmem:[%s6051_s3 + $0x290] sm:$0xff] }
 0x151   : > { %6095 = vst [vmem:[#allocation20_spill] sm:$0xff] %v4421_v1  ;;  %v412_v3 = vadd.f32 %v3932_v7, %v411_v59  ;;  %v4441_v59 = vsel %vm804_vm1, %v4410_v34, %v858_v50  ;;  %1186 = vmatmul.f32.gmra.mxu2 %v4421_v1 }
 0x152   : > { %6096 = vst [vmem:[#allocation21_spill] sm:$0xff] %v4428_v46  ;;  %v469_v16 = vmax.f32 %v424_v35, 0.0  ;;  %2038 = vmatpush.msrb.mxu2 %v3438_v19 }
 0x153   : > { %6097 = vst [vmem:[#allocation22_spill] sm:$0xff] %v4435_v53  ;;  %v465_v52 = vmax.f32 %v412_v3, 0.0  ;;  %1856 = vmatmul.f32.gmra.mxu0 %v4219_v28  ;;  %v3437_v28 = vld [vmem:[%s6051_s3 + $0x298] sm:$0xff]  ;;  %v745_v3 = vrot.slane %v627_v44, 1 }
 0x154   : > { %6098 = vst [vmem:[#allocation23_spill] sm:$0xff] %v4441_v59  ;;  %2039 = vmatpush.msrb.mxu2 %v3437_v28  ;;  %v4457_v50 = vld [vmem:[#allocation2 + $0x108] sm:$0xff] }
 0x155   : > { %552 = vst [vmem:[#allocation2 + $0x111] sm:$0xff] %v465_v52  ;;  %v860_v44 = vrot.slane %v4457_v50, 2  ;;  %v746_v28 = vsel %vm691_vm0, %v4407_v15, %v745_v3  ;;  %v4483_v53 = vld [vmem:[#allocation2 + $0x138] sm:$0xff]  ;;  %1079 = vmatmul.f32.gmra.mxu1 %v4457_v50 }
 0x156   : > { %556 = vst [vmem:[#allocation2 + $0x141] sm:$0xff] %v469_v16  ;;  %v1139_v13 = vpop.f32.mrf.mxu2  ;;  %v3435_v16 = vld [vmem:[%s6051_s3 + $0x288] sm:$0xff]  ;;  %v426_v35 = vpop.f32.mrf.mxu3  ;;  %2040 = vmatpush.msrb.mxu2 %v3436_v45  ;;  %v870_v15 = vrot.slane %v4483_v53, 2 }
 0x157   : > { %v4455_v52 = vadd.f32 %v1139_v13, %v1026_v5  ;;  %v427_v59 = vadd.f32 %v3932_v7, %v426_v35  ;;  %v3434_v5 = vld [vmem:[%s6051_s3 + $0x280] sm:$0xff] }
 0x158   : > { %v414_v11 = vpop.f32.mrf.mxu0  ;;  %2041 = vmatpush.msrb.mxu2 %v3435_v16 }
 0x159   : > { %v415_v57 = vadd.f32 %v3932_v7, %v414_v11  ;;  %6099 = vst [vmem:[#allocation24_spill] sm:$0xff] %v4455_v52  ;;  %1189 = vmatmul.f32.gmra.mxu2 %v746_v28 }
 0x15a   : > { %2042 = vmatpush.msrb.mxu2 %v3434_v5 }
 0x15b   : > { %v466_v19 = vmax.f32 %v415_v57, 0.0  ;;  %1859 = vmatmul.f32.gmra.mxu0 %v4252_v60  ;;  %v470_v60 = vmax.f32 %v427_v59, 0.0  ;;  %v1032_v57 = vpop.f32.mrf.mxu1 }
 0x15c   : > { %v4464_v11 = vld [vmem:[#allocation2 + $0x110] sm:$0xff]  ;;  %v630_v35 = vld [vmem:[#allocation2 + $0x118] sm:$0x3] }
 0x15d   : > { %553 = vst [vmem:[#allocation2 + $0x121] sm:$0xff] %v466_v19  ;;  %v4473_v13 = vrot.slane %v4464_v11, 2  ;;  %v4476_v45 = vrot.slane %v4464_v11, 1  ;;  %v747_v19 = vrot.slane %v4457_v50, 1  ;;  %v4486_v16 = vld [vmem:[#allocation2 + $0x140] sm:$0xff]  ;;  %1082 = vmatmul.f32.gmra.mxu1 %v4464_v11 }
 0x15e   : > { %557 = vst [vmem:[#allocation2 + $0x151] sm:$0xff] %v470_v60  ;;  %v1142_v34 = vpop.f32.mrf.mxu2  ;;  %v863_v60 = vrot.slane %v630_v35, 2 }
 0x15f   : > { %6100 = vst [vmem:[#allocation25_spill] sm:$0xff] %v4473_v13  ;;  %v4480_v52 = vsel %vm804_vm1, %v860_v44, %v4473_v13  ;;  %v4489_v28 = vadd.f32 %v1142_v34, %v1029_v22  ;;  %v4493_v5 = vsel %vm691_vm0, %v747_v19, %v4476_v45  ;;  %v429_v44 = vpop.f32.mrf.mxu3  ;;  %v4503_v34 = vld [vmem:[#allocation2 + $0x148] sm:$0x3] }
 0x160   : > { %6101 = vst [vmem:[#allocation26_spill] sm:$0xff] %v4476_v45  ;;  %v417_v3 = vpop.f32.mrf.mxu0  ;;  %v430_v46 = vadd.f32 %v3932_v7, %v429_v44 }
 0x161   : > { %6102 = vst [vmem:[#allocation27_spill] sm:$0xff] %v4480_v52  ;;  %v418_v59 = vadd.f32 %v3932_v7, %v417_v3  ;;  %v4499_v3 = vrot.slane %v4486_v16, 2  ;;  %1192 = vmatmul.f32.gmra.mxu2 %v4493_v5 }
 0x162   : > { %6103 = vst [vmem:[#allocation28_spill] sm:$0xff] %v4489_v28  ;;  %v471_v22 = vmax.f32 %v430_v46, 0.0  ;;  %v750_v28 = vrot.slane %v630_v35, 1 }
 0x163   : > { %6104 = vst [vmem:[#allocation29_spill] sm:$0xff] %v4493_v5  ;;  %v467_v52 = vmax.f32 %v418_v59, 0.0  ;;  %1862 = vmatmul.f32.gmra.mxu0 %v4257_v6  ;;  %v4509_v6 = vsel %vm804_vm1, %v4473_v13, %v863_v60  ;;  %v1035_v19 = vpop.f32.mrf.mxu1  ;;  %v4513_v7 = vsel %vm804_vm1, %v870_v15, %v4499_v3  ;;  %v873_v59 = vrot.slane %v4503_v34, 2  ;;  %v4529_v15 = vld [vmem:[%s6050_s2] ss:$0 sm:$0xff] }
 0x164   : > { %6105 = vst [vmem:[#allocation30_spill] sm:$0xff] %v4499_v3  ;;  %v4501_v1 = vld [vmem:[#allocation2 + $0x120] sm:$0xff] }
 0x165   : > { %554 = vst [vmem:[#allocation2 + $0x129] sm:$0xff] %v467_v52  ;;  %1085 = vmatmul.f32.vlgmr.msrb.gmra.mxu3 %v4501_v1  ;;  %v4520_v46 = vsel %vm804_vm1, %v4499_v3, %v873_v59  ;;  %v865_v59 = vrot.slane %v4501_v1, 2  ;;  %1930 = vmatmul.f32.vlgmr.msrb.gmra.mxu1 %v3986_v42 }
 0x166   : > { %6106 = vst [vmem:[#allocation31_spill] sm:$0xff] %v4509_v6  ;;  %v1145_v52 = vpop.f32.mrf.mxu2 }
 0x167   : > { %558 = vst [vmem:[#allocation2 + $0x159] sm:$0xff] %v471_v22  ;;  %v4523_v60 = vadd.f32 %v1145_v52, %v1032_v57  ;;  %v432_v6 = vpop.f32.mrf.mxu3  ;;  %v751_v57 = vsel %vm691_vm0, %v4476_v45, %v750_v28 }
 0x168   : > { %6107 = vst [vmem:[#allocation32_spill] sm:$0xff] %v4513_v7  ;;  %v4516_v44 = vpop.f32.mrf.mxu0  ;;  %v433_v22 = vadd.f32 %v4529_v15, %v432_v6  ;;  %v4544_v6 = vld [vmem:[#allocation2 + $0x150] sm:$0xff] }
 0x169   : > { %6108 = vst [vmem:[#allocation33_spill] sm:$0xff] %v4516_v44  ;;  %1195 = vmatmul.f32.gmra.mxu2 %v751_v57  ;;  %v1402_v57 = vld [vmem:[#allocation2 + $0x28] sm:$0x3] }
 0x16a   : > { %6109 = vst [vmem:[#allocation34_spill] sm:$0xff] %v4520_v46  ;;  %v1499_v51 = vrot.slane %v1402_v57, 1 }
 0x16b   : > { %6110 = vst [vmem:[#allocation35_spill] sm:$0xff] %v4523_v60  ;;  %1865 = vmatmul.f32.gmra.mxu0 %v4296_v63  ;;  %v472_v63 = vmax.f32 %v433_v22, 0.0  ;;  %v1038_v60 = vpop.f32.mrf.mxu1 }
 0x16c   : > { %v4532_v44 = vld [vmem:[#allocation2 + $0x128] sm:$0xff]  ;;  %v4534_v35 = vld [vmem:[#allocation2 + $0x130] sm:$0x3] }
 0x16d   : > { %v4540_v52 = vrot.slane %v4532_v44, 2  ;;  %1088 = vmatmul.f32.gmra.mxu3 %v4532_v44  ;;  %v868_v46 = vrot.slane %v4534_v35, 2  ;;  %559 = vst [vmem:[#allocation2 + $0x169] sm:$0xff] %v472_v63  ;;  %v875_v63 = vrot.slane %v4544_v6, 2 }
 0x16e   : > { %v1148_v28 = vpop.f32.mrf.mxu2  ;;  %v4552_v13 = vld [vmem:[#allocation2 + $0x158] sm:$0xff] }
 0x16f   : > { %6111 = vst [vmem:[#allocation36_spill] sm:$0xff] %v4540_v52  ;;  %v4548_v3 = vsel %vm804_vm1, %v865_v59, %v4540_v52  ;;  %v4556_v45 = vsel %vm804_vm1, %v4540_v52, %v868_v46  ;;  %v4559_v22 = vadd.f32 %v1148_v28, %v1035_v19  ;;  %v435_v5 = vpop.f32.mrf.mxu3  ;;  %v4563_v59 = vrot.slane %v4552_v13, 2 }
 0x170   : > { %6112 = vst [vmem:[#allocation37_spill] sm:$0xff] %v4548_v3  ;;  %v4550_v7 = vpop.f32.mrf.mxu0  ;;  %v4567_v3 = vld [vmem:[#allocation2 + $0x160] sm:$0x3] }
 0x171   : > { %6113 = vst [vmem:[#allocation38_spill] sm:$0xff] %v4550_v7  ;;  %v436_v7 = vadd.f32 %v4529_v15, %v435_v5  ;;  %2043 = vmatmul.f32.vlgmr.msrb.gmra.mxu2 %v3995_v48  ;;  %v4573_v42 = vsel %vm804_vm1, %v875_v63, %v4563_v59  ;;  %v878_v19 = vrot.slane %v4567_v3, 2  ;;  %v1500_v5 = vsel %vm691_vm0, %v3975_v32, %v1499_v51 }
 0x172   : > { %6114 = vst [vmem:[#allocation39_spill] sm:$0xff] %v4556_v45  ;;  %1933 = vmatmul.f32.gmra.mxu1 %v1500_v5 }
 0x173   : > { %6115 = vst [vmem:[#allocation40_spill] sm:$0xff] %v4559_v22  ;;  %1868 = vmatmul.f32.gmra.mxu0 %v4310_v43  ;;  %v473_v46 = vmax.f32 %v436_v7, 0.0  ;;  %v1041_v28 = vpop.f32.mrf.mxu1  ;;  %v4580_v43 = vsel %vm804_vm1, %v4563_v59, %v878_v19  ;;  %v1611_v22 = vrot.slane %v1402_v57, 2 }
 0x174   : > { %6117 = vst [vmem:[#allocation42_spill] sm:$0xff] %v4580_v43 }
 0x175   : > { %1091 = vmatmul.f32.gmra.mxu3 %v4483_v53  ;;  %560 = vst [vmem:[#allocation2 + $0x171] sm:$0xff] %v473_v46  ;;  %v1612_v63 = vsel %vm804_vm1, %v3978_v33, %v1611_v22 }
 0x176   : > { %v1151_v7 = vpop.f32.mrf.mxu2 }
 0x177   : > { %v4584_v52 = vadd.f32 %v1151_v7, %v1038_v60 }
 0x178   : > { %v4576_v45 = vpop.f32.mrf.mxu0 }
 0x179   : > { %6116 = vst [vmem:[#allocation41_spill] sm:$0xff] %v4576_v45  ;;  %2046 = vmatmul.f32.gmra.mxu2 %v1612_v63  ;;  %v4590_v45 = vld [vmem:[#allocation2 + $0x168] sm:$0xff] }
 0x17a   : > { %6118 = vst [vmem:[#allocation43_spill] sm:$0xff] %v4584_v52  ;;  %v880_v32 = vrot.slane %v4590_v45, 2  ;;  %1936 = vmatmul.f32.gmra.mxu1 %v4054_v38 }
 0x17b   : > { %1871 = vmatmul.f32.gmra.mxu0 %v4385_v20  ;;  %v1044_v46 = vpop.f32.mrf.mxu1  ;;  %v1405_v20 = vld [vmem:[#allocation2 + $0x40] sm:$0x3] }
 0x17c   : > { %v4595_v51 = vld [vmem:[#allocation2 + $0x170] sm:$0xff]  ;;  %v4604_v22 = vld [vmem:[#allocation2 + $0x178] sm:$0x3]  ;;  %v1504_v57 = vrot.slane %v1405_v20, 1 }
 0x17d   : > { %1094 = vmatmul.f32.gmra.mxu3 %v4486_v16  ;;  %v4601_v33 = vrot.slane %v4595_v51, 2  ;;  %v883_v38 = vrot.slane %v4604_v22, 2 }
 0x17e   : > { %v1154_v43 = vpop.f32.mrf.mxu2 }
 0x17f   : > { %v4598_v60 = vadd.f32 %v1154_v43, %v1041_v28  ;;  %v4609_v5 = vsel %vm804_vm1, %v880_v32, %v4601_v33  ;;  %v4615_v43 = vsel %vm804_vm1, %v4601_v33, %v883_v38 }
 0x180   : > { %v4592_v19 = vpop.f32.mrf.mxu0  ;;  %6120 = vst [vmem:[#allocation45_spill] sm:$0xff] %v4615_v43 }
 0x181   : > { %6119 = vst [vmem:[#allocation44_spill] sm:$0xff] %v4598_v60  ;;  %2049 = vmatmul.f32.gmra.mxu2 %v4038_v12  ;;  %v1616_v60 = vrot.slane %v1405_v20, 2 }
 0x183   : > { %1874 = vmatmul.f32.gmra.mxu0 %v4400_v31  ;;  %v1047_v28 = vpop.f32.mrf.mxu1  ;;  %v1505_v31 = vsel %vm691_vm0, %v4031_v10, %v1504_v57  ;;  %v1617_v32 = vsel %vm804_vm1, %v4024_v8, %v1616_v60  ;;  %v996_v10 = vld [vmem:[%s6051_s3 + $0x178] sm:$0xff] }
 0x184   : > { %1939 = vmatmul.f32.gmra.mxu1 %v1505_v31  ;;  %1223 = vmatpush.msrb.mxu3 %v996_v10 }
 0x185   : > { %1097 = vmatmul.f32.gmra.mxu3 %v4544_v6 }
 0x186   : > { %v1157_v7 = vpop.f32.mrf.mxu2 }
 0x187   : > { %v4621_v52 = vadd.f32 %v1157_v7, %v1044_v46  ;;  %v1408_v46 = vld [vmem:[#allocation2 + $0x58] sm:$0x3] }
 0x188   : > { %v4619_v63 = vpop.f32.mrf.mxu0  ;;  %v1509_v60 = vrot.slane %v1408_v46, 1 }
 0x189   : > { %6121 = vst [vmem:[#allocation46_spill] sm:$0xff] %v4621_v52  ;;  %2052 = vmatmul.f32.gmra.mxu2 %v1617_v32  ;;  %v1621_v32 = vrot.slane %v1408_v46, 2  ;;  %v4661_v46 = vrot.slane %v4532_v44, 1 }
 0x18b   : > { %1877 = vmatmul.f32.gmra.mxu0 %v4457_v50  ;;  %v1050_v38 = vpop.f32.mrf.mxu1  ;;  %v995_v50 = vld [vmem:[%s6051_s3 + $0x170] sm:$0xff] }
 0x18c   : > { %1942 = vmatmul.f32.gmra.mxu1 %v4103_v54  ;;  %1224 = vmatpush.msrb.mxu3 %v995_v50  ;;  %v994_v54 = vld [vmem:[%s6051_s3 + $0x168] sm:$0xff]  ;;  %v1622_v50 = vsel %vm804_vm1, %v4081_v37, %v1621_v32  ;;  %v1411_v37 = vld [vmem:[#allocation2 + $0x70] sm:$0x3] }
 0x18d   : > { %1100 = vmatmul.f32.gmra.mxu3 %v4552_v13 }
 0x18e   : > { %v1160_v57 = vpop.f32.mrf.mxu2  ;;  %1225 = vmatpush.msrb.mxu3 %v994_v54  ;;  %v752_v54 = vrot.slane %v4501_v1, 1 }
 0x18f   : > { %v4631_v20 = vadd.f32 %v1160_v57, %v1047_v28  ;;  %v1510_v28 = vsel %vm691_vm0, %v4085_v39, %v1509_v60 }
 0x190   : > { %v4636_v8 = vpop.f32.mrf.mxu0  ;;  %v4673_v32 = vsel %vm691_vm0, %v752_v54, %v4661_v46 }
 0x191   : > { %6122 = vst [vmem:[#allocation47_spill] sm:$0xff] %v4631_v20  ;;  %2055 = vmatmul.f32.gmra.mxu2 %v4089_v49  ;;  %v6159_v20 = vld [vmem:[#allocation25_spill] sm:$0xff] }
 0x193   : > { %1880 = vmatmul.f32.gmra.mxu0 %v4464_v11  ;;  %v1053_v31 = vpop.f32.mrf.mxu1  ;;  %v993_v11 = vld [vmem:[%s6051_s3 + $0x160] sm:$0xff] }
 0x194   : > { %1945 = vmatmul.f32.gmra.mxu1 %v1510_v28  ;;  %1226 = vmatpush.msrb.mxu3 %v993_v11  ;;  %v1514_v11 = vrot.slane %v1411_v37, 1 }
 0x195   : > { %1103 = vmatmul.f32.gmra.mxu3 %v4590_v45 }
 0x196   : > { %v1163_v7 = vpop.f32.mrf.mxu2 }
 0x197   : > { %v4646_v10 = vadd.f32 %v1163_v7, %v1050_v38  ;;  %v992_v38 = vld [vmem:[%s6051_s3 + $0x158] sm:$0xff]  ;;  %v991_v7 = vld [vmem:[%s6051_s3 + $0x150] sm:$0xff] }
 0x198   : > { %v4652_v57 = vpop.f32.mrf.mxu0  ;;  %1227 = vmatpush.msrb.mxu3 %v992_v38 }
 0x199   : > { %6123 = vst [vmem:[#allocation48_spill] sm:$0xff] %v4646_v10  ;;  %2058 = vmatmul.f32.gmra.mxu2 %v1622_v50  ;;  %v755_v50 = vrot.slane %v4534_v35, 1  ;;  %v5007_v10 = vld [vmem:[#allocation2 + $0x88] sm:$0x3] }
 0x19a   : > { %1228 = vmatpush.msrb.mxu3 %v991_v7  ;;  %v989_v7 = vld [vmem:[%s6051_s3 + $0x140] sm:$0xff] }
 0x19b   : > { %1883 = vmatmul.f32.gmra.mxu0 %v4501_v1  ;;  %v1056_v39 = vpop.f32.mrf.mxu1  ;;  %v756_v43 = vsel %vm691_vm0, %v4661_v46, %v755_v50 }
 0x19c   : > { %1948 = vmatmul.f32.gmra.mxu1 %v4141_v14 }
 0x19d   : > { %1106 = vmatmul.f32.gmra.mxu3 %v4595_v51 }
 0x19e   : > { %v1166_v60 = vpop.f32.mrf.mxu2 }
 0x19f   : > { %v4665_v28 = vadd.f32 %v1166_v60, %v1053_v31  ;;  %v990_v31 = vld [vmem:[%s6051_s3 + $0x148] sm:$0xff]  ;;  %v1626_v60 = vrot.slane %v1411_v37, 2  ;;  %v757_v37 = vrot.slane %v4483_v53, 1 }
 0x1a0   : > { %v4677_v1 = vpop.f32.mrf.mxu0  ;;  %1229 = vmatpush.msrb.mxu3 %v990_v31 }
 0x1a1   : > { %6124 = vst [vmem:[#allocation49_spill] sm:$0xff] %v4665_v28  ;;  %2061 = vmatmul.f32.gmra.mxu2 %v4130_v25  ;;  %v1627_v35 = vsel %vm804_vm1, %v4123_v4, %v1626_v60  ;;  %v1414_v4 = vld [vmem:[#allocation2 + $0x88] sm:$0x3] }
 0x1a2   : > { %6125 = vst [vmem:[#allocation50_spill] sm:$0xff] %v4677_v1  ;;  %1230 = vmatpush.msrb.mxu3 %v989_v7  ;;  %v986_v60 = vld [vmem:[%s6051_s3 + $0x128] sm:$0xff] }
 0x1a3   : > { %1886 = vmatmul.f32.gmra.mxu0 %v4532_v44  ;;  %v1059_v14 = vpop.f32.mrf.mxu1  ;;  %v1515_v44 = vsel %vm691_vm0, %v4126_v0, %v1514_v11  ;;  %v4700_v11 = vrot.slane %v4486_v16, 1 }
 0x1a4   : > { %1951 = vmatmul.f32.gmra.mxu1 %v1515_v44 }
 0x1a5   : > { %1198 = vmatmul.f32.vlgmr.msra.gmra.mxu3 %v4673_v32 }
 0x1a6   : > { %v1169_v38 = vpop.f32.mrf.mxu2 }
 0x1a7   : > { %v4685_v54 = vadd.f32 %v1169_v38, %v1056_v39  ;;  %v988_v39 = vld [vmem:[%s6051_s3 + $0x138] sm:$0xff]  ;;  %v1519_v38 = vrot.slane %v1414_v4, 1 }
 0x1a8   : > { %1231 = vmatpush.msrb.mxu3 %v988_v39  ;;  %v4702_v31 = vpop.f32.mrf.mxu0  ;;  %v1631_v39 = vrot.slane %v1414_v4, 2 }
 0x1a9   : > { %6126 = vst [vmem:[#allocation51_spill] sm:$0xff] %v4685_v54  ;;  %2064 = vmatmul.f32.gmra.mxu2 %v1627_v35  ;;  %v1520_v7 = vsel %vm691_vm0, %v4159_v24, %v1519_v38  ;;  %v3479_v24 = vld [vmem:[%s6051_s3 + $0x3e8] sm:$0xff]  ;;  %v6157_v54 = vld [vmem:[#allocation26_spill] sm:$0xff] }
 0x1aa   : > { %6127 = vst [vmem:[#allocation52_spill] sm:$0xff] %v4702_v31  ;;  %v1632_v38 = vsel %vm804_vm1, %v4156_v23, %v1631_v39  ;;  %v4756_v23 = vrot.slane %v4552_v13, 1 }
 0x1ab   : > { %1889 = vmatmul.f32.gmra.mxu0 %v4483_v53  ;;  %v1062_v0 = vpop.f32.mrf.mxu1  ;;  %v4713_v53 = vsel %vm691_vm0, %v757_v37, %v4700_v11 }
 0x1ac   : > { %1954 = vmatmul.f32.gmra.mxu1 %v4174_v47 }
 0x1ad   : > { %1201 = vmatmul.f32.gmra.mxu3 %v756_v43  ;;  %v987_v43 = vld [vmem:[%s6051_s3 + $0x130] sm:$0xff] }
 0x1ae   : > { %v1172_v44 = vpop.f32.mrf.mxu2  ;;  %1232 = vmatpush.msrb.mxu3 %v987_v43  ;;  %v985_v43 = vld [vmem:[%s6051_s3 + $0x120] sm:$0xff] }
 0x1af   : > { %v4705_v50 = vadd.f32 %v1172_v44, %v1059_v14  ;;  %v3481_v14 = vld [vmem:[%s6051_s3 + $0x3f8] sm:$0xff]  ;;  %v3480_v44 = vld [vmem:[%s6051_s3 + $0x3f0] sm:$0xff] }
 0x1b0   : > { %2719 = vmatpush.msra.mxu0 %v3481_v14  ;;  %1233 = vmatpush.msrb.mxu3 %v986_v60  ;;  %v4734_v31 = vpop.f32.mrf.mxu0  ;;  %v3478_v60 = vld [vmem:[%s6051_s3 + $0x3e0] sm:$0xff] }
 0x1b1   : > { %6128 = vst [vmem:[#allocation53_spill] sm:$0xff] %v4705_v50  ;;  %2067 = vmatmul.f32.gmra.mxu2 %v4163_v61  ;;  %v6151_v50 = vld [vmem:[#allocation5_spill] sm:$0xff] }
 0x1b2   : > { %6130 = vst [vmem:[#allocation55_spill] sm:$0xff] %v4734_v31  ;;  %1234 = vmatpush.msrb.mxu3 %v985_v43  ;;  %2720 = vmatpush.msra.mxu0 %v3480_v44  ;;  %v762_v44 = vrot.slane %v4544_v6, 1 }
 0x1b3   : > { %1892 = vmatmul.f32.gmra.mxu0 %v4486_v16  ;;  %v1065_v47 = vpop.f32.mrf.mxu1  ;;  %v760_v16 = vrot.slane %v4503_v34, 1  ;;  %v438_v34 = vpop.f32.mrf.mxu3  ;;  %6158 = vst [vmem:[#allocation5_spill] sm:$0xff] %v5007_v10 }
 0x1b4   : > { %1957 = vmatmul.f32.gmra.mxu1 %v1520_v7  ;;  %v439_v4 = vadd.f32 %v4529_v15, %v438_v34  ;;  %2721 = vmatpush.msra.mxu0 %v3479_v24  ;;  %v1417_v34 = vld [vmem:[#allocation2 + $0xa0] sm:$0x3]  ;;  %v3476_v24 = vld [vmem:[%s6051_s3 + $0x3d0] sm:$0xff] }
 0x1b5   : > { %1204 = vmatmul.f32.gmra.mxu3 %v4713_v53 }
 0x1b6   : > { %v1175_v35 = vpop.f32.mrf.mxu2  ;;  %v474_v14 = vmax.f32 %v439_v4, 0.0  ;;  %2722 = vmatpush.msra.mxu0 %v3478_v60  ;;  %v3475_v4 = vld [vmem:[%s6051_s3 + $0x3c8] sm:$0xff]  ;;  %v3474_v60 = vld [vmem:[%s6051_s3 + $0x3c0] sm:$0xff] }
 0x1b7   : > { %v4726_v37 = vadd.f32 %v1175_v35, %v1062_v0  ;;  %v761_v0 = vsel %vm691_vm0, %v4700_v11, %v760_v16  ;;  %v3477_v35 = vld [vmem:[%s6051_s3 + $0x3d8] sm:$0xff] }
 0x1b8   : > { %v984_v16 = vld [vmem:[%s6051_s3 + $0x118] sm:$0xff]  ;;  %561 = vst [vmem:[#allocation2 + $0x181] sm:$0xff] %v474_v14  ;;  %2723 = vmatpush.msra.mxu0 %v3477_v35  ;;  %v1524_v14 = vrot.slane %v1417_v34, 1 }
 0x1b9   : > { %6129 = vst [vmem:[#allocation54_spill] sm:$0xff] %v4726_v37  ;;  %2070 = vmatmul.f32.gmra.mxu2 %v1632_v38  ;;  %1235 = vmatpush.msrb.mxu3 %v984_v16  ;;  %v4776_v38 = vpop.f32.mrf.mxu0  ;;  %v3473_v16 = vld [vmem:[%s6051_s3 + $0x3b8] sm:$0xff] }
 0x1ba   : > { %2724 = vmatpush.msra.mxu0 %v3476_v24  ;;  %6132 = vst [vmem:[#allocation57_spill] sm:$0xff] %v4776_v38 }
 0x1bb   : > { %1895 = vmatmul.f32.gmra.mxu0 %v4544_v6  ;;  %v1068_v7 = vpop.f32.mrf.mxu1  ;;  %v983_v6 = vld [vmem:[%s6051_s3 + $0x110] sm:$0xff] }
 0x1bc   : > { %1960 = vmatmul.f32.gmra.mxu1 %v4207_v9  ;;  %1236 = vmatpush.msrb.mxu3 %v983_v6  ;;  %v4773_v9 = vsel %vm691_vm0, %v762_v44, %v4756_v23  ;;  %v765_v44 = vrot.slane %v4567_v3, 1  ;;  %v1636_v6 = vrot.slane %v1417_v34, 2  ;;  %v981_v3 = vld [vmem:[%s6051_s3 + $0x100] sm:$0xff] }
 0x1bd   : > { %1207 = vmatmul.f32.gmra.mxu3 %v761_v0  ;;  %v441_v0 = vpop.f32.mrf.mxu3  ;;  %2725 = vmatpush.msra.mxu0 %v3475_v4  ;;  %v3472_v4 = vld [vmem:[%s6051_s3 + $0x3b0] sm:$0xff] }
 0x1be   : > { %v1178_v39 = vpop.f32.mrf.mxu2  ;;  %v1637_v34 = vsel %vm804_vm1, %v4189_v58, %v1636_v6 }
 0x1bf   : > { %v4759_v43 = vadd.f32 %v1178_v39, %v1065_v47  ;;  %v442_v47 = vadd.f32 %v4529_v15, %v441_v0  ;;  %v982_v15 = vld [vmem:[%s6051_s3 + $0x108] sm:$0xff]  ;;  %2726 = vmatpush.msra.mxu0 %v3474_v60  ;;  %v1525_v39 = vsel %vm691_vm0, %v4192_v2, %v1524_v14  ;;  %v767_v14 = vrot.slane %v4590_v45, 1 }
 0x1c0   : > { %1237 = vmatpush.msrb.mxu3 %v982_v15  ;;  %v3471_v2 = vld [vmem:[%s6051_s3 + $0x3a8] sm:$0xff]  ;;  %v1445_v15 = vld [vmem:[#allocation2 + $0x180] sm:$0xff] }
 0x1c1   : > { %6131 = vst [vmem:[#allocation56_spill] sm:$0xff] %v4759_v43  ;;  %2073 = vmatmul.f32.gmra.mxu2 %v4196_v26  ;;  %2727 = vmatpush.msra.mxu0 %v3473_v16  ;;  %v4815_v60 = vpop.f32.mrf.mxu0  ;;  %v1683_v58 = vrot.slane %v1445_v15, 2  ;;  %v6150_v43 = vld [vmem:[#allocation19_spill] sm:$0xff] }
 0x1c2   : > { %1238 = vmatpush.msrb.mxu3 %v981_v3  ;;  %6134 = vst [vmem:[#allocation59_spill] sm:$0xff] %v4815_v60 }
 0x1c3   : > { %1898 = vmatmul.f32.gmra.mxu0 %v4552_v13  ;;  %v475_v13 = vmax.f32 %v442_v47, 0.0  ;;  %v1071_v35 = vpop.f32.mrf.mxu1  ;;  %v3470_v47 = vld [vmem:[%s6051_s3 + $0x3a0] sm:$0xff] }
 0x1c4   : > { %1963 = vmatmul.f32.gmra.mxu1 %v1525_v39  ;;  %2728 = vmatpush.msra.mxu0 %v3472_v4  ;;  %v1571_v39 = vrot.slane %v1445_v15, 1 }
 0x1c5   : > { %1210 = vmatmul.f32.gmra.mxu3 %v4773_v9  ;;  %562 = vst [vmem:[#allocation2 + $0x189] sm:$0xff] %v475_v13  ;;  %v4813_v13 = vrot.slane %v4595_v51, 1 }
 0x1c6   : > { %v1181_v24 = vpop.f32.mrf.mxu2  ;;  %2729 = vmatpush.msra.mxu0 %v3471_v2  ;;  %v1420_v2 = vld [vmem:[#allocation2 + $0xb8] sm:$0x3] }
 0x1c7   : > { %v4792_v0 = vadd.f32 %v1181_v24, %v1068_v7  ;;  %v766_v7 = vsel %vm691_vm0, %v4756_v23, %v765_v44 }
 0x1c8   : > { %2730 = vmatpush.msra.mxu0 %v3470_v47  ;;  %v3467_v47 = vld [vmem:[%s6051_s3 + $0x388] sm:$0xff] }
 0x1c9   : > { %6133 = vst [vmem:[#allocation58_spill] sm:$0xff] %v4792_v0  ;;  %2076 = vmatmul.f32.gmra.mxu2 %v1637_v34  ;;  %v3468_v34 = vld [vmem:[%s6051_s3 + $0x390] sm:$0xff] }
 0x1ca   : > { %v4972_v0 = vld [vmem:[#allocation2 + $0x70] sm:$0x3] }
 0x1cb   : > { %1901 = vmatmul.f32.gmra.mxu0 %v4590_v45  ;;  %v1074_v16 = vpop.f32.mrf.mxu1  ;;  %v3469_v45 = vld [vmem:[%s6051_s3 + $0x398] sm:$0xff] }
 0x1cc   : > { %v4817_v44 = vld [vmem:[#allocation2 + $0x188] sm:$0xff]  ;;  %1966 = vmatmul.f32.gmra.mxu1 %v4246_v55  ;;  %2731 = vmatpush.msra.mxu0 %v3469_v45  ;;  %v4839_v55 = vsel %vm691_vm0, %v767_v14, %v4813_v13  ;;  %v3466_v14 = vld [vmem:[%s6051_s3 + $0x380] sm:$0xff] }
 0x1cd   : > { %1213 = vmatmul.f32.gmra.mxu3 %v766_v7  ;;  %v6069_v24 = vrot.slane %v4817_v44, 1  ;;  %v6068_v6 = vrot.slane %v4817_v44, 2  ;;  %v3465_v7 = vld [vmem:[%s6051_s3 + $0x378] sm:$0xff] }
 0x1ce   : > { %v1184_v4 = vpop.f32.mrf.mxu2  ;;  %2606 = vmatpush.msra.mxu3 %v3465_v7  ;;  %2732 = vmatpush.msra.mxu0 %v3468_v34  ;;  %v770_v7 = vrot.slane %v4604_v22, 1 }
 0x1cf   : > { %v4825_v3 = vadd.f32 %v1184_v4, %v1071_v35  ;;  %v4844_v35 = vsel %vm691_vm0, %v1571_v39, %v6069_v24  ;;  %v4849_v45 = vsel %vm804_vm1, %v1683_v58, %v6068_v6  ;;  %v4857_v39 = vpop.f32.mrf.mxu0  ;;  %v1641_v6 = vrot.slane %v1420_v2, 2 }
 0x1d0   : > { %2733 = vmatpush.msra.mxu0 %v3467_v47  ;;  %6136 = vst [vmem:[#allocation61_spill] sm:$0xff] %v4857_v39  ;;  %v3497_v47 = vld [vmem:[%s6051_s3 + $0x478] sm:$0xff]  ;;  %v771_v22 = vsel %vm691_vm0, %v4813_v13, %v770_v7  ;;  %v3563_v39 = vld [vmem:[#allocation2] sm:$0xff]  ;;  %v4881_v7 = vld [vmem:[#allocation2 + $0x30] sm:$0xff] }
 0x1d1   : > { %6135 = vst [vmem:[#allocation60_spill] sm:$0xff] %v4825_v3  ;;  %2079 = vmatmul.f32.gmra.mxu2 %v4232_v62  ;;  %2832 = vmatpush.msra.mxu1 %v3497_v47 }
 0x1d2   : > { %2734 = vmatpush.msra.mxu0 %v3466_v14  ;;  %v1642_v14 = vsel %vm804_vm1, %v4225_v40, %v1641_v6  ;;  %v4879_v40 = vld [vmem:[#allocation2 + $0x38] sm:$0xff] }
 0x1d3   : > { %1904 = vmatmul.f32.gmra.mxu0 %v4595_v51  ;;  %v1529_v51 = vrot.slane %v1420_v2, 1  ;;  %v1077_v4 = vpop.f32.mrf.mxu1 }
 0x1d5   : > { %1216 = vmatmul.f32.gmra.mxu3 %v4839_v55  ;;  %v1530_v58 = vsel %vm691_vm0, %v4228_v29, %v1529_v51  ;;  %v805_v29 = vrot.slane %v3563_v39, 2 }
 0x1d6   : > { %v1187_v34 = vpop.f32.mrf.mxu2  ;;  %1969 = vmatmul.f32.gmra.mxu1 %v1530_v58  ;;  %v1423_v58 = vld [vmem:[#allocation2 + $0xd0] sm:$0x3] }
 0x1d7   : > { %v4861_v24 = vadd.f32 %v1187_v34, %v1074_v16  ;;  %v4876_v34 = vpop.f32.mrf.mxu0  ;;  %v1534_v6 = vrot.slane %v1423_v58, 1 }
 0x1d8   : > { %6139 = vst [vmem:[#allocation64_spill] sm:$0xff] %v4876_v34 }
 0x1d9   : > { %6137 = vst [vmem:[#allocation62_spill] sm:$0xff] %v4861_v24  ;;  %2082 = vmatmul.f32.gmra.mxu2 %v1642_v14  ;;  %v2301_v14 = vrot.slane %v4881_v7, 1 }
 0x1db   : > { %1907 = vmatmul.f32.gmra.mxu0 %v1445_v15  ;;  %v1080_v2 = vpop.f32.mrf.mxu1  ;;  %v3464_v15 = vld [vmem:[%s6051_s3 + $0x370] sm:$0xff] }
 0x1dc   : > { %2607 = vmatpush.msra.mxu3 %v3464_v15  ;;  %v1646_v15 = vrot.slane %v1423_v58, 2 }
 0x1dd   : > { %1219 = vmatmul.f32.gmra.mxu3 %v771_v22 }
 0x1de   : > { %v1190_v51 = vpop.f32.mrf.mxu2  ;;  %1972 = vmatmul.f32.gmra.mxu1 %v4271_v21  ;;  %v2302_v21 = vrot.slane %v4879_v40, 1 }
 0x1df   : > { %v4871_v16 = vadd.f32 %v1190_v51, %v1077_v4  ;;  %v3564_v4 = vld [vmem:[#allocation2 + $0x10] sm:$0x3]  ;;  %v1535_v51 = vsel %vm691_vm0, %v4263_v36, %v1534_v6  ;;  %v4899_v24 = vpop.f32.mrf.mxu0  ;;  %v1647_v36 = vsel %vm804_vm1, %v4266_v17, %v1646_v15  ;;  %v1426_v6 = vld [vmem:[#allocation2 + $0xe8] sm:$0x3] }
 0x1e0   : > { %v808_v39 = vrot.slane %v3564_v4, 2  ;;  %v2303_v38 = vsel %vm691_vm0, %v2301_v14, %v2302_v21  ;;  %v3496_v4 = vld [vmem:[%s6051_s3 + $0x470] sm:$0xff]  ;;  %6141 = vst [vmem:[#allocation66_spill] sm:$0xff] %v4899_v24  ;;  %v3463_v17 = vld [vmem:[%s6051_s3 + $0x368] sm:$0xff]  ;;  %v1539_v14 = vrot.slane %v1426_v6, 1 }
 0x1e1   : > { %6138 = vst [vmem:[#allocation63_spill] sm:$0xff] %v4871_v16  ;;  %2085 = vmatmul.f32.gmra.mxu2 %v4275_v27  ;;  %v4897_v16 = vld [vmem:[#allocation2 + $0x40] sm:$0x3]  ;;  %2833 = vmatpush.msra.mxu1 %v3496_v4 }
 0x1e2   : > { %v809_v31 = vsel %vm804_vm1, %v805_v29, %v808_v39  ;;  %2608 = vmatpush.msra.mxu3 %v3463_v17 }
 0x1e3   : > { %1910 = vmatmul.f32.gmra.mxu0 %v4817_v44  ;;  %v1083_v47 = vpop.f32.mrf.mxu1 }
 0x1e5   : > { %1239 = vmatmul.f32.vlgmr.msrb.gmra.mxu3 %v805_v29 }
 0x1e6   : > { %v1193_v34 = vpop.f32.mrf.mxu2  ;;  %1975 = vmatmul.f32.gmra.mxu1 %v1535_v51  ;;  %v4918_v51 = vld [vmem:[#allocation2 + $0x48] sm:$0xff] }
 0x1e7   : > { %v4890_v60 = vadd.f32 %v1193_v34, %v1080_v2  ;;  %v2304_v2 = vrot.slane %v4897_v16, 1  ;;  %v2306_v4 = vrot.slane %v4918_v51, 1 }
 0x1e8   : > { %v4885_v22 = vpop.f32.mrf.mxu3 }
 0x1e9   : > { %6140 = vst [vmem:[#allocation65_spill] sm:$0xff] %v4890_v60  ;;  %2088 = vmatmul.f32.gmra.mxu2 %v1647_v36  ;;  %v2305_v39 = vsel %vm691_vm0, %v2302_v21, %v2304_v2  ;;  %v1540_v36 = vsel %vm691_vm0, %v4318_v56, %v1539_v14  ;;  %v1651_v2 = vrot.slane %v1426_v6, 2 }
 0x1eb   : > { %2735 = vmatmul.f32.vlgmr.msra.gmra.mxu0 %v2303_v38  ;;  %v4904_v58 = vpop.f32.mrf.mxu1  ;;  %v1652_v17 = vsel %vm804_vm1, %v4321_v30, %v1651_v2  ;;  %v3462_v30 = vld [vmem:[%s6051_s3 + $0x360] sm:$0xff] }
 0x1ec   : > { %2609 = vmatpush.msra.mxu3 %v3462_v30 }
 0x1ed   : > { %1242 = vmatmul.f32.gmra.mxu3 %v809_v31  ;;  %v4915_v31 = vld [vmem:[#allocation2 + $0x50] sm:$0xff] }
 0x1ee   : > { %v1196_v34 = vpop.f32.mrf.mxu2  ;;  %1978 = vmatmul.f32.gmra.mxu1 %v4339_v41  ;;  %v2307_v41 = vrot.slane %v4915_v31, 1 }
 0x1ef   : > { %v4909_v38 = vadd.f32 %v1196_v34, %v1083_v47  ;;  %v4922_v47 = vpop.f32.mrf.mxu0  ;;  %v3495_v34 = vld [vmem:[%s6051_s3 + $0x468] sm:$0xff] }
 0x1f0   : > { %v4906_v29 = vpop.f32.mrf.mxu3  ;;  %6143 = vst [vmem:[#allocation68_spill] sm:$0xff] %v4922_v47  ;;  %2834 = vmatpush.msra.mxu1 %v3495_v34  ;;  %v6144_v47 = vld [vmem:[#allocation4_spill] sm:$0xff]  ;;  %v4955_v34 = vld [vmem:[#allocation2 + $0x60] sm:$0xff] }
 0x1f1   : > { %6142 = vst [vmem:[#allocation67_spill] sm:$0xff] %v4909_v38  ;;  %2091 = vmatmul.f32.gmra.mxu2 %v4343_v18  ;;  %v6148_v38 = vld [vmem:[#allocation18_spill] sm:$0xff] }
 0x1f3   : > { %2738 = vmatmul.f32.gmra.mxu0 %v2305_v39  ;;  %v4924_v21 = vpop.f32.mrf.mxu1  ;;  %v4935_v39 = vld [vmem:[#allocation2 + $0x58] sm:$0x3] }
 0x1f4   : > { %v2309_v56 = vrot.slane %v4935_v39, 1 }
 0x1f5   : > { %1245 = vmatmul.f32.gmra.mxu3 %v3995_v48  ;;  %v2308_v48 = vsel %vm691_vm0, %v2306_v4, %v2307_v41 }
 0x1f6   : > { %1981 = vmatmul.f32.gmra.mxu1 %v1540_v36  ;;  %v6146_v36 = vld [vmem:[#allocation20_spill] sm:$0xff]  ;;  %v2310_v24 = vsel %vm691_vm0, %v2307_v41, %v2309_v56  ;;  %v2311_v56 = vrot.slane %v4955_v34, 1 }
 0x1f7   : > { %v4945_v4 = vpop.f32.mrf.mxu0 }
 0x1f8   : > { %v4926_v15 = vpop.f32.mrf.mxu3  ;;  %6145 = vst [vmem:[#allocation4_spill] sm:$0xff] %v4945_v4 }
 0x1f9   : > { %2094 = vmatmul.f32.gmra.mxu2 %v1652_v17  ;;  %v6147_v17 = vld [vmem:[#allocation21_spill] sm:$0xff] }
 0x1fb   : > { %2741 = vmatmul.f32.gmra.mxu0 %v2308_v48  ;;  %v4941_v6 = vpop.f32.mrf.mxu1  ;;  %v1429_v48 = vld [vmem:[#allocation2 + $0x100] sm:$0x3] }
 0x1fc   : > { %v1544_v2 = vrot.slane %v1429_v48, 1  ;;  %v1656_v60 = vrot.slane %v1429_v48, 2 }
 0x1fd   : > { %1248 = vmatmul.f32.gmra.mxu3 %v6144_v47  ;;  %v4952_v47 = vld [vmem:[#allocation2 + $0x68] sm:$0xff] }
 0x1fe   : > { %1984 = vmatmul.f32.gmra.mxu1 %v6146_v36  ;;  %v2312_v36 = vrot.slane %v4952_v47, 1  ;;  %v1657_v37 = vsel %vm804_vm1, %v6150_v43, %v1656_v60  ;;  %v4987_v43 = vld [vmem:[#allocation2 + $0x80] sm:$0xff]  ;;  %v4992_v60 = vld [vmem:[#allocation2 + $0x78] sm:$0xff] }
 0x1ff   : > { %v4970_v3 = vpop.f32.mrf.mxu0  ;;  %6153 = vst [vmem:[#allocation21_spill] sm:$0xff] %v4987_v43 }
 0x200   : > { %v4943_v14 = vpop.f32.mrf.mxu3  ;;  %v2313_v30 = vsel %vm691_vm0, %v2311_v56, %v2312_v36  ;;  %6149 = vst [vmem:[#allocation20_spill] sm:$0xff] %v4970_v3  ;;  %v6152_v56 = vld [vmem:[#allocation29_spill] sm:$0xff]  ;;  %v6156_v3 = vld [vmem:[#allocation27_spill] sm:$0xff] }
 0x201   : > { %2097 = vmatmul.f32.gmra.mxu2 %v6147_v17  ;;  %6155 = vst [vmem:[#allocation19_spill] sm:$0xff] %v4992_v60 }
 0x203   : > { %2744 = vmatmul.f32.gmra.mxu0 %v2310_v24  ;;  %v4959_v4 = vpop.f32.mrf.mxu1  ;;  %v1545_v24 = vsel %vm691_vm0, %v6148_v38, %v1544_v2  ;;  %v2314_v38 = vrot.slane %v4972_v0, 1 }
 0x205   : > { %1251 = vmatmul.f32.gmra.mxu3 %v4038_v12  ;;  %v3494_v12 = vld [vmem:[%s6051_s3 + $0x460] sm:$0xff] }
 0x206   : > { %1987 = vmatmul.f32.gmra.mxu1 %v1545_v24  ;;  %v1432_v24 = vld [vmem:[#allocation2 + $0x118] sm:$0x3] }
 0x207   : > { %2835 = vmatpush.msra.mxu1 %v3494_v12  ;;  %v3461_v12 = vld [vmem:[%s6051_s3 + $0x358] sm:$0xff]  ;;  %v1661_v28 = vrot.slane %v1432_v24, 2 }
 0x208   : > { %v4961_v41 = vpop.f32.mrf.mxu3  ;;  %2610 = vmatpush.msra.mxu3 %v3461_v12 }
 0x209   : > { %2100 = vmatmul.f32.gmra.mxu2 %v1657_v37  ;;  %v1549_v37 = vrot.slane %v1432_v24, 1  ;;  %v1662_v52 = vsel %vm804_vm1, %v6159_v20, %v1661_v28  ;;  %v5022_v20 = vld [vmem:[#allocation2 + $0x98] sm:$0xff] }
 0x20a   : > { %6162 = vst [vmem:[#allocation27_spill] sm:$0xff] %v5022_v20 }
 0x20b   : > { %2747 = vmatmul.f32.gmra.mxu0 %v2313_v30  ;;  %v4978_v48 = vpop.f32.mrf.mxu1  ;;  %v2315_v30 = vsel %vm691_vm0, %v2312_v36, %v2314_v38  ;;  %v2316_v38 = vrot.slane %v4992_v60, 1  ;;  %v6160_v60 = vld [vmem:[#allocation6_spill] sm:$0xff] }
 0x20d   : > { %1254 = vmatmul.f32.gmra.mxu3 %v6151_v50  ;;  %v4989_v50 = vpop.f32.mrf.mxu0 }
 0x20e   : > { %1990 = vmatmul.f32.gmra.mxu1 %v6152_v56  ;;  %6154 = vst [vmem:[#allocation18_spill] sm:$0xff] %v4989_v50  ;;  %v2317_v56 = vrot.slane %v4987_v43, 1  ;;  %v6168_v43 = vld [vmem:[#allocation7_spill] sm:$0xff] }
 0x210   : > { %v4980_v2 = vpop.f32.mrf.mxu3  ;;  %v2318_v50 = vsel %vm691_vm0, %v2316_v38, %v2317_v56  ;;  %v1435_v38 = vld [vmem:[#allocation2 + $0x130] sm:$0x3] }
 0x211   : > { %2103 = vmatmul.f32.gmra.mxu2 %v6156_v3  ;;  %v1554_v28 = vrot.slane %v1435_v38, 1 }
 0x213   : > { %2750 = vmatmul.f32.gmra.mxu0 %v2315_v30  ;;  %v1550_v30 = vsel %vm691_vm0, %v6157_v54, %v1549_v37  ;;  %v5001_v12 = vpop.f32.mrf.mxu1  ;;  %v2319_v54 = vrot.slane %v5007_v10, 1 }
 0x215   : > { %1257 = vmatmul.f32.gmra.mxu3 %v4089_v49  ;;  %v3493_v49 = vld [vmem:[%s6051_s3 + $0x458] sm:$0xff]  ;;  %v5013_v24 = vpop.f32.mrf.mxu0 }
 0x216   : > { %1993 = vmatmul.f32.gmra.mxu1 %v1550_v30  ;;  %6161 = vst [vmem:[#allocation29_spill] sm:$0xff] %v5013_v24  ;;  %v3460_v30 = vld [vmem:[%s6051_s3 + $0x350] sm:$0xff] }
 0x217   : > { %2836 = vmatpush.msra.mxu1 %v3493_v49  ;;  %2611 = vmatpush.msra.mxu3 %v3460_v30  ;;  %v6164_v49 = vld [vmem:[#allocation37_spill] sm:$0xff]  ;;  %v1555_v30 = vsel %vm691_vm0, %v4661_v46, %v1554_v28 }
 0x218   : > { %v4996_v36 = vpop.f32.mrf.mxu3 }
 0x219   : > { %2106 = vmatmul.f32.gmra.mxu2 %v1662_v52 }
 0x21b   : > { %2753 = vmatmul.f32.gmra.mxu0 %v2318_v50  ;;  %v2320_v50 = vsel %vm691_vm0, %v2317_v56, %v2319_v54  ;;  %v5024_v52 = vpop.f32.mrf.mxu1  ;;  %v5031_v56 = vpop.f32.mrf.mxu2 }
 0x21d   : > { %1260 = vmatmul.f32.gmra.mxu3 %v6160_v60  ;;  %v5027_v60 = vld [vmem:[#allocation2 + $0x90] sm:$0xff] }
 0x21e   : > { %1996 = vmatmul.f32.gmra.mxu1 %v4673_v32  ;;  %6163 = vst [vmem:[#allocation26_spill] sm:$0xff] %v5027_v60  ;;  %v2322_v32 = vrot.slane %v5022_v20, 1  ;;  %v2321_v24 = vrot.slane %v5027_v60, 1  ;;  %v3492_v20 = vld [vmem:[%s6051_s3 + $0x450] sm:$0xff] }
 0x21f   : > { %2837 = vmatpush.msra.mxu1 %v3492_v20  ;;  %v6167_v60 = vld [vmem:[#allocation36_spill] sm:$0xff] }
 0x220   : > { %v5015_v37 = vpop.f32.mrf.mxu3  ;;  %v2323_v1 = vsel %vm691_vm0, %v2321_v24, %v2322_v32 }
 0x221   : > { %2109 = vmatmul.f32.gmra.mxu2 %v6164_v49  ;;  %v5045_v49 = vld [vmem:[#allocation2 + $0xa0] sm:$0x3] }
 0x223   : > { %2756 = vmatmul.f32.gmra.mxu0 %v2320_v50  ;;  %v5034_v50 = vpop.f32.mrf.mxu0  ;;  %v5050_v46 = vpop.f32.mrf.mxu1 }
 0x224   : > { %6165 = vst [vmem:[#allocation25_spill] sm:$0xff] %v5034_v50  ;;  %v5056_v28 = vpop.f32.mrf.mxu2 }
 0x225   : > { %1263 = vmatmul.f32.gmra.mxu3 %v4130_v25  ;;  %v1666_v25 = vrot.slane %v1435_v38, 2 }
 0x226   : > { %1999 = vmatmul.f32.gmra.mxu1 %v1555_v30  ;;  %v6171_v30 = vld [vmem:[#allocation32_spill] sm:$0xff] }
 0x227   : > { %v1667_v50 = vsel %vm804_vm1, %v6167_v60, %v1666_v25 }
 0x228   : > { %v1199_v54 = vpop.f32.mrf.mxu3 }
 0x229   : > { %v5039_v10 = vadd.f32 %v1199_v54, %v4885_v22  ;;  %2112 = vmatmul.f32.gmra.mxu2 %v1667_v50  ;;  %v2324_v22 = vrot.slane %v5045_v49, 1  ;;  %v5065_v54 = vld [vmem:[#allocation2 + $0xb0] sm:$0xff] }
 0x22b   : > { %6166 = vst [vmem:[#allocation6_spill] sm:$0xff] %v5039_v10  ;;  %2759 = vmatmul.f32.gmra.mxu0 %v2323_v1  ;;  %v1438_v1 = vld [vmem:[#allocation2 + $0x148] sm:$0x3]  ;;  %v2325_v20 = vsel %vm691_vm0, %v2322_v32, %v2324_v22  ;;  %v5063_v60 = vpop.f32.mrf.mxu0  ;;  %v5072_v32 = vpop.f32.mrf.mxu1 }
 0x22c   : > { %6170 = vst [vmem:[#allocation7_spill] sm:$0xff] %v5063_v60  ;;  %v1559_v50 = vrot.slane %v1438_v1, 1  ;;  %v3491_v60 = vld [vmem:[%s6051_s3 + $0x448] sm:$0xff] }
 0x22d   : > { %1266 = vmatmul.f32.gmra.mxu3 %v6168_v43  ;;  %v3459_v43 = vld [vmem:[%s6051_s3 + $0x348] sm:$0xff]  ;;  %6172 = vst [vmem:[#allocation32_spill] sm:$0xff] %v5072_v32  ;;  %2838 = vmatpush.msra.mxu1 %v3491_v60  ;;  %v5086_v32 = vpop.f32.mrf.mxu2 }
 0x22e   : > { %2002 = vmatmul.f32.gmra.mxu1 %v4713_v53  ;;  %2612 = vmatpush.msra.mxu3 %v3459_v43  ;;  %v2327_v53 = vrot.slane %v5065_v54, 1  ;;  %v1671_v43 = vrot.slane %v1438_v1, 2 }
 0x230   : > { %v1202_v38 = vpop.f32.mrf.mxu3 }
 0x231   : > { %v5054_v24 = vadd.f32 %v1202_v38, %v4906_v29  ;;  %v5068_v29 = vld [vmem:[#allocation2 + $0xa8] sm:$0xff]  ;;  %2115 = vmatmul.f32.gmra.mxu2 %v6171_v30  ;;  %v1560_v38 = vsel %vm691_vm0, %v4700_v11, %v1559_v50  ;;  %v6175_v11 = vld [vmem:[#allocation30_spill] sm:$0xff]  ;;  %v6176_v50 = vld [vmem:[#allocation8_spill] sm:$0xff] }
 0x232   : > { %v2326_v22 = vrot.slane %v5068_v29, 1 }
 0x233   : > { %6169 = vst [vmem:[#allocation36_spill] sm:$0xff] %v5054_v24  ;;  %2762 = vmatmul.f32.gmra.mxu0 %v2325_v20  ;;  %v5084_v24 = vld [vmem:[#allocation2 + $0xb8] sm:$0x3]  ;;  %v5088_v10 = vpop.f32.mrf.mxu0  ;;  %v5100_v60 = vpop.f32.mrf.mxu1 }
 0x234   : > { %6174 = vst [vmem:[#allocation70_spill] sm:$0xff] %v5088_v10  ;;  %v2329_v1 = vrot.slane %v5084_v24, 1 }
 0x235   : > { %1269 = vmatmul.f32.gmra.mxu3 %v4163_v61  ;;  %v2328_v61 = vsel %vm691_vm0, %v2326_v22, %v2327_v53  ;;  %v3490_v22 = vld [vmem:[%s6051_s3 + $0x440] sm:$0xff]  ;;  %6178 = vst [vmem:[#allocation8_spill] sm:$0xff] %v5100_v60 }
 0x236   : > { %2005 = vmatmul.f32.gmra.mxu1 %v1560_v38 }
 0x237   : > { %2839 = vmatpush.msra.mxu1 %v3490_v22  ;;  %v3487_v22 = vld [vmem:[%s6051_s3 + $0x428] sm:$0xff] }
 0x238   : > { %v1205_v25 = vpop.f32.mrf.mxu3 }
 0x239   : > { %v5078_v20 = vadd.f32 %v1205_v25, %v4926_v15  ;;  %v1672_v15 = vsel %vm804_vm1, %v6175_v11, %v1671_v43  ;;  %v2330_v43 = vsel %vm691_vm0, %v2327_v53, %v2329_v1  ;;  %v3458_v11 = vld [vmem:[%s6051_s3 + $0x340] sm:$0xff]  ;;  %v5118_v1 = vpop.f32.mrf.mxu2 }
 0x23a   : > { %2118 = vmatmul.f32.gmra.mxu2 %v1672_v15  ;;  %v3489_v15 = vld [vmem:[%s6051_s3 + $0x438] sm:$0xff]  ;;  %2613 = vmatpush.msra.mxu3 %v3458_v11  ;;  %v5116_v53 = vld [vmem:[#allocation2 + $0xc0] sm:$0xff] }
 0x23b   : > { %6173 = vst [vmem:[#allocation69_spill] sm:$0xff] %v5078_v20  ;;  %2765 = vmatmul.f32.gmra.mxu0 %v2328_v61  ;;  %v1441_v61 = vld [vmem:[#allocation2 + $0x160] sm:$0x3]  ;;  %2840 = vmatpush.msra.mxu1 %v3489_v15  ;;  %v2331_v15 = vrot.slane %v5116_v53, 1  ;;  %v5142_v20 = vpop.f32.mrf.mxu1 }
 0x23c   : > { %6181 = vst [vmem:[#allocation73_spill] sm:$0xff] %v5142_v20  ;;  %v5172_v20 = vld [vmem:[#allocation2 + $0xd8] sm:$0xff] }
 0x23d   : > { %1272 = vmatmul.f32.gmra.mxu3 %v6176_v50  ;;  %v5110_v50 = vld [vmem:[#allocation2 + $0xc8] sm:$0xff] }
 0x23e   : > { %2008 = vmatmul.f32.gmra.mxu1 %v4773_v9  ;;  %v1564_v9 = vrot.slane %v1441_v61, 1 }
 0x240   : > { %v1208_v25 = vpop.f32.mrf.mxu3  ;;  %v1565_v10 = vsel %vm691_vm0, %v4756_v23, %v1564_v9  ;;  %v3484_v23 = vld [vmem:[%s6051_s3 + $0x410] sm:$0xff] }
 0x241   : > { %v5098_v38 = vadd.f32 %v1208_v25, %v4943_v14  ;;  %v3488_v14 = vld [vmem:[%s6051_s3 + $0x430] sm:$0xff]  ;;  %v2332_v25 = vrot.slane %v5110_v50, 1  ;;  %v5154_v9 = vpop.f32.mrf.mxu2 }
 0x242   : > { %2121 = vmatmul.f32.gmra.mxu2 %v4573_v42  ;;  %2841 = vmatpush.msra.mxu1 %v3488_v14  ;;  %v1676_v14 = vrot.slane %v1441_v61, 2 }
 0x243   : > { %6177 = vst [vmem:[#allocation30_spill] sm:$0xff] %v5098_v38  ;;  %2768 = vmatmul.f32.gmra.mxu0 %v2330_v43  ;;  %v5125_v43 = vpop.f32.mrf.mxu0  ;;  %v2333_v38 = vsel %vm691_vm0, %v2331_v15, %v2332_v25  ;;  %v3482_v15 = vld [vmem:[%s6051_s3 + $0x400] sm:$0xff] }
 0x244   : > { %6179 = vst [vmem:[#allocation71_spill] sm:$0xff] %v5125_v43  ;;  %2842 = vmatpush.msra.mxu1 %v3487_v22  ;;  %v3485_v43 = vld [vmem:[%s6051_s3 + $0x418] sm:$0xff]  ;;  %v5140_v22 = vld [vmem:[#allocation2 + $0xd0] sm:$0x3] }
 0x245   : > { %1275 = vmatmul.f32.gmra.mxu3 %v4196_v26  ;;  %v3486_v26 = vld [vmem:[%s6051_s3 + $0x420] sm:$0xff]  ;;  %v2334_v61 = vrot.slane %v5140_v22, 1 }
 0x246   : > { %2011 = vmatmul.f32.gmra.mxu1 %v1565_v10  ;;  %v6182_v10 = vld [vmem:[#allocation9_spill] sm:$0xff] }
 0x247   : > { %2843 = vmatpush.msra.mxu1 %v3486_v26 }
 0x248   : > { %v1211_v11 = vpop.f32.mrf.mxu3 }
 0x249   : > { %v5134_v60 = vadd.f32 %v1211_v11, %v4961_v41  ;;  %v1677_v41 = vsel %vm804_vm1, %v4563_v59, %v1676_v14  ;;  %2844 = vmatpush.msra.mxu1 %v3485_v43  ;;  %v3457_v59 = vld [vmem:[%s6051_s3 + $0x338] sm:$0xff] }
 0x24a   : > { %2124 = vmatmul.f32.gmra.mxu2 %v1677_v41  ;;  %2614 = vmatpush.msra.mxu3 %v3457_v59  ;;  %v1444_v14 = vld [vmem:[#allocation2 + $0x178] sm:$0x3]  ;;  %v5169_v41 = vld [vmem:[#allocation2 + $0xe0] sm:$0xff] }
 0x24b   : > { %6180 = vst [vmem:[#allocation72_spill] sm:$0xff] %v5134_v60  ;;  %2771 = vmatmul.f32.gmra.mxu0 %v2333_v38  ;;  %v3483_v38 = vld [vmem:[%s6051_s3 + $0x408] sm:$0xff]  ;;  %2845 = vmatpush.msra.mxu1 %v3484_v23  ;;  %v5162_v43 = vpop.f32.mrf.mxu0  ;;  %v2335_v23 = vsel %vm691_vm0, %v2332_v25, %v2334_v61 }
 0x24c   : > { %6183 = vst [vmem:[#allocation9_spill] sm:$0xff] %v5162_v43  ;;  %v5174_v43 = vpop.f32.mrf.mxu1 }
 0x24d   : > { %1278 = vmatmul.f32.gmra.mxu3 %v6182_v10  ;;  %2846 = vmatpush.msra.mxu1 %v3483_v38  ;;  %v1569_v10 = vrot.slane %v1444_v14, 1  ;;  %6185 = vst [vmem:[#allocation75_spill] sm:$0xff] %v5174_v43 }
 0x24e   : > { %2014 = vmatmul.f32.gmra.mxu1 %v4839_v55  ;;  %v2336_v55 = vrot.slane %v5172_v20, 1 }
 0x24f   : > { %2847 = vmatpush.msra.mxu1 %v3482_v15  ;;  %v1570_v25 = vsel %vm691_vm0, %v4813_v13, %v1569_v10  ;;  %v5184_v15 = vpop.f32.mrf.mxu2  ;;  %v3124_v10 = vld [vmem:[%s6053_s5 + $0x78] sm:$0xff] }
 0x250   : > { %v1214_v11 = vpop.f32.mrf.mxu3  ;;  %3129 = vmatpush.msra.mxu2 %v3124_v10 }
 0x251   : > { %v5165_v26 = vadd.f32 %v1214_v11, %v4980_v2  ;;  %v2337_v2 = vrot.slane %v5169_v41, 1  ;;  %v1681_v11 = vrot.slane %v1444_v14, 2 }
 0x252   : > { %2127 = vmatmul.f32.gmra.mxu2 %v4609_v5 }
 0x253   : > { %6184 = vst [vmem:[#allocation74_spill] sm:$0xff] %v5165_v26  ;;  %2774 = vmatmul.f32.gmra.mxu0 %v2335_v23  ;;  %v5187_v59 = vpop.f32.mrf.mxu0  ;;  %v5189_v23 = vld [vmem:[#allocation2 + $0xe8] sm:$0x3]  ;;  %v1682_v43 = vsel %vm804_vm1, %v4601_v33, %v1681_v11  ;;  %v6188_v26 = vld [vmem:[#allocation10_spill] sm:$0xff]  ;;  %v1447_v33 = vld [vmem:[#allocation2 + $0x190] sm:$0x3] }
 0x254   : > { %6187 = vst [vmem:[#allocation77_spill] sm:$0xff] %v5187_v59  ;;  %v2339_v13 = vrot.slane %v5189_v23, 1  ;;  %v5215_v59 = vld [vmem:[#allocation2 + $0xf0] sm:$0xff] }
 0x255   : > { %1281 = vmatmul.f32.gmra.mxu3 %v4232_v62  ;;  %v2338_v62 = vsel %vm691_vm0, %v2336_v55, %v2337_v2 }
 0x256   : > { %2017 = vmatmul.f32.gmra.mxu1 %v1570_v25 }
 0x257   : > { %v5210_v25 = vpop.f32.mrf.mxu2 }
 0x258   : > { %v1217_v38 = vpop.f32.mrf.mxu3 }
 0x259   : > { %v5182_v61 = vadd.f32 %v1217_v38, %v4996_v36  ;;  %v5195_v36 = vpop.f32.mrf.mxu1  ;;  %v3456_v38 = vld [vmem:[%s6051_s3 + $0x330] sm:$0xff] }
 0x25a   : > { %2130 = vmatmul.f32.gmra.mxu2 %v1682_v43  ;;  %6189 = vst [vmem:[#allocation10_spill] sm:$0xff] %v5195_v36  ;;  %2615 = vmatpush.msra.mxu3 %v3456_v38  ;;  %v2340_v43 = vsel %vm691_vm0, %v2337_v2, %v2339_v13  ;;  %v6194_v2 = vld [vmem:[#allocation33_spill] sm:$0xff]  ;;  %v6195_v36 = vrot.slane %v4817_v44, 1 }
 0x25b   : > { %6186 = vst [vmem:[#allocation76_spill] sm:$0xff] %v5182_v61  ;;  %2777 = vmatmul.f32.gmra.mxu0 %v2338_v62  ;;  %v5212_v11 = vpop.f32.mrf.mxu0  ;;  %v1574_v62 = vrot.slane %v1447_v33, 1  ;;  %v1932_v13 = vadd.f32 %v4904_v58, %v6194_v2  ;;  %v1686_v61 = vrot.slane %v1447_v33, 2  ;;  %v5233_v58 = vld [vmem:[#allocation2 + $0x100] sm:$0x3] }
 0x25c   : > { %6191 = vst [vmem:[#allocation79_spill] sm:$0xff] %v5212_v11  ;;  %v2344_v33 = vrot.slane %v5233_v58, 1 }
 0x25d   : > { %1284 = vmatmul.f32.gmra.mxu3 %v6188_v26  ;;  %v5208_v26 = vld [vmem:[#allocation2 + $0xf8] sm:$0xff]  ;;  %v2045_v11 = vadd.f32 %v5031_v56, %v1932_v13  ;;  %v6197_v56 = vrot.slane %v4817_v44, 2  ;;  %v6198_v13 = vld [vmem:[#allocation12_spill] sm:$0xff] }
 0x25e   : > { %2020 = vmatmul.f32.gmra.mxu1 %v4844_v35  ;;  %v6192_v35 = vld [vmem:[#allocation11_spill] sm:$0xff] }
 0x25f   : > { %v1687_v2 = vsel %vm804_vm1, %v6197_v56, %v1686_v61  ;;  %v3123_v61 = vld [vmem:[%s6053_s5 + $0x70] sm:$0xff] }
 0x260   : > { %v1220_v14 = vpop.f32.mrf.mxu3  ;;  %3130 = vmatpush.msra.mxu2 %v3123_v61 }
 0x261   : > { %v5204_v55 = vadd.f32 %v1220_v14, %v5015_v37  ;;  %v2342_v37 = vrot.slane %v5208_v26, 1  ;;  %v6193_v14 = vld [vmem:[#allocation14_spill] sm:$0xff] }
 0x262   : > { %2133 = vmatmul.f32.gmra.mxu2 %v4849_v45  ;;  %v1128_v10 = vadd.f32 %v6193_v14, %v6192_v35  ;;  %v5228_v45 = vpop.f32.mrf.mxu1  ;;  %v2414_v14 = vrot.slane %v4879_v40, 2  ;;  %v2413_v40 = vrot.slane %v4881_v7, 2 }
 0x263   : > { %6190 = vst [vmem:[#allocation78_spill] sm:$0xff] %v5204_v55  ;;  %2780 = vmatmul.f32.gmra.mxu0 %v2340_v43  ;;  %v2341_v43 = vrot.slane %v5215_v59, 1 }
 0x264   : > { %6196 = vst [vmem:[#allocation11_spill] sm:$0xff] %v5228_v45  ;;  %v2415_v56 = vsel %vm804_vm1, %v2413_v40, %v2414_v14  ;;  %v2441_v45 = vrot.slane %v5084_v24, 2  ;;  %v6244_v24 = vld [vmem:[#allocation42_spill] sm:$0xff] }
 0x265   : > { %1287 = vmatmul.f32.gmra.mxu3 %v4275_v27  ;;  %v1575_v27 = vsel %vm691_vm0, %v6195_v36, %v1574_v62  ;;  %v2343_v60 = vsel %vm691_vm0, %v2341_v43, %v2342_v37  ;;  %v5240_v36 = vpop.f32.mrf.mxu2  ;;  %v6199_v62 = vld [vmem:[#allocation13_spill] sm:$0xff]  ;;  %v3455_v43 = vld [vmem:[%s6051_s3 + $0x328] sm:$0xff] }
 0x266   : > { %2023 = vmatmul.f32.gmra.mxu1 %v1575_v27  ;;  %2616 = vmatpush.msra.mxu3 %v3455_v43  ;;  %v6206_v43 = vld [vmem:[#allocation17_spill] sm:$0xff] }
 0x268   : > { %v1240_v38 = vpop.f32.mrf.mxu3 }
 0x269   : > { %v1241_v55 = vadd.f32 %v1240_v38, %v1128_v10  ;;  %v6200_v10 = vld [vmem:[#allocation15_spill] sm:$0xff]  ;;  %v5247_v38 = vpop.f32.mrf.mxu0 }
 0x26a   : > { %2136 = vmatmul.f32.gmra.mxu2 %v1687_v2  ;;  %6202 = vst [vmem:[#allocation14_spill] sm:$0xff] %v5247_v38  ;;  %v5425_v38 = vld [vmem:[#allocation2 + $0x168] sm:$0xff] }
 0x26b   : > { %v5231_v35 = vadd.f32 %v2045_v11, %v1241_v55  ;;  %2783 = vmatmul.f32.gmra.mxu0 %v2343_v60  ;;  %v1131_v55 = vadd.f32 %v6200_v10, %v6199_v62  ;;  %v6201_v11 = vld [vmem:[#allocation38_spill] sm:$0xff]  ;;  %v5263_v62 = vpop.f32.mrf.mxu1  ;;  %v2416_v10 = vrot.slane %v4897_v16, 2 }
 0x26c   : > { %v1935_v60 = vadd.f32 %v4924_v21, %v6201_v11  ;;  %v2345_v21 = vsel %vm691_vm0, %v2342_v37, %v2344_v33  ;;  %6203 = vst [vmem:[#allocation33_spill] sm:$0xff] %v5263_v62  ;;  %v6204_v11 = vld [vmem:[#allocation41_spill] sm:$0xff] }
 0x26d   : > { %1290 = vmatmul.f32.gmra.mxu3 %v6198_v13  ;;  %v5261_v13 = vld [vmem:[#allocation2 + $0x110] sm:$0xff]  ;;  %v2417_v61 = vsel %vm804_vm1, %v2414_v14, %v2416_v10  ;;  %v1941_v14 = vadd.f32 %v4959_v4, %v4592_v19  ;;  %v2418_v10 = vrot.slane %v4918_v51, 2 }
 0x26e   : > { %v2048_v27 = vadd.f32 %v5056_v28, %v1935_v60  ;;  %2848 = vmatmul.f32.vlgmr.msra.gmra.mxu1 %v2415_v56  ;;  %v5267_v28 = vld [vmem:[#allocation2 + $0x108] sm:$0xff]  ;;  %v1938_v60 = vadd.f32 %v4941_v6, %v6204_v11  ;;  %v5281_v56 = vld [vmem:[#allocation2 + $0x118] sm:$0x3]  ;;  %v2419_v6 = vrot.slane %v4915_v31, 2  ;;  %v3454_v31 = vld [vmem:[%s6051_s3 + $0x320] sm:$0xff] }
 0x26f   : > { %v2346_v37 = vrot.slane %v5267_v28, 1  ;;  %2617 = vmatpush.msra.mxu3 %v3454_v31 }
 0x270   : > { %v1243_v44 = vpop.f32.mrf.mxu3  ;;  %v2051_v33 = vadd.f32 %v5086_v32, %v1938_v60  ;;  %v2349_v32 = vrot.slane %v5281_v56, 1  ;;  %v3122_v60 = vld [vmem:[%s6053_s5 + $0x68] sm:$0xff] }
 0x271   : > { %v1244_v2 = vadd.f32 %v1243_v44, %v1131_v55  ;;  %v2347_v55 = vrot.slane %v5261_v13, 1  ;;  %v5274_v44 = vpop.f32.mrf.mxu0  ;;  %3131 = vmatpush.msra.mxu2 %v3122_v60  ;;  %v6212_v60 = vld [vmem:[#allocation24_spill] sm:$0xff] }
 0x272   : > { %6205 = vst [vmem:[#allocation12_spill] sm:$0xff] %v5274_v44 }
 0x273   : > { %v5259_v7 = vadd.f32 %v2048_v27, %v1244_v2  ;;  %2786 = vmatmul.f32.gmra.mxu0 %v2345_v21  ;;  %v6207_v2 = vld [vmem:[#allocation16_spill] sm:$0xff]  ;;  %v5285_v21 = vpop.f32.mrf.mxu1  ;;  %v2350_v19 = vsel %vm691_vm0, %v2347_v55, %v2349_v32 }
 0x274   : > { %6208 = vst [vmem:[#allocation13_spill] sm:$0xff] %v5285_v21  ;;  %v5463_v21 = vld [vmem:[#allocation2 + $0x188] sm:$0xff] }
 0x275   : > { %1293 = vmatmul.f32.gmra.mxu3 %v4343_v18  ;;  %v2348_v18 = vsel %vm691_vm0, %v2346_v37, %v2347_v55  ;;  %v2420_v37 = vsel %vm804_vm1, %v2418_v10, %v2419_v6 }
 0x276   : > { %2851 = vmatmul.f32.gmra.mxu1 %v2417_v61 }
 0x278   : > { %v1246_v40 = vpop.f32.mrf.mxu3 }
 0x279   : > { %v1247_v16 = vadd.f32 %v1246_v40, %v6206_v43  ;;  %v2054_v40 = vadd.f32 %v5118_v1, %v1941_v14  ;;  %v5301_v51 = vpop.f32.mrf.mxu0  ;;  %v5305_v43 = vld [vmem:[#allocation2 + $0x128] sm:$0xff]  ;;  %v5309_v1 = vld [vmem:[#allocation2 + $0x120] sm:$0xff] }
 0x27a   : > { %6210 = vst [vmem:[#allocation15_spill] sm:$0xff] %v5301_v51  ;;  %v2351_v32 = vrot.slane %v5309_v1, 1  ;;  %v6231_v51 = vld [vmem:[#allocation26_spill] sm:$0xff] }
 0x27b   : > { %v5279_v27 = vadd.f32 %v2051_v33, %v1247_v16  ;;  %2789 = vmatmul.f32.gmra.mxu0 %v2348_v18  ;;  %v6209_v33 = vld [vmem:[#allocation22_spill] sm:$0xff]  ;;  %v2421_v16 = vrot.slane %v4935_v39, 2  ;;  %v2352_v18 = vrot.slane %v5305_v43, 1  ;;  %v5314_v14 = vpop.f32.mrf.mxu1  ;;  %v2433_v44 = vrot.slane %v6231_v51, 2 }
 0x27c   : > { %6211 = vst [vmem:[#allocation38_spill] sm:$0xff] %v5314_v14 }
 0x27d   : > { %1296 = vmatmul.f32.gmra.mxu3 %v6207_v2  ;;  %v1944_v2 = vadd.f32 %v4978_v48, %v4619_v63  ;;  %v2424_v48 = vrot.slane %v4952_v47, 2 }
 0x27e   : > { %2854 = vmatmul.f32.gmra.mxu1 %v2420_v37  ;;  %v6214_v37 = vld [vmem:[#allocation23_spill] sm:$0xff] }
 0x27f   : > { %v2057_v10 = vadd.f32 %v5154_v9, %v1944_v2 }
 0x280   : > { %v1249_v11 = vpop.f32.mrf.mxu3 }
 0x281   : > { %v1250_v61 = vadd.f32 %v1249_v11, %v6209_v33  ;;  %v2422_v11 = vsel %vm804_vm1, %v2419_v6, %v2421_v16  ;;  %v5325_v63 = vpop.f32.mrf.mxu0  ;;  %v1947_v6 = vadd.f32 %v5001_v12, %v4636_v8  ;;  %v2423_v33 = vrot.slane %v4955_v34, 2  ;;  %v3453_v16 = vld [vmem:[%s6051_s3 + $0x318] sm:$0xff] }
 0x282   : > { %6213 = vst [vmem:[#allocation41_spill] sm:$0xff] %v5325_v63  ;;  %2618 = vmatpush.msra.mxu3 %v3453_v16  ;;  %v5365_v16 = vld [vmem:[#allocation2 + $0x148] sm:$0x3] }
 0x283   : > { %v5303_v4 = vadd.f32 %v2054_v40, %v1250_v61  ;;  %2792 = vmatmul.f32.gmra.mxu0 %v2350_v19  ;;  %v5323_v40 = vld [vmem:[#allocation2 + $0x130] sm:$0x3]  ;;  %v3121_v19 = vld [vmem:[%s6053_s5 + $0x60] sm:$0xff]  ;;  %v2060_v47 = vadd.f32 %v5184_v15, %v1947_v6  ;;  %v2425_v2 = vsel %vm804_vm1, %v2423_v33, %v2424_v48  ;;  %v5342_v8 = vpop.f32.mrf.mxu1  ;;  %v2426_v15 = vrot.slane %v4972_v0, 2 }
 0x284   : > { %v2354_v9 = vrot.slane %v5323_v40, 1  ;;  %3132 = vmatpush.msra.mxu2 %v3121_v19  ;;  %6216 = vst [vmem:[#allocation17_spill] sm:$0xff] %v5342_v8 }
 0x285   : > { %1299 = vmatmul.f32.gmra.mxu3 %v6147_v17  ;;  %v2353_v17 = vsel %vm691_vm0, %v2351_v32, %v2352_v18  ;;  %v2427_v33 = vsel %vm804_vm1, %v2424_v48, %v2426_v15 }
 0x286   : > { %2857 = vmatmul.f32.gmra.mxu1 %v2422_v11  ;;  %v2355_v12 = vsel %vm691_vm0, %v2352_v18, %v2354_v9  ;;  %v5347_v11 = vld [vmem:[#allocation2 + $0x138] sm:$0xff] }
 0x288   : > { %v1252_v55 = vpop.f32.mrf.mxu3 }
 0x289   : > { %v1253_v39 = vadd.f32 %v1252_v55, %v6212_v60  ;;  %v6215_v55 = vld [vmem:[#allocation28_spill] sm:$0xff]  ;;  %v5349_v60 = vld [vmem:[#allocation2 + $0x140] sm:$0xff]  ;;  %v5357_v6 = vpop.f32.mrf.mxu0 }
 0x28a   : > { %6217 = vst [vmem:[#allocation16_spill] sm:$0xff] %v5357_v6  ;;  %v6225_v6 = vld [vmem:[#allocation5_spill] sm:$0xff] }
 0x28b   : > { %v5321_v31 = vadd.f32 %v2057_v10, %v1253_v39  ;;  %2795 = vmatmul.f32.gmra.mxu0 %v2353_v17  ;;  %v2356_v39 = vrot.slane %v5347_v11, 1  ;;  %v2357_v17 = vrot.slane %v5349_v60, 1 }
 0x28d   : > { %1302 = vmatmul.f32.gmra.mxu3 %v6214_v37  ;;  %v1950_v37 = vadd.f32 %v5024_v52, %v4652_v57  ;;  %v2358_v0 = vsel %vm691_vm0, %v2356_v39, %v2357_v17  ;;  %v6220_v57 = vld [vmem:[#allocation21_spill] sm:$0xff] }
 0x28e   : > { %2860 = vmatmul.f32.gmra.mxu1 %v2425_v2  ;;  %v2429_v52 = vrot.slane %v6220_v57, 2  ;;  %v6221_v2 = vld [vmem:[#allocation31_spill] sm:$0xff]  ;;  %v3120_v39 = vld [vmem:[%s6053_s5 + $0x58] sm:$0xff] }
 0x28f   : > { %v2063_v9 = vadd.f32 %v5210_v25, %v1950_v37  ;;  %v2359_v25 = vrot.slane %v5365_v16, 1  ;;  %v3452_v37 = vld [vmem:[%s6051_s3 + $0x310] sm:$0xff]  ;;  %3133 = vmatpush.msra.mxu2 %v3120_v39 }
 0x290   : > { %v1255_v61 = vpop.f32.mrf.mxu3  ;;  %2619 = vmatpush.msra.mxu3 %v3452_v37 }
 0x291   : > { %v1256_v32 = vadd.f32 %v1255_v61, %v6215_v55  ;;  %v6218_v61 = vld [vmem:[#allocation35_spill] sm:$0xff]  ;;  %v6222_v55 = vld [vmem:[#allocation50_spill] sm:$0xff] }
 0x292   : > { %v1953_v48 = vadd.f32 %v5050_v46, %v6222_v55  ;;  %v2360_v46 = vsel %vm691_vm0, %v2357_v17, %v2359_v25  ;;  %v5391_v55 = vld [vmem:[#allocation2 + $0x158] sm:$0xff]  ;;  %v6228_v25 = vld [vmem:[#allocation43_spill] sm:$0xff] }
 0x293   : > { %v5345_v10 = vadd.f32 %v2060_v47, %v1256_v32  ;;  %2798 = vmatmul.f32.gmra.mxu0 %v2355_v12  ;;  %v5367_v47 = vpop.f32.mrf.mxu1  ;;  %v6223_v32 = vld [vmem:[#allocation19_spill] sm:$0xff] }
 0x294   : > { %6219 = vst [vmem:[#allocation22_spill] sm:$0xff] %v5367_v47  ;;  %v2428_v12 = vrot.slane %v6223_v32, 2  ;;  %v2436_v47 = vrot.slane %v5045_v49, 2  ;;  %v2439_v49 = vrot.slane %v5065_v54, 2 }
 0x295   : > { %1305 = vmatmul.f32.gmra.mxu3 %v6156_v3 }
 0x296   : > { %2863 = vmatmul.f32.gmra.mxu1 %v2427_v33  ;;  %v2430_v33 = vsel %vm804_vm1, %v2428_v12, %v2429_v52 }
 0x298   : > { %v1258_v18 = vpop.f32.mrf.mxu3 }
 0x299   : > { %v1259_v19 = vadd.f32 %v1258_v18, %v6218_v61  ;;  %v2066_v18 = vadd.f32 %v5240_v36, %v1953_v48  ;;  %v6224_v61 = vld [vmem:[#allocation40_spill] sm:$0xff]  ;;  %v2431_v36 = vrot.slane %v6225_v6, 2  ;;  %v6226_v48 = vld [vmem:[#allocation37_spill] sm:$0xff]  ;;  %v5406_v6 = vld [vmem:[#allocation2 + $0x160] sm:$0x3] }
 0x29b   : > { %v5363_v3 = vadd.f32 %v2063_v9, %v1259_v19  ;;  %2801 = vmatmul.f32.gmra.mxu0 %v2358_v0  ;;  %v5382_v9 = vpop.f32.mrf.mxu0  ;;  %v5395_v63 = vpop.f32.mrf.mxu1  ;;  %v2432_v17 = vsel %vm804_vm1, %v2429_v52, %v2431_v36 }
 0x29c   : > { %6227 = vst [vmem:[#allocation24_spill] sm:$0xff] %v5395_v63 }
 0x29d   : > { %1308 = vmatmul.f32.gmra.mxu3 %v6221_v2  ;;  %v5389_v2 = vld [vmem:[#allocation2 + $0x150] sm:$0xff] }
 0x29e   : > { %2866 = vmatmul.f32.gmra.mxu1 %v2430_v33  ;;  %v2361_v12 = vrot.slane %v5389_v2, 1 }
 0x2a0   : > { %v1261_v15 = vpop.f32.mrf.mxu3 }
 0x2a1   : > { %v1262_v19 = vadd.f32 %v1261_v15, %v6224_v61  ;;  %v2362_v15 = vrot.slane %v5391_v55, 1  ;;  %v6229_v61 = vld [vmem:[#allocation27_spill] sm:$0xff] }
 0x2a3   : > { %v5387_v0 = vadd.f32 %v2066_v18, %v1262_v19  ;;  %2804 = vmatmul.f32.gmra.mxu0 %v2360_v46  ;;  %v2363_v18 = vsel %vm691_vm0, %v2361_v12, %v2362_v15  ;;  %v5404_v33 = vpop.f32.mrf.mxu0  ;;  %v2434_v19 = vrot.slane %v6229_v61, 2  ;;  %v6230_v46 = vld [vmem:[#allocation39_spill] sm:$0xff]  ;;  %v5412_v52 = vpop.f32.mrf.mxu1  ;;  %v3119_v12 = vld [vmem:[%s6053_s5 + $0x50] sm:$0xff] }
 0x2a4   : > { %6232 = vst [vmem:[#allocation23_spill] sm:$0xff] %v5412_v52  ;;  %3134 = vmatpush.msra.mxu2 %v3119_v12  ;;  %v5427_v52 = vld [vmem:[#allocation2 + $0x170] sm:$0xff] }
 0x2a5   : > { %1311 = vmatmul.f32.gmra.mxu3 %v6226_v48  ;;  %v2364_v48 = vrot.slane %v5406_v6, 1 }
 0x2a6   : > { %2869 = vmatmul.f32.gmra.mxu1 %v2432_v17  ;;  %v2435_v17 = vsel %vm804_vm1, %v2433_v44, %v2434_v19  ;;  %v2366_v44 = vrot.slane %v5425_v38, 1 }
 0x2a8   : > { %v1264_v39 = vpop.f32.mrf.mxu3 }
 0x2a9   : > { %v5401_v37 = vadd.f32 %v1264_v39, %v6228_v25  ;;  %v3451_v39 = vld [vmem:[%s6051_s3 + $0x308] sm:$0xff]  ;;  %v6233_v25 = vld [vmem:[#allocation44_spill] sm:$0xff] }
 0x2aa   : > { %2620 = vmatpush.msra.mxu3 %v3451_v39  ;;  %v2437_v39 = vsel %vm804_vm1, %v2434_v19, %v2436_v47  ;;  %v2438_v47 = vrot.slane %v5068_v29, 2 }
 0x2ab   : > { %2807 = vmatmul.f32.gmra.mxu0 %v2363_v18  ;;  %v5429_v63 = vpop.f32.mrf.mxu0 }
 0x2ad   : > { %1314 = vmatmul.f32.gmra.mxu3 %v6230_v46  ;;  %v2365_v46 = vsel %vm691_vm0, %v2362_v15, %v2364_v48  ;;  %v5439_v48 = vpop.f32.mrf.mxu1 }
 0x2ae   : > { %2872 = vmatmul.f32.gmra.mxu1 %v2435_v17  ;;  %v6235_v17 = vld [vmem:[#allocation46_spill] sm:$0xff]  ;;  %6237 = vst [vmem:[#allocation21_spill] sm:$0xff] %v5439_v48 }
 0x2af   : > { %v5461_v48 = vld [vmem:[#allocation2 + $0x180] sm:$0xff] }
 0x2b0   : > { %v1267_v36 = vpop.f32.mrf.mxu3 }
 0x2b1   : > { %v5422_v18 = vadd.f32 %v1267_v36, %v6233_v25  ;;  %v2367_v36 = vrot.slane %v5427_v52, 1 }
 0x2b3   : > { %6234 = vst [vmem:[#allocation28_spill] sm:$0xff] %v5422_v18  ;;  %2810 = vmatmul.f32.gmra.mxu0 %v2365_v46  ;;  %v2368_v25 = vsel %vm691_vm0, %v2366_v44, %v2367_v36  ;;  %v5442_v46 = vld [vmem:[#allocation2 + $0x178] sm:$0x3]  ;;  %v5447_v14 = vpop.f32.mrf.mxu0  ;;  %v3450_v44 = vld [vmem:[%s6051_s3 + $0x300] sm:$0xff]  ;;  %v6248_v18 = vld [vmem:[#allocation51_spill] sm:$0xff] }
 0x2b4   : > { %v2369_v8 = vrot.slane %v5442_v46, 1  ;;  %2621 = vmatpush.msra.mxu3 %v3450_v44 }
 0x2b5   : > { %1317 = vmatmul.f32.gmra.mxu3 %v6171_v30  ;;  %v6238_v30 = vld [vmem:[#allocation34_spill] sm:$0xff]  ;;  %v5465_v62 = vpop.f32.mrf.mxu1 }
 0x2b6   : > { %2875 = vmatmul.f32.gmra.mxu1 %v2437_v39  ;;  %v2440_v39 = vsel %vm804_vm1, %v2438_v47, %v2439_v49  ;;  %6241 = vst [vmem:[#allocation50_spill] sm:$0xff] %v5465_v62  ;;  %v2371_v47 = vrot.slane %v5461_v48, 1 }
 0x2b8   : > { %v1270_v12 = vpop.f32.mrf.mxu3 }
 0x2b9   : > { %v5437_v15 = vadd.f32 %v1270_v12, %v6235_v17  ;;  %v3118_v12 = vld [vmem:[%s6053_s5 + $0x48] sm:$0xff] }
 0x2ba   : > { %v6239_v17 = vld [vmem:[#allocation47_spill] sm:$0xff]  ;;  %3135 = vmatpush.msra.mxu2 %v3118_v12 }
 0x2bb   : > { %6236 = vst [vmem:[#allocation35_spill] sm:$0xff] %v5437_v15  ;;  %2813 = vmatmul.f32.gmra.mxu0 %v2368_v25  ;;  %v5471_v44 = vpop.f32.mrf.mxu0  ;;  %v2443_v15 = vrot.slane %v5116_v53, 2 }
 0x2bd   : > { %1320 = vmatmul.f32.gmra.mxu3 %v6238_v30  ;;  %v2370_v30 = vsel %vm691_vm0, %v2367_v36, %v2369_v8  ;;  %v2442_v8 = vsel %vm804_vm1, %v2439_v49, %v2441_v45  ;;  %v6242_v36 = vld [vmem:[#allocation48_spill] sm:$0xff]  ;;  %v5482_v62 = vpop.f32.mrf.mxu1  ;;  %v3117_v45 = vld [vmem:[%s6053_s5 + $0x40] sm:$0xff] }
 0x2be   : > { %2878 = vmatmul.f32.gmra.mxu1 %v2440_v39  ;;  %6245 = vst [vmem:[#allocation40_spill] sm:$0xff] %v5482_v62  ;;  %3136 = vmatpush.msra.mxu2 %v3117_v45 }
 0x2c0   : > { %v1273_v19 = vpop.f32.mrf.mxu3 }
 0x2c1   : > { %v5458_v25 = vadd.f32 %v1273_v19, %v6239_v17  ;;  %v2372_v19 = vrot.slane %v5463_v21, 1 }
 0x2c3   : > { %6240 = vst [vmem:[#allocation31_spill] sm:$0xff] %v5458_v25  ;;  %2816 = vmatmul.f32.gmra.mxu0 %v2370_v30  ;;  %v2373_v17 = vsel %vm691_vm0, %v2371_v47, %v2372_v19  ;;  %v5478_v30 = vld [vmem:[#allocation2 + $0x190] sm:$0x3] }
 0x2c4   : > { %v2374_v25 = vrot.slane %v5478_v30, 1 }
 0x2c5   : > { %1323 = vmatmul.f32.gmra.mxu3 %v4573_v42  ;;  %v2444_v42 = vrot.slane %v5110_v50, 2  ;;  %v5498_v62 = vpop.f32.mrf.mxu1 }
 0x2c6   : > { %2881 = vmatmul.f32.gmra.mxu1 %v2442_v8  ;;  %6247 = vst [vmem:[#allocation5_spill] sm:$0xff] %v5498_v62 }
 0x2c7   : > { %v2445_v47 = vsel %vm804_vm1, %v2443_v15, %v2444_v42 }
 0x2c8   : > { %v1276_v12 = vpop.f32.mrf.mxu3 }
 0x2c9   : > { %v5475_v39 = vadd.f32 %v1276_v12, %v6242_v36  ;;  %v6246_v12 = vld [vmem:[#allocation49_spill] sm:$0xff]  ;;  %v2375_v36 = vsel %vm691_vm0, %v2372_v19, %v2374_v25  ;;  %v2448_v25 = vrot.slane %v5172_v20, 2 }
 0x2cb   : > { %6243 = vst [vmem:[#allocation19_spill] sm:$0xff] %v5475_v39  ;;  %2819 = vmatmul.f32.gmra.mxu0 %v2373_v17  ;;  %v5494_v17 = vpop.f32.mrf.mxu0 }
 0x2cd   : > { %1326 = vmatmul.f32.gmra.mxu3 %v6244_v24  ;;  %v2446_v24 = vrot.slane %v5140_v22, 2  ;;  %v3116_v22 = vld [vmem:[%s6053_s5 + $0x38] sm:$0xff] }
 0x2ce   : > { %2884 = vmatmul.f32.gmra.mxu1 %v2445_v47  ;;  %v6249_v47 = vld [vmem:[#allocation45_spill] sm:$0xff]  ;;  %3137 = vmatpush.msra.mxu2 %v3116_v22 }
 0x2cf   : > { %v2447_v45 = vsel %vm804_vm1, %v2444_v42, %v2446_v24 }
 0x2d0   : > { %v1279_v49 = vpop.f32.mrf.mxu3 }
 0x2d1   : > { %v5491_v8 = vadd.f32 %v1279_v49, %v6246_v12  ;;  %v2449_v49 = vrot.slane %v5169_v41, 2  ;;  %v6250_v12 = vld [vmem:[#allocation53_spill] sm:$0xff] }
 0x2d3   : > { %2822 = vmatmul.f32.gmra.mxu0 %v2375_v36  ;;  %v2450_v19 = vsel %vm804_vm1, %v2448_v25, %v2449_v49  ;;  %v3565_v36 = vld [vmem:[#allocation2 + $0x30] sm:$0xff]  ;;  %v2454_v25 = vrot.slane %v5208_v26, 2 }
 0x2d5   : > { %1329 = vmatmul.f32.gmra.mxu3 %v4609_v5 }
 0x2d6   : > { %2887 = vmatmul.f32.gmra.mxu1 %v2447_v45 }
 0x2d8   : > { %v1282_v39 = vpop.f32.mrf.mxu3 }
 0x2d9   : > { %v5502_v15 = vadd.f32 %v1282_v39, %v6248_v18  ;;  %v5514_v18 = vpop.f32.mrf.mxu1  ;;  %v2451_v39 = vrot.slane %v5189_v23, 2  ;;  %v3115_v23 = vld [vmem:[%s6053_s5 + $0x30] sm:$0xff] }
 0x2da   : > { %6251 = vst [vmem:[#allocation37_spill] sm:$0xff] %v5514_v18  ;;  %3138 = vmatpush.msra.mxu2 %v3115_v23  ;;  %v6257_v18 = vld [vmem:[#allocation58_spill] sm:$0xff]  ;;  %v2459_v23 = vrot.slane %v5261_v13, 2 }
 0x2db   : > { %v2452_v45 = vsel %vm804_vm1, %v2449_v49, %v2451_v39  ;;  %v6255_v39 = vld [vmem:[#allocation56_spill] sm:$0xff] }
 0x2dd   : > { %1332 = vmatmul.f32.gmra.mxu3 %v6249_v47  ;;  %v6252_v47 = vld [vmem:[#allocation54_spill] sm:$0xff] }
 0x2de   : > { %2890 = vmatmul.f32.gmra.mxu1 %v2450_v19 }
 0x2e0   : > { %v1285_v5 = vpop.f32.mrf.mxu3 }
 0x2e1   : > { %v5512_v42 = vadd.f32 %v1285_v5, %v6250_v12  ;;  %v5521_v22 = vpop.f32.mrf.mxu1  ;;  %v3566_v5 = vld [vmem:[#allocation2 + $0x38] sm:$0xff]  ;;  %v2453_v12 = vrot.slane %v5215_v59, 2 }
 0x2e2   : > { %6254 = vst [vmem:[#allocation27_spill] sm:$0xff] %v5521_v22 }
 0x2e3   : > { %v2455_v49 = vsel %vm804_vm1, %v2453_v12, %v2454_v25  ;;  %v3568_v12 = vld [vmem:[#allocation2 + $0x50] sm:$0xff] }
 0x2e5   : > { %2622 = vmatmul.f32.vlgmr.msra.gmra.mxu3 %v3565_v36 }
 0x2e6   : > { %2893 = vmatmul.f32.gmra.mxu1 %v2452_v45  ;;  %v3567_v45 = vld [vmem:[#allocation2 + $0x48] sm:$0xff] }
 0x2e8   : > { %v1288_v24 = vpop.f32.mrf.mxu3 }
 0x2e9   : > { %v5519_v62 = vadd.f32 %v1288_v24, %v6252_v47  ;;  %v2456_v24 = vrot.slane %v5233_v58, 2  ;;  %v5533_v47 = vpop.f32.mrf.mxu1  ;;  %v3114_v58 = vld [vmem:[%s6053_s5 + $0x28] sm:$0xff] }
 0x2ea   : > { %6256 = vst [vmem:[#allocation39_spill] sm:$0xff] %v5533_v47  ;;  %3139 = vmatpush.msra.mxu2 %v3114_v58  ;;  %v6261_v47 = vld [vmem:[#allocation62_spill] sm:$0xff]  ;;  %v3569_v58 = vld [vmem:[#allocation2 + $0x68] sm:$0xff] }
 0x2eb   : > { %6253 = vst [vmem:[#allocation43_spill] sm:$0xff] %v5519_v62  ;;  %v2457_v22 = vsel %vm804_vm1, %v2454_v25, %v2456_v24  ;;  %v6260_v24 = vld [vmem:[#allocation60_spill] sm:$0xff] }
 0x2ed   : > { %2625 = vmatmul.f32.gmra.mxu3 %v3566_v5 }
 0x2ee   : > { %2896 = vmatmul.f32.gmra.mxu1 %v2455_v49 }
 0x2f0   : > { %v1291_v19 = vpop.f32.mrf.mxu3 }
 0x2f1   : > { %v5530_v36 = vadd.f32 %v1291_v19, %v6255_v39  ;;  %v2458_v19 = vrot.slane %v5267_v28, 2  ;;  %v5544_v49 = vpop.f32.mrf.mxu1 }
 0x2f2   : > { %6259 = vst [vmem:[#allocation44_spill] sm:$0xff] %v5544_v49 }
 0x2f3   : > { %v2460_v25 = vsel %vm804_vm1, %v2458_v19, %v2459_v23  ;;  %v2464_v19 = vrot.slane %v5305_v43, 2 }
 0x2f5   : > { %2628 = vmatmul.f32.gmra.mxu3 %v3567_v45  ;;  %v5552_v45 = vpop.f32.mrf.mxu2 }
 0x2f6   : > { %2899 = vmatmul.f32.gmra.mxu1 %v2457_v22  ;;  %v2461_v22 = vrot.slane %v5281_v56, 2 }
 0x2f8   : > { %v1294_v5 = vpop.f32.mrf.mxu3 }
 0x2f9   : > { %v5537_v62 = vadd.f32 %v1294_v5, %v6257_v18  ;;  %v5558_v49 = vpop.f32.mrf.mxu1 }
 0x2fa   : > { %6263 = vst [vmem:[#allocation34_spill] sm:$0xff] %v5558_v49  ;;  %v6267_v49 = vld [vmem:[#allocation65_spill] sm:$0xff] }
 0x2fb   : > { %6258 = vst [vmem:[#allocation26_spill] sm:$0xff] %v5537_v62 }
 0x2fd   : > { %2631 = vmatmul.f32.gmra.mxu3 %v3568_v12  ;;  %v2462_v12 = vsel %vm804_vm1, %v2459_v23, %v2461_v22 }
 0x2fe   : > { %2902 = vmatmul.f32.gmra.mxu1 %v2460_v25  ;;  %v6264_v25 = vld [vmem:[#allocation63_spill] sm:$0xff] }
 0x300   : > { %v1297_v39 = vpop.f32.mrf.mxu3 }
 0x301   : > { %v5548_v18 = vadd.f32 %v1297_v39, %v6260_v24  ;;  %v2463_v39 = vrot.slane %v5309_v1, 2  ;;  %v5569_v24 = vpop.f32.mrf.mxu2  ;;  %v5571_v22 = vpop.f32.mrf.mxu1 }
 0x302   : > { %6266 = vst [vmem:[#allocation48_spill] sm:$0xff] %v5571_v22  ;;  %v6272_v22 = vld [vmem:[#allocation6_spill] sm:$0xff] }
 0x303   : > { %v2465_v23 = vsel %vm804_vm1, %v2463_v39, %v2464_v19 }
 0x305   : > { %2634 = vmatmul.f32.gmra.mxu3 %v4955_v34  ;;  %v3113_v34 = vld [vmem:[%s6053_s5 + $0x20] sm:$0xff] }
 0x306   : > { %2905 = vmatmul.f32.gmra.mxu1 %v2462_v12  ;;  %3140 = vmatpush.msra.mxu2 %v3113_v34  ;;  %v2468_v34 = vrot.slane %v5347_v11, 2 }
 0x308   : > { %v1300_v5 = vpop.f32.mrf.mxu3 }
 0x309   : > { %v5556_v62 = vadd.f32 %v1300_v5, %v6261_v47  ;;  %v2466_v5 = vrot.slane %v5323_v40, 2  ;;  %v5579_v39 = vpop.f32.mrf.mxu2  ;;  %v3112_v40 = vld [vmem:[%s6053_s5 + $0x18] sm:$0xff] }
 0x30a   : > { %3141 = vmatpush.msra.mxu2 %v3112_v40  ;;  %v2474_v40 = vrot.slane %v5391_v55, 2 }
 0x30b   : > { %6262 = vst [vmem:[#allocation46_spill] sm:$0xff] %v5556_v62 }
 0x30d   : > { %2637 = vmatmul.f32.gmra.mxu3 %v3569_v58  ;;  %v2467_v58 = vsel %vm804_vm1, %v2464_v19, %v2466_v5  ;;  %v6270_v19 = vld [vmem:[#allocation67_spill] sm:$0xff]  ;;  %v2471_v5 = vrot.slane %v5365_v16, 2 }
 0x30e   : > { %2908 = vmatmul.f32.gmra.mxu1 %v2465_v23  ;;  %v5584_v23 = vpop.f32.mrf.mxu1 }
 0x30f   : > { %6269 = vst [vmem:[#allocation49_spill] sm:$0xff] %v5584_v23 }
 0x310   : > { %v1303_v56 = vpop.f32.mrf.mxu3 }
 0x311   : > { %v5567_v47 = vadd.f32 %v1303_v56, %v6264_v25  ;;  %v2469_v56 = vrot.slane %v5349_v60, 2 }
 0x313   : > { %6265 = vst [vmem:[#allocation47_spill] sm:$0xff] %v5567_v47  ;;  %v2472_v23 = vsel %vm804_vm1, %v2469_v56, %v2471_v5 }
 0x315   : > { %2640 = vmatmul.f32.gmra.mxu3 %v6223_v32 }
 0x316   : > { %2911 = vmatmul.f32.gmra.mxu1 %v2467_v58 }
 0x318   : > { %v1306_v12 = vpop.f32.mrf.mxu3 }
 0x319   : > { %v5577_v62 = vadd.f32 %v1306_v12, %v6267_v49  ;;  %v2470_v49 = vsel %vm804_vm1, %v2468_v34, %v2469_v56  ;;  %v5595_v12 = vpop.f32.mrf.mxu2  ;;  %v2473_v34 = vrot.slane %v5389_v2, 2 }
 0x31b   : > { %6268 = vst [vmem:[#allocation42_spill] sm:$0xff] %v5577_v62  ;;  %v2475_v56 = vsel %vm804_vm1, %v2473_v34, %v2474_v40 }
 0x31d   : > { %2643 = vmatmul.f32.gmra.mxu3 %v6220_v57  ;;  %v5597_v57 = vpop.f32.mrf.mxu1 }
 0x31e   : > { %2914 = vmatmul.f32.gmra.mxu1 %v2470_v49  ;;  %v6274_v49 = vld [vmem:[#allocation36_spill] sm:$0xff] }
 0x320   : > { %v1309_v32 = vpop.f32.mrf.mxu3 }
 0x321   : > { %v5591_v25 = vadd.f32 %v1309_v32, %v6270_v19  ;;  %v5609_v16 = vpop.f32.mrf.mxu2  ;;  %v2476_v19 = vrot.slane %v5406_v6, 2 }
 0x323   : > { %6271 = vst [vmem:[#allocation51_spill] sm:$0xff] %v5591_v25  ;;  %v2477_v5 = vsel %vm804_vm1, %v2474_v40, %v2476_v19 }
 0x325   : > { %2646 = vmatmul.f32.gmra.mxu3 %v6231_v51  ;;  %v3111_v51 = vld [vmem:[%s6053_s5 + $0x10] sm:$0xff] }
 0x326   : > { %2917 = vmatmul.f32.gmra.mxu1 %v2472_v23  ;;  %3142 = vmatpush.msra.mxu2 %v3111_v51  ;;  %v5615_v23 = vpop.f32.mrf.mxu1  ;;  %v2478_v51 = vrot.slane %v5425_v38, 2 }
 0x328   : > { %v1312_v58 = vpop.f32.mrf.mxu3 }
 0x329   : > { %v5601_v62 = vadd.f32 %v1312_v58, %v6272_v22  ;;  %v6276_v58 = vld [vmem:[#allocation69_spill] sm:$0xff]  ;;  %v5623_v25 = vpop.f32.mrf.mxu2 }
 0x32b   : > { %6273 = vst [vmem:[#allocation45_spill] sm:$0xff] %v5601_v62 }
 0x32d   : > { %2649 = vmatmul.f32.gmra.mxu3 %v6229_v61 }
 0x32e   : > { %2920 = vmatmul.f32.gmra.mxu1 %v2475_v56  ;;  %v5625_v34 = vpop.f32.mrf.mxu1  ;;  %v6278_v56 = vld [vmem:[#allocation30_spill] sm:$0xff] }
 0x330   : > { %v1315_v32 = vpop.f32.mrf.mxu3 }
 0x331   : > { %v5613_v22 = vadd.f32 %v1315_v32, %v6274_v49  ;;  %v2479_v32 = vrot.slane %v5427_v52, 2  ;;  %v5637_v19 = vpop.f32.mrf.mxu2 }
 0x333   : > { %6275 = vst [vmem:[#allocation53_spill] sm:$0xff] %v5613_v22  ;;  %v2480_v40 = vsel %vm804_vm1, %v2478_v51, %v2479_v32  ;;  %v2483_v51 = vrot.slane %v5461_v48, 2 }
 0x335   : > { %2652 = vmatmul.f32.gmra.mxu3 %v5068_v29  ;;  %v3110_v29 = vld [vmem:[%s6053_s5 + $0x8] sm:$0xff] }
 0x336   : > { %2923 = vmatmul.f32.gmra.mxu1 %v2477_v5  ;;  %3143 = vmatpush.msra.mxu2 %v3110_v29  ;;  %v5641_v5 = vpop.f32.mrf.mxu1  ;;  %v2484_v29 = vrot.slane %v5463_v21, 2 }
 0x338   : > { %v1318_v61 = vpop.f32.mrf.mxu3 }
 0x339   : > { %v5621_v62 = vadd.f32 %v1318_v61, %v6276_v58  ;;  %v2481_v61 = vrot.slane %v5442_v46, 2 }
 0x33b   : > { %6277 = vst [vmem:[#allocation54_spill] sm:$0xff] %v5621_v62  ;;  %v2482_v58 = vsel %vm804_vm1, %v2479_v32, %v2481_v61  ;;  %v6280_v62 = vld [vmem:[#allocation72_spill] sm:$0xff]  ;;  %v6282_v32 = vld [vmem:[#allocation74_spill] sm:$0xff]  ;;  %v2486_v61 = vrot.slane %v5478_v30, 2 }
 0x33d   : > { %2655 = vmatmul.f32.gmra.mxu3 %v5065_v54 }
 0x33e   : > { %2926 = vmatmul.f32.gmra.mxu1 %v2480_v40  ;;  %v5655_v46 = vpop.f32.mrf.mxu1 }
 0x340   : > { %v1321_v6 = vpop.f32.mrf.mxu3 }
 0x341   : > { %v5635_v49 = vadd.f32 %v1321_v6, %v6278_v56  ;;  %v5650_v6 = vpop.f32.mrf.mxu2 }
 0x343   : > { %6279 = vst [vmem:[#allocation56_spill] sm:$0xff] %v5635_v49 }
 0x345   : > { %2658 = vmatmul.f32.gmra.mxu3 %v5116_v53  ;;  %v3109_v53 = vld [vmem:[%s6053_s5] sm:$0xff] }
 0x346   : > { %2929 = vmatmul.f32.gmra.mxu1 %v2482_v58  ;;  %3144 = vmatpush.msra.mxu2 %v3109_v53  ;;  %v2487_v58 = vsel %vm804_vm1, %v2484_v29, %v2486_v61  ;;  %v5669_v47 = vpop.f32.mrf.mxu1  ;;  %v6284_v53 = vld [vmem:[#allocation78_spill] sm:$0xff] }
 0x348   : > { %v1324_v54 = vpop.f32.mrf.mxu3 }
 0x349   : > { %v5645_v22 = vadd.f32 %v1324_v54, %v6280_v62  ;;  %v2485_v62 = vsel %vm804_vm1, %v2483_v51, %v2484_v29 }
 0x34b   : > { %6281 = vst [vmem:[#allocation58_spill] sm:$0xff] %v5645_v22  ;;  %v6283_v22 = vld [vmem:[#allocation76_spill] sm:$0xff] }
 0x34d   : > { %2661 = vmatmul.f32.gmra.mxu3 %v5110_v50  ;;  %v5663_v50 = vpop.f32.mrf.mxu2 }
 0x34e   : > { %2932 = vmatmul.f32.gmra.mxu1 %v2485_v62  ;;  %v5680_v62 = vpop.f32.mrf.mxu1 }
 0x350   : > { %v1327_v40 = vpop.f32.mrf.mxu3 }
 0x351   : > { %v5659_v56 = vadd.f32 %v1327_v40, %v6282_v32 }
 0x355   : > { %2664 = vmatmul.f32.gmra.mxu3 %v5172_v20  ;;  %v5675_v30 = vpop.f32.mrf.mxu2  ;;  %v5678_v20 = vpop.f32.mrf.mxu0 }
 0x356   : > { %2935 = vmatmul.f32.gmra.mxu1 %v2487_v58 }
 0x358   : > { %v1330_v54 = vpop.f32.mrf.mxu3 }
 0x359   : > { %v5667_v49 = vadd.f32 %v1330_v54, %v6283_v22 }
 0x35d   : > { %2667 = vmatmul.f32.gmra.mxu3 %v5169_v41  ;;  %v5687_v41 = vld [vmem:[%s6052_s4] ss:$0 sm:$0xff]  ;;  %v5689_v61 = vpop.f32.mrf.mxu2  ;;  %v5694_v58 = vpop.f32.mrf.mxu0 }
 0x360   : > { %v1333_v51 = vpop.f32.mrf.mxu3 }
 0x361   : > { %v5673_v40 = vadd.f32 %v1333_v51, %v6284_v53 }
 0x363   : > { %6285 = vst [vmem:[#allocation60_spill] sm:$0xff] %v5673_v40 }
 0x365   : > { %2670 = vmatmul.f32.gmra.mxu3 %v5215_v59 }
 0x368   : > { %v2623_v29 = vpop.f32.mrf.mxu3 }
 0x369   : > { %v2737_v22 = vadd.f32 %v5382_v9, %v2623_v29 }
 0x36b   : > { %v2850_v32 = vadd.f32 %v5597_v57, %v2737_v22  ;;  %v5697_v57 = vpop.f32.mrf.mxu1 }
 0x36d   : > { %v2945_v54 = vadd.f32 %v2850_v32, %v5231_v35  ;;  %2673 = vmatmul.f32.gmra.mxu3 %v5208_v26  ;;  %v5702_v35 = vpop.f32.mrf.mxu2 }
 0x36f   : > { %v3045_v59 = vadd.f32 %v5687_v41, %v2945_v54 }
 0x370   : > { %v2626_v51 = vpop.f32.mrf.mxu3 }
 0x371   : > { %v3077_v53 = vmax.f32 %v3045_v59, 0.0  ;;  %v2740_v9 = vadd.f32 %v5404_v33, %v2626_v51  ;;  %v5706_v59 = vpop.f32.mrf.mxu0 }
 0x373   : > { %v2853_v29 = vadd.f32 %v5615_v23, %v2740_v9  ;;  %3145 = vmatmul.f32.vlgmr.msra.gmra.mxu2 %v3077_v53  ;;  %v5709_v51 = vpop.f32.mrf.mxu1 }
 0x375   : > { %v2946_v22 = vadd.f32 %v2853_v29, %v5259_v7  ;;  %2676 = vmatmul.f32.gmra.mxu3 %v5267_v28  ;;  %v5714_v28 = vpop.f32.mrf.mxu2 }
 0x377   : > { %v3046_v26 = vadd.f32 %v5687_v41, %v2946_v22 }
 0x378   : > { %v2629_v32 = vpop.f32.mrf.mxu3 }
 0x379   : > { %v2743_v54 = vadd.f32 %v5429_v63, %v2629_v32  ;;  %v3078_v40 = vmax.f32 %v3046_v26, 0.0  ;;  %v5718_v22 = vpop.f32.mrf.mxu0 }
 0x37b   : > { %v2856_v33 = vadd.f32 %v5625_v34, %v2743_v54  ;;  %3148 = vmatmul.f32.gmra.mxu2 %v3078_v40 }
 0x37d   : > { %v2947_v23 = vadd.f32 %v2856_v33, %v5279_v27  ;;  %2679 = vmatmul.f32.gmra.mxu3 %v5261_v13  ;;  %v5722_v27 = vpop.f32.mrf.mxu1  ;;  %v5726_v54 = vpop.f32.mrf.mxu2 }
 0x37f   : > { %v3047_v7 = vadd.f32 %v5687_v41, %v2947_v23 }
 0x380   : > { %v2632_v53 = vpop.f32.mrf.mxu3 }
 0x381   : > { %v2746_v9 = vadd.f32 %v5447_v14, %v2632_v53  ;;  %v3079_v63 = vmax.f32 %v3047_v7, 0.0 }
 0x383   : > { %v2859_v29 = vadd.f32 %v5641_v5, %v2746_v9  ;;  %3151 = vmatmul.f32.gmra.mxu2 %v3079_v63 }
 0x385   : > { %v2948_v34 = vadd.f32 %v2859_v29, %v5303_v4  ;;  %2682 = vmatmul.f32.gmra.mxu3 %v5309_v1  ;;  %v5731_v4 = vpop.f32.mrf.mxu0  ;;  %v5734_v33 = vpop.f32.mrf.mxu1 }
 0x386   : > { %v5738_v9 = vpop.f32.mrf.mxu2 }
 0x387   : > { %v3048_v13 = vadd.f32 %v5687_v41, %v2948_v34 }
 0x388   : > { %v2635_v40 = vpop.f32.mrf.mxu3 }
 0x389   : > { %v2749_v26 = vadd.f32 %v5471_v44, %v2635_v40  ;;  %v3080_v32 = vmax.f32 %v3048_v13, 0.0 }
 0x38b   : > { %v2862_v14 = vadd.f32 %v5655_v46, %v2749_v26  ;;  %3154 = vmatmul.f32.gmra.mxu2 %v3080_v32 }
 0x38d   : > { %v2949_v5 = vadd.f32 %v2862_v14, %v5321_v31  ;;  %2685 = vmatmul.f32.gmra.mxu3 %v5305_v43  ;;  %v5743_v31 = vpop.f32.mrf.mxu0  ;;  %v5746_v13 = vpop.f32.mrf.mxu1 }
 0x38f   : > { %v3049_v1 = vadd.f32 %v5687_v41, %v2949_v5 }
 0x390   : > { %v2638_v23 = vpop.f32.mrf.mxu3 }
 0x391   : > { %v2752_v7 = vadd.f32 %v5494_v17, %v2638_v23  ;;  %v3081_v44 = vmax.f32 %v3049_v1, 0.0 }
 0x393   : > { %v2865_v53 = vadd.f32 %v5669_v47, %v2752_v7  ;;  %3157 = vmatmul.f32.gmra.mxu2 %v3081_v44 }
 0x395   : > { %v2950_v46 = vadd.f32 %v2865_v53, %v5345_v10  ;;  %2688 = vmatmul.f32.gmra.mxu3 %v5347_v11  ;;  %v5751_v10 = vpop.f32.mrf.mxu2  ;;  %v5755_v14 = vpop.f32.mrf.mxu0 }
 0x396   : > { %v5758_v5 = vpop.f32.mrf.mxu1 }
 0x397   : > { %v3050_v43 = vadd.f32 %v5687_v41, %v2950_v46 }
 0x398   : > { %v2641_v63 = vpop.f32.mrf.mxu3 }
 0x399   : > { %v2755_v29 = vadd.f32 %v5678_v20, %v2641_v63  ;;  %v3082_v34 = vmax.f32 %v3050_v43, 0.0 }
 0x39b   : > { %v2868_v17 = vadd.f32 %v5680_v62, %v2755_v29  ;;  %3160 = vmatmul.f32.gmra.mxu2 %v3082_v34  ;;  %v6288_v29 = vld [vmem:[#allocation55_spill] sm:$0xff]  ;;  %v6289_v34 = vld [vmem:[#allocation8_spill] sm:$0xff] }
 0x39d   : > { %v2951_v47 = vadd.f32 %v2868_v17, %v5363_v3  ;;  %2691 = vmatmul.f32.gmra.mxu3 %v5349_v60  ;;  %v6286_v60 = vld [vmem:[#allocation52_spill] sm:$0xff]  ;;  %v5765_v7 = vpop.f32.mrf.mxu2  ;;  %v1959_v17 = vadd.f32 %v6289_v34, %v6288_v29  ;;  %v6295_v29 = vld [vmem:[#allocation75_spill] sm:$0xff] }
 0x39e   : > { %v6287_v3 = vld [vmem:[#allocation32_spill] sm:$0xff]  ;;  %v5774_v63 = vpop.f32.mrf.mxu1 }
 0x39f   : > { %v3051_v11 = vadd.f32 %v5687_v41, %v2951_v47  ;;  %v1956_v1 = vadd.f32 %v6287_v3, %v6286_v60 }
 0x3a0   : > { %v2644_v40 = vpop.f32.mrf.mxu3 }
 0x3a1   : > { %v2758_v26 = vadd.f32 %v5694_v58, %v2644_v40  ;;  %v3083_v32 = vmax.f32 %v3051_v11, 0.0  ;;  %v2069_v44 = vadd.f32 %v5552_v45, %v1956_v1  ;;  %v6290_v40 = vld [vmem:[#allocation28_spill] sm:$0xff] }
 0x3a3   : > { %v2871_v20 = vadd.f32 %v5697_v57, %v2758_v26  ;;  %3163 = vmatmul.f32.gmra.mxu2 %v3083_v32  ;;  %v2148_v46 = vadd.f32 %v2069_v44, %v5401_v37 }
 0x3a5   : > { %v2952_v62 = vadd.f32 %v2871_v20, %v5387_v0  ;;  %2694 = vmatmul.f32.gmra.mxu3 %v5389_v2  ;;  %v5771_v0 = vpop.f32.mrf.mxu0  ;;  %v6291_v20 = vld [vmem:[#allocation57_spill] sm:$0xff] }
 0x3a6   : > { %v5792_v1 = vpop.f32.mrf.mxu1 }
 0x3a7   : > { %v3052_v23 = vadd.f32 %v5687_v41, %v2952_v62  ;;  %v6292_v62 = vld [vmem:[#allocation73_spill] sm:$0xff] }
 0x3a8   : > { %v2647_v58 = vpop.f32.mrf.mxu3  ;;  %v1962_v60 = vadd.f32 %v6292_v62, %v6291_v20 }
 0x3a9   : > { %v2761_v53 = vadd.f32 %v5706_v59, %v2647_v58  ;;  %v3084_v57 = vmax.f32 %v3052_v23, 0.0  ;;  %v2072_v59 = vadd.f32 %v5569_v24, %v1959_v17 }
 0x3ab   : > { %v2874_v43 = vadd.f32 %v5709_v51, %v2761_v53  ;;  %3166 = vmatmul.f32.gmra.mxu2 %v3084_v57  ;;  %v5781_v51 = vpop.f32.mrf.mxu2  ;;  %v2149_v26 = vadd.f32 %v2072_v59, %v6290_v40  ;;  %v6293_v57 = vld [vmem:[#allocation35_spill] sm:$0xff] }
 0x3ac   : > { %v6296_v40 = vld [vmem:[#allocation31_spill] sm:$0xff] }
 0x3ad   : > { %v2953_v2 = vadd.f32 %v2874_v43, %v2148_v46  ;;  %2697 = vmatmul.f32.gmra.mxu3 %v5391_v55  ;;  %v5788_v3 = vpop.f32.mrf.mxu0 }
 0x3af   : > { %v3053_v45 = vadd.f32 %v5687_v41, %v2953_v2 }
 0x3b0   : > { %v2650_v47 = vpop.f32.mrf.mxu3 }
 0x3b1   : > { %v2764_v37 = vadd.f32 %v5718_v22, %v2650_v47  ;;  %v3085_v11 = vmax.f32 %v3053_v45, 0.0  ;;  %v2075_v22 = vadd.f32 %v5579_v39, %v1962_v60 }
 0x3b3   : > { %v2877_v32 = vadd.f32 %v5722_v27, %v2764_v37  ;;  %3169 = vmatmul.f32.gmra.mxu2 %v3085_v11  ;;  %v5795_v27 = vld [vmem:[#allocation2] sm:$0xff]  ;;  %v2150_v46 = vadd.f32 %v2075_v22, %v6293_v57  ;;  %v5801_v2 = vpop.f32.mrf.mxu2  ;;  %v2894_v11 = vpop.f32.mrf.mxu1 }
 0x3b4   : > { %v2376_v53 = vrot.slane %v5795_v27, 1  ;;  %v6298_v22 = vld [vmem:[#allocation10_spill] sm:$0xff] }
 0x3b5   : > { %v2954_v55 = vadd.f32 %v2877_v32, %v2149_v26  ;;  %2700 = vmatmul.f32.gmra.mxu3 %v5425_v38  ;;  %v2488_v38 = vrot.slane %v5795_v27, 2  ;;  %v5807_v45 = vpop.f32.mrf.mxu0 }
 0x3b6   : > { %2825 = vmatmul.f32.gmra.mxu0 %v2376_v53 }
 0x3b7   : > { %v3054_v24 = vadd.f32 %v5687_v41, %v2954_v55  ;;  %2938 = vmatmul.f32.gmra.mxu1 %v2488_v38  ;;  %v2252_v55 = vld [vmem:[#allocation2 + $0x1a8] sm:$0x3] }
 0x3b8   : > { %v2653_v23 = vpop.f32.mrf.mxu3  ;;  %v2379_v62 = vrot.slane %v2252_v55, 1  ;;  %v2491_v60 = vrot.slane %v2252_v55, 2  ;;  %v6303_v55 = vld [vmem:[#allocation33_spill] sm:$0xff] }
 0x3b9   : > { %v2767_v58 = vadd.f32 %v5731_v4, %v2653_v23  ;;  %v3086_v44 = vmax.f32 %v3054_v24, 0.0  ;;  %v6294_v4 = vld [vmem:[#allocation59_spill] sm:$0xff]  ;;  %v6297_v24 = vld [vmem:[#allocation61_spill] sm:$0xff] }
 0x3ba   : > { %v1965_v34 = vadd.f32 %v6295_v29, %v6294_v4 }
 0x3bb   : > { %v2880_v43 = vadd.f32 %v5734_v33, %v2767_v58  ;;  %3172 = vmatmul.f32.gmra.mxu2 %v3086_v44  ;;  %v5814_v20 = vpop.f32.mrf.mxu2  ;;  %v2380_v58 = vsel %vm691_vm0, %v2376_v53, %v2379_v62  ;;  %v2492_v44 = vsel %vm804_vm1, %v2488_v38, %v2491_v60  ;;  %v2897_v29 = vpop.f32.mrf.mxu1  ;;  %v6300_v53 = vld [vmem:[#allocation64_spill] sm:$0xff] }
 0x3bc   : > { %v2078_v59 = vadd.f32 %v5595_v12, %v1965_v34  ;;  %v1968_v12 = vadd.f32 %v6298_v22, %v6297_v24 }
 0x3bd   : > { %v2955_v39 = vadd.f32 %v2880_v43, %v2150_v46  ;;  %2703 = vmatmul.f32.gmra.mxu3 %v5427_v52  ;;  %v2784_v46 = vpop.f32.mrf.mxu0  ;;  %v6299_v43 = vld [vmem:[#allocation19_spill] sm:$0xff] }
 0x3be   : > { %v2151_v26 = vadd.f32 %v2078_v59, %v6296_v40  ;;  %2828 = vmatmul.f32.gmra.mxu0 %v2380_v58  ;;  %v6304_v58 = vld [vmem:[#allocation68_spill] sm:$0xff] }
 0x3bf   : > { %v3055_v17 = vadd.f32 %v5687_v41, %v2955_v39  ;;  %2941 = vmatmul.f32.gmra.mxu1 %v2492_v44  ;;  %v6305_v44 = vld [vmem:[#allocation13_spill] sm:$0xff] }
 0x3c0   : > { %v2656_v47 = vpop.f32.mrf.mxu3 }
 0x3c1   : > { %v2770_v33 = vadd.f32 %v5743_v31, %v2656_v47  ;;  %v3087_v37 = vmax.f32 %v3055_v17, 0.0  ;;  %v6301_v17 = vld [vmem:[#allocation11_spill] sm:$0xff] }
 0x3c2   : > { %v1971_v38 = vadd.f32 %v6301_v17, %v6300_v53  ;;  %v6307_v53 = vld [vmem:[#allocation38_spill] sm:$0xff] }
 0x3c3   : > { %v2883_v52 = vadd.f32 %v5746_v13, %v2770_v33  ;;  %3175 = vmatmul.f32.gmra.mxu2 %v3087_v37  ;;  %v2081_v13 = vadd.f32 %v5609_v16, %v1968_v12  ;;  %v5829_v47 = vpop.f32.mrf.mxu2 }
 0x3c4   : > { %v2084_v59 = vadd.f32 %v5623_v25, %v1971_v38 }
 0x3c5   : > { %v2956_v32 = vadd.f32 %v2883_v52, %v2151_v26  ;;  %2706 = vmatmul.f32.gmra.mxu3 %v5461_v48  ;;  %v2152_v39 = vadd.f32 %v2081_v13, %v6299_v43  ;;  %v2787_v26 = vpop.f32.mrf.mxu0  ;;  %v2900_v52 = vpop.f32.mrf.mxu1  ;;  %v1977_v13 = vadd.f32 %v6305_v44, %v6304_v58  ;;  %v6311_v58 = vld [vmem:[#allocation18_spill] sm:$0xff] }
 0x3c6   : > { %v6312_v44 = vld [vmem:[#allocation22_spill] sm:$0xff] }
 0x3c7   : > { %v3056_v31 = vadd.f32 %v5687_v41, %v2956_v32  ;;  %v6302_v32 = vld [vmem:[#allocation66_spill] sm:$0xff] }
 0x3c8   : > { %v2659_v23 = vpop.f32.mrf.mxu3  ;;  %v1974_v62 = vadd.f32 %v6303_v55, %v6302_v32  ;;  %v6310_v32 = vld [vmem:[#allocation17_spill] sm:$0xff] }
 0x3c9   : > { %v2773_v57 = vadd.f32 %v5755_v14, %v2659_v23  ;;  %v3088_v48 = vmax.f32 %v3056_v31, 0.0 }
 0x3ca   : > { %v2087_v25 = vadd.f32 %v5637_v19, %v1974_v62 }
 0x3cb   : > { %v2886_v4 = vadd.f32 %v5758_v5, %v2773_v57  ;;  %3178 = vmatmul.f32.gmra.mxu2 %v3088_v48  ;;  %v2153_v5 = vadd.f32 %v2084_v59, %v5491_v8  ;;  %v5841_v8 = vpop.f32.mrf.mxu2 }
 0x3cd   : > { %v2957_v34 = vadd.f32 %v2886_v4, %v2152_v39  ;;  %2709 = vmatmul.f32.gmra.mxu3 %v5463_v21  ;;  %v2790_v23 = vpop.f32.mrf.mxu0  ;;  %v2903_v19 = vpop.f32.mrf.mxu1 }
 0x3cf   : > { %v3057_v16 = vadd.f32 %v5687_v41, %v2957_v34  ;;  %v6306_v34 = vld [vmem:[#allocation4_spill] sm:$0xff] }
 0x3d0   : > { %v2662_v14 = vpop.f32.mrf.mxu3  ;;  %v1980_v17 = vadd.f32 %v6307_v53, %v6306_v34 }
 0x3d1   : > { %v2776_v33 = vadd.f32 %v5771_v0, %v2662_v14  ;;  %v3089_v37 = vmax.f32 %v3057_v16, 0.0 }
 0x3d2   : > { %v2093_v59 = vadd.f32 %v5663_v50, %v1980_v17  ;;  %v6314_v17 = vld [vmem:[#allocation29_spill] sm:$0xff] }
 0x3d3   : > { %v2889_v40 = vadd.f32 %v5774_v63, %v2776_v33  ;;  %3181 = vmatmul.f32.gmra.mxu2 %v3089_v37  ;;  %v2154_v63 = vadd.f32 %v2087_v25, %v5502_v15  ;;  %v5852_v4 = vpop.f32.mrf.mxu2  ;;  %v6308_v37 = vld [vmem:[#allocation43_spill] sm:$0xff] }
 0x3d5   : > { %v2958_v21 = vadd.f32 %v2889_v40, %v2153_v5  ;;  %2712 = vmatmul.f32.gmra.mxu3 %v5795_v27  ;;  %v2793_v16 = vpop.f32.mrf.mxu0  ;;  %v2156_v5 = vadd.f32 %v2093_v59, %v6308_v37 }
 0x3d7   : > { %v3058_v60 = vadd.f32 %v5687_v41, %v2958_v21  ;;  %v6309_v21 = vld [vmem:[#allocation20_spill] sm:$0xff] }
 0x3d8   : > { %v2665_v24 = vpop.f32.mrf.mxu3  ;;  %v1983_v55 = vadd.f32 %v6310_v32, %v6309_v21 }
 0x3d9   : > { %v2779_v0 = vadd.f32 %v5788_v3, %v2665_v24  ;;  %v3090_v22 = vmax.f32 %v3058_v60, 0.0  ;;  %v2090_v3 = vadd.f32 %v5650_v6, %v1977_v13 }
 0x3da   : > { %v2096_v24 = vadd.f32 %v5675_v30, %v1983_v55  ;;  %v1986_v30 = vadd.f32 %v6312_v44, %v6311_v58 }
 0x3db   : > { %v2892_v12 = vadd.f32 %v5792_v1, %v2779_v0  ;;  %3184 = vmatmul.f32.gmra.mxu2 %v3090_v22  ;;  %v2155_v15 = vadd.f32 %v2090_v3, %v5512_v42  ;;  %v5859_v40 = vpop.f32.mrf.mxu2  ;;  %v5869_v22 = vld [vmem:[%s6054_s6] ss:$0 sm:$0xff] }
 0x3dc   : > { %v2157_v0 = vadd.f32 %v2096_v24, %v5530_v36  ;;  %v2099_v36 = vadd.f32 %v5689_v61, %v1986_v30  ;;  %v6318_v30 = vld [vmem:[#allocation46_spill] sm:$0xff] }
 0x3dd   : > { %v2959_v31 = vadd.f32 %v2892_v12, %v2154_v63  ;;  %2715 = vmatmul.f32.gmra.mxu3 %v5795_v27  ;;  %v2796_v25 = vpop.f32.mrf.mxu0 }
 0x3df   : > { %v3059_v57 = vadd.f32 %v5687_v41, %v2959_v31 }
 0x3e0   : > { %v2668_v48 = vpop.f32.mrf.mxu3 }
 0x3e1   : > { %v2782_v43 = vadd.f32 %v5807_v45, %v2668_v48  ;;  %v3091_v39 = vmax.f32 %v3059_v57, 0.0  ;;  %v2906_v45 = vpop.f32.mrf.mxu1 }
 0x3e3   : > { %v2895_v1 = vadd.f32 %v2894_v11, %v2782_v43  ;;  %3187 = vmatmul.f32.gmra.mxu2 %v3091_v39  ;;  %v6313_v39 = vld [vmem:[#allocation26_spill] sm:$0xff] }
 0x3e5   : > { %v2960_v27 = vadd.f32 %v2895_v1, %v2155_v15  ;;  %v2158_v15 = vadd.f32 %v2099_v36, %v6313_v39  ;;  %v2799_v34 = vpop.f32.mrf.mxu0 }
 0x3e7   : > { %v3060_v38 = vadd.f32 %v5687_v41, %v2960_v27 }
 0x3e8   : > { %v2671_v14 = vpop.f32.mrf.mxu3 }
 0x3e9   : > { %v2785_v6 = vadd.f32 %v2784_v46, %v2671_v14  ;;  %v3092_v33 = vmax.f32 %v3060_v38, 0.0  ;;  %v2909_v63 = vpop.f32.mrf.mxu1  ;;  %v6315_v38 = vld [vmem:[#allocation24_spill] sm:$0xff] }
 0x3ea   : > { %v1989_v14 = vadd.f32 %v6315_v38, %v6314_v17  ;;  %v6321_v38 = vld [vmem:[#allocation47_spill] sm:$0xff] }
 0x3eb   : > { %v2898_v42 = vadd.f32 %v2897_v29, %v2785_v6  ;;  %3190 = vmatmul.f32.gmra.mxu2 %v3092_v33 }
 0x3ec   : > { %v2102_v37 = vadd.f32 %v5702_v35, %v1989_v14 }
 0x3ed   : > { %v2961_v11 = vadd.f32 %v2898_v42, %v2156_v5  ;;  %v3572_v5 = vld [vmem:[%s3717_s15 + $0x8] sm:$0xff] }
 0x3ee   : > { %v2159_v21 = vadd.f32 %v2102_v37, %v5548_v18  ;;  %v3573_v18 = vld [vmem:[%s3717_s15 + $0x10] sm:$0xff] }
 0x3ef   : > { %v3061_v62 = vadd.f32 %v5687_v41, %v2961_v11 }
 0x3f0   : > { %v2674_v60 = vpop.f32.mrf.mxu3 }
 0x3f1   : > { %v2788_v50 = vadd.f32 %v2787_v26, %v2674_v60  ;;  %v3093_v46 = vmax.f32 %v3061_v62, 0.0  ;;  %v2912_v53 = vpop.f32.mrf.mxu1  ;;  %v2802_v60 = vpop.f32.mrf.mxu0 }
 0x3f3   : > { %v2901_v29 = vadd.f32 %v2900_v52, %v2788_v50  ;;  %3193 = vmatmul.f32.gmra.mxu2 %v3093_v46  ;;  %v3571_v52 = vld [vmem:[%s3717_s15] sm:$0xff]  ;;  %v6316_v50 = vld [vmem:[#allocation25_spill] sm:$0xff]  ;;  %v6317_v46 = vld [vmem:[#allocation23_spill] sm:$0xff] }
 0x3f5   : > { %v2962_v12 = vadd.f32 %v2901_v29, %v2157_v0  ;;  %v1992_v0 = vadd.f32 %v6317_v46, %v6316_v50  ;;  %v6324_v50 = vld [vmem:[#allocation42_spill] sm:$0xff] }
 0x3f6   : > { %v3146_v31 = vpop.f32.mrf.mxu2 }
 0x3f7   : > { %v3147_v26 = vadd.f32 %v5869_v22, %v3146_v31  ;;  %v3062_v13 = vadd.f32 %v5687_v41, %v2962_v12  ;;  %v2105_v31 = vadd.f32 %v5714_v28, %v1992_v0 }
 0x3f8   : > { %v2677_v57 = vpop.f32.mrf.mxu3 }
 0x3f9   : > { %v3242_v48 = vadd.f32 %v3571_v52, %v3147_v26  ;;  %v2791_v3 = vadd.f32 %v2790_v23, %v2677_v57  ;;  %v3094_v43 = vmax.f32 %v3062_v13, 0.0  ;;  %v2160_v26 = vadd.f32 %v2105_v31, %v6318_v30 }
 0x3fb   : > { %v3274_v1 = vmax.f32 %v3242_v48, 0.0  ;;  %v2904_v27 = vadd.f32 %v2903_v19, %v2791_v3  ;;  %3196 = vmatmul.f32.gmra.mxu2 %v3094_v43  ;;  %v6319_v48 = vld [vmem:[#allocation7_spill] sm:$0xff]  ;;  %v6320_v3 = vld [vmem:[#allocation21_spill] sm:$0xff] }
 0x3fc   : > { %v1995_v43 = vadd.f32 %v6320_v3, %v6319_v48 }
 0x3fd   : > { %3306 = vst [vmem:[%s5882_s27] sm:$0xff] %v3274_v1  ;;  %v2963_v61 = vadd.f32 %v2904_v27, %v2158_v15  ;;  %v2805_v15 = vpop.f32.mrf.mxu0  ;;  %v3574_v27 = vld [vmem:[%s3717_s15 + $0x18] sm:$0xff] }
 0x3fe   : > { %v3149_v23 = vpop.f32.mrf.mxu2 }
 0x3ff   : > { %v3150_v59 = vadd.f32 %v5869_v22, %v3149_v23  ;;  %v3063_v6 = vadd.f32 %v5687_v41, %v2963_v61 }
 0x400   : > { %v2680_v33 = vpop.f32.mrf.mxu3 }
 0x401   : > { %v3243_v42 = vadd.f32 %v3572_v5, %v3150_v59  ;;  %v2794_v19 = vadd.f32 %v2793_v16, %v2680_v33  ;;  %v3095_v11 = vmax.f32 %v3063_v6, 0.0  ;;  %v2915_v16 = vpop.f32.mrf.mxu1  ;;  %v6322_v5 = vld [vmem:[#allocation70_spill] sm:$0xff] }
 0x403   : > { %v3275_v32 = vmax.f32 %v3243_v42, 0.0  ;;  %v2907_v55 = vadd.f32 %v2906_v45, %v2794_v19  ;;  %3199 = vmatmul.f32.gmra.mxu2 %v3095_v11  ;;  %v6323_v42 = vld [vmem:[#allocation50_spill] sm:$0xff] }
 0x404   : > { %v1998_v19 = vadd.f32 %v6323_v42, %v6322_v5 }
 0x405   : > { %3307 = vst [vmem:[%s5882_s27 + $0x8] sm:$0xff] %v3275_v32  ;;  %v2964_v62 = vadd.f32 %v2907_v55, %v2159_v21  ;;  %v3575_v32 = vld [vmem:[%s3717_s15 + $0x20] sm:$0xff] }
 0x406   : > { %v3152_v24 = vpop.f32.mrf.mxu2 }
 0x407   : > { %v3153_v35 = vadd.f32 %v5869_v22, %v3152_v24  ;;  %v3064_v29 = vadd.f32 %v5687_v41, %v2964_v62  ;;  %v2808_v24 = vpop.f32.mrf.mxu0 }
 0x408   : > { %v2683_v12 = vpop.f32.mrf.mxu3 }
 0x409   : > { %v3244_v58 = vadd.f32 %v3573_v18, %v3153_v35  ;;  %v2797_v45 = vadd.f32 %v2796_v25, %v2683_v12  ;;  %v3096_v44 = vmax.f32 %v3064_v29, 0.0  ;;  %v2108_v25 = vadd.f32 %v5726_v54, %v1995_v43  ;;  %v2918_v17 = vpop.f32.mrf.mxu1  ;;  %v6325_v18 = vld [vmem:[#allocation71_spill] sm:$0xff] }
 0x40b   : > { %v3276_v13 = vmax.f32 %v3244_v58, 0.0  ;;  %v2910_v57 = vadd.f32 %v2909_v63, %v2797_v45  ;;  %3202 = vmatmul.f32.gmra.mxu2 %v3096_v44  ;;  %v2161_v14 = vadd.f32 %v2108_v25, %v6321_v38  ;;  %v6326_v58 = vld [vmem:[#allocation40_spill] sm:$0xff]  ;;  %v6328_v25 = vld [vmem:[#allocation9_spill] sm:$0xff] }
 0x40c   : > { %v2001_v45 = vadd.f32 %v6326_v58, %v6325_v18  ;;  %v3577_v38 = vld [vmem:[%s3717_s15 + $0x30] sm:$0xff] }
 0x40d   : > { %3308 = vst [vmem:[%s5882_s27 + $0x10] sm:$0xff] %v3276_v13  ;;  %v2965_v36 = vadd.f32 %v2910_v57, %v2160_v26  ;;  %v3576_v26 = vld [vmem:[%s3717_s15 + $0x28] sm:$0xff] }
 0x40e   : > { %v3155_v52 = vpop.f32.mrf.mxu2  ;;  %v2114_v30 = vadd.f32 %v5751_v10, %v2001_v45  ;;  %v6334_v45 = vld [vmem:[#allocation79_spill] sm:$0xff] }
 0x40f   : > { %v3156_v39 = vadd.f32 %v5869_v22, %v3155_v52  ;;  %v3065_v28 = vadd.f32 %v5687_v41, %v2965_v36  ;;  %v6327_v36 = vld [vmem:[#allocation51_spill] sm:$0xff]  ;;  %v2811_v43 = vpop.f32.mrf.mxu0 }
 0x410   : > { %v2686_v1 = vpop.f32.mrf.mxu3  ;;  %v2163_v52 = vadd.f32 %v2114_v30, %v6327_v36 }
 0x411   : > { %v3245_v61 = vadd.f32 %v3574_v27, %v3156_v39  ;;  %v2800_v63 = vadd.f32 %v2799_v34, %v2686_v1  ;;  %v3097_v23 = vmax.f32 %v3065_v28, 0.0  ;;  %v2111_v34 = vadd.f32 %v5738_v9, %v1998_v19  ;;  %v2921_v29 = vpop.f32.mrf.mxu1  ;;  %v6329_v27 = vld [vmem:[#allocation5_spill] sm:$0xff] }
 0x413   : > { %v3277_v59 = vmax.f32 %v3245_v61, 0.0  ;;  %v2913_v6 = vadd.f32 %v2912_v53, %v2800_v63  ;;  %3205 = vmatmul.f32.gmra.mxu2 %v3097_v23  ;;  %v2162_v46 = vadd.f32 %v2111_v34, %v6324_v50  ;;  %v2004_v61 = vadd.f32 %v6329_v27, %v6328_v25  ;;  %v6337_v27 = vld [vmem:[#allocation14_spill] sm:$0xff] }
 0x415   : > { %3309 = vst [vmem:[%s5882_s27 + $0x18] sm:$0xff] %v3277_v59  ;;  %v2966_v33 = vadd.f32 %v2913_v6, %v2161_v14  ;;  %v2117_v23 = vadd.f32 %v5765_v7, %v2004_v61  ;;  %v6330_v6 = vld [vmem:[#allocation45_spill] sm:$0xff]  ;;  %v6338_v61 = vld [vmem:[#allocation39_spill] sm:$0xff] }
 0x416   : > { %v3158_v37 = vpop.f32.mrf.mxu2 }
 0x417   : > { %v3159_v54 = vadd.f32 %v5869_v22, %v3158_v37  ;;  %v3066_v11 = vadd.f32 %v5687_v41, %v2966_v33  ;;  %v2164_v33 = vadd.f32 %v2117_v23, %v6330_v6  ;;  %v2814_v19 = vpop.f32.mrf.mxu0 }
 0x418   : > { %v2689_v21 = vpop.f32.mrf.mxu3 }
 0x419   : > { %v3246_v55 = vadd.f32 %v3575_v32, %v3159_v54  ;;  %v2803_v62 = vadd.f32 %v2802_v60, %v2689_v21  ;;  %v3098_v53 = vmax.f32 %v3066_v11, 0.0  ;;  %v2924_v28 = vpop.f32.mrf.mxu1  ;;  %v6331_v11 = vld [vmem:[#allocation77_spill] sm:$0xff] }
 0x41a   : > { %v6332_v21 = vld [vmem:[#allocation37_spill] sm:$0xff] }
 0x41b   : > { %v3278_v0 = vmax.f32 %v3246_v55, 0.0  ;;  %v2916_v35 = vadd.f32 %v2915_v16, %v2803_v62  ;;  %3208 = vmatmul.f32.gmra.mxu2 %v3098_v53  ;;  %v2007_v34 = vadd.f32 %v6332_v21, %v6331_v11  ;;  %v6340_v21 = vld [vmem:[#allocation12_spill] sm:$0xff] }
 0x41d   : > { %3310 = vst [vmem:[%s5882_s27 + $0x20] sm:$0xff] %v3278_v0  ;;  %v2967_v12 = vadd.f32 %v2916_v35, %v2162_v46  ;;  %v2120_v53 = vadd.f32 %v5781_v51, %v2007_v34  ;;  %v6333_v35 = vld [vmem:[#allocation53_spill] sm:$0xff]  ;;  %v6341_v34 = vld [vmem:[#allocation44_spill] sm:$0xff] }
 0x41e   : > { %v3161_v31 = vpop.f32.mrf.mxu2 }
 0x41f   : > { %v3162_v9 = vadd.f32 %v5869_v22, %v3161_v31  ;;  %v3067_v60 = vadd.f32 %v5687_v41, %v2967_v12  ;;  %v2817_v30 = vpop.f32.mrf.mxu0 }
 0x420   : > { %v2692_v44 = vpop.f32.mrf.mxu3 }
 0x421   : > { %v3247_v13 = vadd.f32 %v3576_v26, %v3162_v9  ;;  %v2806_v57 = vadd.f32 %v2805_v15, %v2692_v44  ;;  %v3099_v16 = vmax.f32 %v3067_v60, 0.0  ;;  %v2927_v55 = vpop.f32.mrf.mxu1  ;;  %v6335_v9 = vld [vmem:[#allocation27_spill] sm:$0xff] }
 0x422   : > { %v2010_v60 = vadd.f32 %v6335_v9, %v6334_v45  ;;  %v6343_v9 = vld [vmem:[#allocation15_spill] sm:$0xff] }
 0x423   : > { %v3279_v48 = vmax.f32 %v3247_v13, 0.0  ;;  %v2919_v3 = vadd.f32 %v2918_v17, %v2806_v57  ;;  %3211 = vmatmul.f32.gmra.mxu2 %v3099_v16  ;;  %v3579_v57 = vld [vmem:[%s3717_s15 + $0x40] sm:$0xff] }
 0x424   : > { %v2123_v13 = vadd.f32 %v5801_v2, %v2010_v60  ;;  %v6344_v60 = vld [vmem:[#allocation34_spill] sm:$0xff] }
 0x425   : > { %3311 = vst [vmem:[%s5882_s27 + $0x28] sm:$0xff] %v3279_v48  ;;  %v2968_v39 = vadd.f32 %v2919_v3, %v2163_v52  ;;  %v6336_v3 = vld [vmem:[#allocation54_spill] sm:$0xff] }
 0x426   : > { %v3164_v1 = vpop.f32.mrf.mxu2 }
 0x427   : > { %v3165_v10 = vadd.f32 %v5869_v22, %v3164_v1  ;;  %v3068_v15 = vadd.f32 %v5687_v41, %v2968_v39  ;;  %v2820_v6 = vpop.f32.mrf.mxu0 }
 0x428   : > { %v2695_v63 = vpop.f32.mrf.mxu3 }
 0x429   : > { %v3248_v14 = vadd.f32 %v3577_v38, %v3165_v10  ;;  %v2809_v17 = vadd.f32 %v2808_v24, %v2695_v63  ;;  %v3100_v59 = vmax.f32 %v3068_v15, 0.0  ;;  %v3578_v24 = vld [vmem:[%s3717_s15 + $0x38] sm:$0xff]  ;;  %v2930_v48 = vpop.f32.mrf.mxu1  ;;  %v2013_v10 = vadd.f32 %v6338_v61, %v6337_v27  ;;  %v3580_v38 = vld [vmem:[%s3717_s15 + $0x48] sm:$0xff]  ;;  %v6346_v27 = vld [vmem:[#allocation48_spill] sm:$0xff] }
 0x42b   : > { %v3280_v37 = vmax.f32 %v3248_v14, 0.0  ;;  %v2922_v5 = vadd.f32 %v2921_v29, %v2809_v17  ;;  %3214 = vmatmul.f32.gmra.mxu2 %v3100_v59  ;;  %v2165_v29 = vadd.f32 %v2120_v53, %v6333_v35  ;;  %v2126_v23 = vadd.f32 %v5814_v20, %v2013_v10  ;;  %v3581_v53 = vld [vmem:[%s3717_s15 + $0x50] sm:$0xff] }
 0x42d   : > { %3312 = vst [vmem:[%s5882_s27 + $0x30] sm:$0xff] %v3280_v37  ;;  %v2969_v42 = vadd.f32 %v2922_v5, %v2164_v33  ;;  %v6339_v33 = vld [vmem:[#allocation56_spill] sm:$0xff] }
 0x42e   : > { %v3167_v54 = vpop.f32.mrf.mxu2  ;;  %v2167_v37 = vadd.f32 %v2126_v23, %v6339_v33 }
 0x42f   : > { %v3168_v7 = vadd.f32 %v5869_v22, %v3167_v54  ;;  %v3069_v32 = vadd.f32 %v5687_v41, %v2969_v42 }
 0x430   : > { %v2698_v62 = vpop.f32.mrf.mxu3 }
 0x431   : > { %v3249_v50 = vadd.f32 %v3578_v24, %v3168_v7  ;;  %v2812_v46 = vadd.f32 %v2811_v43, %v2698_v62  ;;  %v3101_v0 = vmax.f32 %v3069_v32, 0.0  ;;  %v2166_v43 = vadd.f32 %v2123_v13, %v6336_v3  ;;  %v3582_v13 = vld [vmem:[%s3717_s15 + $0x58] sm:$0xff] }
 0x432   : > { %v2016_v7 = vadd.f32 %v6341_v34, %v6340_v21  ;;  %v3584_v34 = vld [vmem:[%s3717_s15 + $0x68] sm:$0xff] }
 0x433   : > { %v3281_v12 = vmax.f32 %v3249_v50, 0.0  ;;  %v2925_v31 = vadd.f32 %v2924_v28, %v2812_v46  ;;  %3217 = vmatmul.f32.gmra.mxu2 %v3101_v0  ;;  %v6342_v0 = vld [vmem:[#allocation58_spill] sm:$0xff] }
 0x434   : > { %v2129_v62 = vadd.f32 %v5829_v47, %v2016_v7 }
 0x435   : > { %3313 = vst [vmem:[%s5882_s27 + $0x38] sm:$0xff] %v3281_v12  ;;  %v2970_v18 = vadd.f32 %v2925_v31, %v2165_v29  ;;  %v2823_v31 = vpop.f32.mrf.mxu0 }
 0x436   : > { %v3170_v58 = vpop.f32.mrf.mxu2  ;;  %v2168_v35 = vadd.f32 %v2129_v62, %v6342_v0 }
 0x437   : > { %v3171_v44 = vadd.f32 %v5869_v22, %v3170_v58  ;;  %v3070_v51 = vadd.f32 %v5687_v41, %v2970_v18 }
 0x438   : > { %v2701_v26 = vpop.f32.mrf.mxu3 }
 0x439   : > { %v3250_v16 = vadd.f32 %v3579_v57, %v3171_v44  ;;  %v2815_v36 = vadd.f32 %v2814_v19, %v2701_v26  ;;  %v3102_v52 = vmax.f32 %v3070_v51, 0.0  ;;  %v2933_v19 = vpop.f32.mrf.mxu1  ;;  %v2019_v44 = vadd.f32 %v6344_v60, %v6343_v9 }
 0x43b   : > { %v3282_v39 = vmax.f32 %v3250_v16, 0.0  ;;  %v2928_v28 = vadd.f32 %v2927_v55, %v2815_v36  ;;  %3220 = vmatmul.f32.gmra.mxu2 %v3102_v52  ;;  %v2132_v26 = vadd.f32 %v5841_v8, %v2019_v44 }
 0x43d   : > { %3314 = vst [vmem:[%s5882_s27 + $0x40] sm:$0xff] %v3282_v39  ;;  %v2971_v1 = vadd.f32 %v2928_v28, %v2166_v43  ;;  %v2169_v52 = vadd.f32 %v2132_v26, %v5659_v56  ;;  %v2826_v43 = vpop.f32.mrf.mxu0  ;;  %v3583_v56 = vld [vmem:[%s3717_s15 + $0x60] sm:$0xff] }
 0x43e   : > { %v3173_v25 = vpop.f32.mrf.mxu2 }
 0x43f   : > { %v3174_v2 = vadd.f32 %v5869_v22, %v3173_v25  ;;  %v3071_v15 = vadd.f32 %v5687_v41, %v2971_v1  ;;  %v6345_v25 = vld [vmem:[#allocation41_spill] sm:$0xff] }
 0x440   : > { %v2704_v63 = vpop.f32.mrf.mxu3  ;;  %v2022_v61 = vadd.f32 %v6346_v27, %v6345_v25  ;;  %v3590_v25 = vld [vmem:[%s3717_s15 + $0x98] sm:$0xff] }
 0x441   : > { %v3251_v14 = vadd.f32 %v3580_v38, %v3174_v2  ;;  %v2818_v17 = vadd.f32 %v2817_v30, %v2704_v63  ;;  %v3103_v59 = vmax.f32 %v3071_v15, 0.0  ;;  %v2936_v58 = vpop.f32.mrf.mxu1 }
 0x442   : > { %v2135_v15 = vadd.f32 %v5852_v4, %v2022_v61 }
 0x443   : > { %v3283_v5 = vmax.f32 %v3251_v14, 0.0  ;;  %v2931_v42 = vadd.f32 %v2930_v48, %v2818_v17  ;;  %3223 = vmatmul.f32.gmra.mxu2 %v3103_v59 }
 0x444   : > { %v2170_v14 = vadd.f32 %v2135_v15, %v5667_v49 }
 0x445   : > { %3315 = vst [vmem:[%s5882_s27 + $0x48] sm:$0xff] %v3283_v5  ;;  %v2972_v54 = vadd.f32 %v2931_v42, %v2167_v37  ;;  %v2829_v37 = vpop.f32.mrf.mxu0  ;;  %v6347_v5 = vld [vmem:[#allocation16_spill] sm:$0xff]  ;;  %v6348_v42 = vld [vmem:[#allocation49_spill] sm:$0xff] }
 0x446   : > { %v3176_v11 = vpop.f32.mrf.mxu2 }
 0x447   : > { %v3177_v20 = vadd.f32 %v5869_v22, %v3176_v11  ;;  %v3072_v32 = vadd.f32 %v5687_v41, %v2972_v54 }
 0x448   : > { %v2707_v55 = vpop.f32.mrf.mxu3 }
 0x449   : > { %v3252_v24 = vadd.f32 %v3581_v53, %v3177_v20  ;;  %v2821_v50 = vadd.f32 %v2820_v6, %v2707_v55  ;;  %v3104_v46 = vmax.f32 %v3072_v32, 0.0  ;;  %v2939_v1 = vpop.f32.mrf.mxu1  ;;  %v6349_v55 = vld [vmem:[#allocation60_spill] sm:$0xff] }
 0x44b   : > { %v3284_v29 = vmax.f32 %v3252_v24, 0.0  ;;  %v2934_v12 = vadd.f32 %v2933_v19, %v2821_v50  ;;  %3226 = vmatmul.f32.gmra.mxu2 %v3104_v46  ;;  %v2025_v19 = vadd.f32 %v6348_v42, %v6347_v5 }
 0x44d   : > { %3316 = vst [vmem:[%s5882_s27 + $0x50] sm:$0xff] %v3284_v29  ;;  %v2973_v18 = vadd.f32 %v2934_v12, %v2168_v35  ;;  %v2138_v49 = vadd.f32 %v5859_v40, %v2025_v19  ;;  %v3585_v35 = vld [vmem:[%s3717_s15 + $0x70] sm:$0xff] }
 0x44e   : > { %v3179_v45 = vpop.f32.mrf.mxu2 }
 0x44f   : > { %v3180_v47 = vadd.f32 %v5869_v22, %v3179_v45  ;;  %v3073_v51 = vadd.f32 %v5687_v41, %v2973_v18  ;;  %v2171_v62 = vadd.f32 %v2138_v49, %v6349_v55  ;;  %v3586_v45 = vld [vmem:[%s3717_s15 + $0x78] sm:$0xff] }
 0x450   : > { %v2710_v30 = vpop.f32.mrf.mxu3 }
 0x451   : > { %v3253_v57 = vadd.f32 %v3582_v13, %v3180_v47  ;;  %v2824_v16 = vadd.f32 %v2823_v31, %v2710_v30  ;;  %v3105_v36 = vmax.f32 %v3073_v51, 0.0  ;;  %v2942_v21 = vpop.f32.mrf.mxu1  ;;  %v3587_v47 = vld [vmem:[%s3717_s15 + $0x80] sm:$0xff] }
 0x453   : > { %v3285_v48 = vmax.f32 %v3253_v57, 0.0  ;;  %v2937_v3 = vadd.f32 %v2936_v58, %v2824_v16  ;;  %3229 = vmatmul.f32.gmra.mxu2 %v3105_v36  ;;  %v3588_v57 = vld [vmem:[%s3717_s15 + $0x88] sm:$0xff] }
 0x455   : > { %3317 = vst [vmem:[%s5882_s27 + $0x58] sm:$0xff] %v3285_v48  ;;  %v2974_v39 = vadd.f32 %v2937_v3, %v2169_v52  ;;  %v3589_v3 = vld [vmem:[%s3717_s15 + $0x90] sm:$0xff] }
 0x456   : > { %v3182_v28 = vpop.f32.mrf.mxu2 }
 0x457   : > { %v3183_v8 = vadd.f32 %v5869_v22, %v3182_v28  ;;  %v3074_v10 = vadd.f32 %v5687_v41, %v2974_v39 }
 0x458   : > { %v2713_v2 = vpop.f32.mrf.mxu3 }
 0x459   : > { %v3254_v63 = vadd.f32 %v3583_v56, %v3183_v8  ;;  %v2827_v23 = vadd.f32 %v2826_v43, %v2713_v2  ;;  %v3106_v38 = vmax.f32 %v3074_v10, 0.0  ;;  %v3591_v2 = vld [vmem:[%s3717_s15 + $0xa0] sm:$0xff] }
 0x45b   : > { %v3286_v17 = vmax.f32 %v3254_v63, 0.0  ;;  %v2940_v59 = vadd.f32 %v2939_v1, %v2827_v23  ;;  %3232 = vmatmul.f32.gmra.mxu2 %v3106_v38  ;;  %v3592_v38 = vld [vmem:[%s3717_s15 + $0xa8] sm:$0xff] }
 0x45d   : > { %3318 = vst [vmem:[%s5882_s27 + $0x60] sm:$0xff] %v3286_v17  ;;  %v2975_v6 = vadd.f32 %v2940_v59, %v2170_v14 }
 0x45e   : > { %v3185_v33 = vpop.f32.mrf.mxu2 }
 0x45f   : > { %v3186_v4 = vadd.f32 %v5869_v22, %v3185_v33  ;;  %v3075_v54 = vadd.f32 %v5687_v41, %v2975_v6  ;;  %v3593_v33 = vld [vmem:[%s3717_s15 + $0xb0] sm:$0xff] }
 0x460   : > { %v2716_v11 = vpop.f32.mrf.mxu3 }
 0x461   : > { %v3255_v7 = vadd.f32 %v3584_v34, %v3186_v4  ;;  %v2830_v20 = vadd.f32 %v2829_v37, %v2716_v11  ;;  %v3107_v32 = vmax.f32 %v3075_v54, 0.0  ;;  %v3594_v4 = vld [vmem:[%s3717_s15 + $0xb8] sm:$0xff]  ;;  %v3595_v34 = vld [vmem:[%s3717_s15 + $0xc0] sm:$0xff] }
 0x463   : > { %v3287_v53 = vmax.f32 %v3255_v7, 0.0  ;;  %v2943_v24 = vadd.f32 %v2942_v21, %v2830_v20  ;;  %3235 = vmatmul.f32.gmra.mxu2 %v3107_v32 }
 0x465   : > { %3319 = vst [vmem:[%s5882_s27 + $0x68] sm:$0xff] %v3287_v53  ;;  %v2976_v50 = vadd.f32 %v2943_v24, %v2171_v62  ;;  %v3596_v62 = vld [vmem:[%s3717_s15 + $0xc8] sm:$0xff] }
 0x466   : > { %v3188_v46 = vpop.f32.mrf.mxu2 }
 0x467   : > { %v3189_v0 = vadd.f32 %v5869_v22, %v3188_v46  ;;  %v3076_v40 = vadd.f32 %v5687_v41, %v2976_v50 }
 0x469   : > { %v3256_v29 = vadd.f32 %v3585_v35, %v3189_v0  ;;  %v3108_v12 = vmax.f32 %v3076_v40, 0.0  ;;  %v3597_v0 = vld [vmem:[%s3717_s15 + $0xd0] sm:$0xff] }
 0x46b   : > { %v3288_v31 = vmax.f32 %v3256_v29, 0.0  ;;  %3238 = vmatmul.f32.gmra.mxu2 %v3108_v12 }
 0x46d   : > { %3320 = vst [vmem:[%s5882_s27 + $0x70] sm:$0xff] %v3288_v31  ;;  %v3598_v31 = vld [vmem:[%s3717_s15 + $0xd8] sm:$0xff] }
 0x46e   : > { %v3191_v18 = vpop.f32.mrf.mxu2 }
 0x46f   : > { %v3192_v58 = vadd.f32 %v5869_v22, %v3191_v18 }
 0x471   : > { %v3257_v9 = vadd.f32 %v3586_v45, %v3192_v58 }
 0x473   : > { %v3289_v60 = vmax.f32 %v3257_v9, 0.0 }
 0x475   : > { %3321 = vst [vmem:[%s5882_s27 + $0x78] sm:$0xff] %v3289_v60  ;;  %v3599_v60 = vld [vmem:[%s3717_s15 + $0xe0] sm:$0xff] }
 0x476   : > { %v3194_v44 = vpop.f32.mrf.mxu2 }
 0x477   : > { %v3195_v41 = vadd.f32 %v5869_v22, %v3194_v44 }
 0x479   : > { %v3258_v51 = vadd.f32 %v3587_v47, %v3195_v41 }
 0x47b   : > { %v3290_v30 = vmax.f32 %v3258_v51, 0.0 }
 0x47d   : > { %3322 = vst [vmem:[%s5882_s27 + $0x80] sm:$0xff] %v3290_v30  ;;  %v3600_v30 = vld [vmem:[%s3717_s15 + $0xe8] sm:$0xff] }
 0x47e   : > { %v3197_v26 = vpop.f32.mrf.mxu2 }
 0x47f   : > { %v3198_v13 = vadd.f32 %v5869_v22, %v3197_v26 }
 0x481   : > { %v3259_v16 = vadd.f32 %v3588_v57, %v3198_v13 }
 0x483   : > { %v3291_v36 = vmax.f32 %v3259_v16, 0.0 }
 0x485   : > { %3323 = vst [vmem:[%s5882_s27 + $0x88] sm:$0xff] %v3291_v36  ;;  %v3601_v36 = vld [vmem:[%s3717_s15 + $0xf0] sm:$0xff] }
 0x486   : > { %v3200_v52 = vpop.f32.mrf.mxu2 }
 0x487   : > { %v3201_v48 = vadd.f32 %v5869_v22, %v3200_v52 }
 0x489   : > { %v3260_v43 = vadd.f32 %v3589_v3, %v3201_v48 }
 0x48b   : > { %v3292_v39 = vmax.f32 %v3260_v43, 0.0 }
 0x48d   : > { %3324 = vst [vmem:[%s5882_s27 + $0x90] sm:$0xff] %v3292_v39  ;;  %v3602_v39 = vld [vmem:[%s3717_s15 + $0xf8] sm:$0xff] }
 0x48e   : > { %v3203_v28 = vpop.f32.mrf.mxu2 }
 0x48f   : > { %v3204_v1 = vadd.f32 %v5869_v22, %v3203_v28 }
 0x491   : > { %v3261_v27 = vadd.f32 %v3590_v25, %v3204_v1 }
 0x493   : > { %v3293_v61 = vmax.f32 %v3261_v27, 0.0 }
 0x495   : > { %3325 = vst [vmem:[%s5882_s27 + $0x98] sm:$0xff] %v3293_v61 }
 0x496   : > { %v3206_v8 = vpop.f32.mrf.mxu2 }
 0x497   : > { %v3207_v10 = vadd.f32 %v5869_v22, %v3206_v8 }
 0x499   : > { %v3262_v15 = vadd.f32 %v3591_v2, %v3207_v10 }
 0x49b   : > { %v3294_v56 = vmax.f32 %v3262_v15, 0.0 }
 0x49d   : > { %3326 = vst [vmem:[%s5882_s27 + $0xa0] sm:$0xff] %v3294_v56 }
 0x49e   : > { %v3209_v63 = vpop.f32.mrf.mxu2 }
 0x49f   : > { %v3210_v23 = vadd.f32 %v5869_v22, %v3209_v63 }
 0x4a1   : > { %v3263_v14 = vadd.f32 %v3592_v38, %v3210_v23 }
 0x4a3   : > { %v3295_v17 = vmax.f32 %v3263_v14, 0.0 }
 0x4a5   : > { %3327 = vst [vmem:[%s5882_s27 + $0xa8] sm:$0xff] %v3295_v17 }
 0x4a6   : > { %v3212_v59 = vpop.f32.mrf.mxu2 }
 0x4a7   : > { %v3213_v6 = vadd.f32 %v5869_v22, %v3212_v59 }
 0x4a9   : > { %v3264_v37 = vadd.f32 %v3593_v33, %v3213_v6 }
 0x4ab   : > { %v3296_v5 = vmax.f32 %v3264_v37, 0.0 }
 0x4ad   : > { %3328 = vst [vmem:[%s5882_s27 + $0xb0] sm:$0xff] %v3296_v5 }
 0x4ae   : > { %v3215_v42 = vpop.f32.mrf.mxu2 }
 0x4af   : > { %v3216_v19 = vadd.f32 %v5869_v22, %v3215_v42 }
 0x4b1   : > { %v3265_v54 = vadd.f32 %v3594_v4, %v3216_v19 }
 0x4b3   : > { %v3297_v11 = vmax.f32 %v3265_v54, 0.0 }
 0x4b5   : > { %3329 = vst [vmem:[%s5882_s27 + $0xb8] sm:$0xff] %v3297_v11 }
 0x4b6   : > { %v3218_v21 = vpop.f32.mrf.mxu2 }
 0x4b7   : > { %v3219_v49 = vadd.f32 %v5869_v22, %v3218_v21 }
 0x4b9   : > { %v3266_v7 = vadd.f32 %v3595_v34, %v3219_v49 }
 0x4bb   : > { %v3298_v20 = vmax.f32 %v3266_v7, 0.0 }
 0x4bd   : > { %3330 = vst [vmem:[%s5882_s27 + $0xc0] sm:$0xff] %v3298_v20 }
 0x4be   : > { %v3221_v32 = vpop.f32.mrf.mxu2 }
 0x4bf   : > { %v3222_v55 = vadd.f32 %v5869_v22, %v3221_v32 }
 0x4c1   : > { %v3267_v53 = vadd.f32 %v3596_v62, %v3222_v55 }
 0x4c3   : > { %v3299_v24 = vmax.f32 %v3267_v53, 0.0 }
 0x4c5   : > { %3331 = vst [vmem:[%s5882_s27 + $0xc8] sm:$0xff] %v3299_v24 }
 0x4c6   : > { %v3224_v50 = vpop.f32.mrf.mxu2 }
 0x4c7   : > { %v3225_v46 = vadd.f32 %v5869_v22, %v3224_v50 }
 0x4c9   : > { %v3268_v40 = vadd.f32 %v3597_v0, %v3225_v46 }
 0x4cb   : > { %v3300_v35 = vmax.f32 %v3268_v40, 0.0 }
 0x4cd   : > { %3332 = vst [vmem:[%s5882_s27 + $0xd0] sm:$0xff] %v3300_v35 }
 0x4ce   : > { %v3227_v29 = vpop.f32.mrf.mxu2 }
 0x4cf   : > { %v3228_v12 = vadd.f32 %v5869_v22, %v3227_v29 }
 0x4d1   : > { %v3269_v18 = vadd.f32 %v3598_v31, %v3228_v12 }
 0x4d3   : > { %v3301_v58 = vmax.f32 %v3269_v18, 0.0 }
 0x4d5   : > { %3333 = vst [vmem:[%s5882_s27 + $0xd8] sm:$0xff] %v3301_v58 }
 0x4d6   : > { %v3230_v45 = vpop.f32.mrf.mxu2 }
 0x4d7   : > { %v3231_v9 = vadd.f32 %v5869_v22, %v3230_v45 }
 0x4d9   : > { %v3270_v44 = vadd.f32 %v3599_v60, %v3231_v9 }
 0x4db   : > { %v3302_v41 = vmax.f32 %v3270_v44, 0.0 }
 0x4dd   : > { %3334 = vst [vmem:[%s5882_s27 + $0xe0] sm:$0xff] %v3302_v41 }
 0x4de   : > { %v3233_v47 = vpop.f32.mrf.mxu2 }
 0x4df   : > { %v3234_v51 = vadd.f32 %v5869_v22, %v3233_v47 }
 0x4e1   : > { %v3271_v26 = vadd.f32 %v3600_v30, %v3234_v51 }
 0x4e3   : > { %v3303_v13 = vmax.f32 %v3271_v26, 0.0 }
 0x4e5   : > { %3335 = vst [vmem:[%s5882_s27 + $0xe8] sm:$0xff] %v3303_v13 }
 0x4e6   : > { %v3236_v57 = vpop.f32.mrf.mxu2 }
 0x4e7   : > { %v3237_v16 = vadd.f32 %v5869_v22, %v3236_v57 }
 0x4e9   : > { %v3272_v52 = vadd.f32 %v3601_v36, %v3237_v16 }
 0x4eb   : > { %v3304_v48 = vmax.f32 %v3272_v52, 0.0 }
 0x4ed   : > { %3336 = vst [vmem:[%s5882_s27 + $0xf0] sm:$0xff] %v3304_v48 }
 0x4ee   : > { %v3239_v3 = vpop.f32.mrf.mxu2 }
 0x4ef   : > { %v3240_v43 = vadd.f32 %v5869_v22, %v3239_v3 }
 0x4f1   : > { %v3273_v28 = vadd.f32 %v3602_v39, %v3240_v43 }
 0x4f3   : > { %v3305_v1 = vmax.f32 %v3273_v28, 0.0 }
 0x4f5   : > { %3337 = vst [vmem:[%s5882_s27 + $0xf8] sm:$0xff] %v3305_v1 }
 0x4f6 PF: > { %s17_s24 = sadd.s32 1, %s3609_s24  }
 0x4f7   : > { %p14_p4 = scmp.ge.s32.totalorder %s17_s24, 4  }
 0x4f9   :  { %16 = sbr.rel (!%p14_p4) target bundleno = 1 (0x1), region = 82 }

</bundles_post_ra>
